<compile_context>
chip_gen: v7x
topology: tpu7x:2x2x1
jax: 0.10.0
libtpu: 0.0.40
codegen_flags: <defaults>
</compile_context>

<pallas_src>
import math
import functools

import jax
import jax.numpy as jnp
from jax.experimental import pallas as pl
from jax.experimental.pallas import tpu as pltpu


# ---------------------------------------------------------------------------
# Generation-aware VMEM budget
# ---------------------------------------------------------------------------

def _vmem_limit_bytes():
    try:
        cap = int(pltpu.get_tpu_info().vmem_capacity_bytes)
    except Exception:
        cap = 64 * 1024 * 1024          # conservative fallback (v7x-sized)
    if cap >= 120 * 1024 * 1024:        # v5e / v6e: 128 MiB physical
        return 96 * 1024 * 1024
    # v7x: 64 MiB physical -> leave ~20 MiB headroom for compiler scratch
    return max(cap - 20 * 1024 * 1024, 32 * 1024 * 1024)


_VMEM_LIMIT = _vmem_limit_bytes()

# bf16 weights at or below this stay fully resident in VMEM (constant-index
# block, fetched once).  8 MiB keeps worst-case double-buffering well inside
# v7x's 64 MiB even with tm=1024 activations.
_WEIGHT_RESIDENT_BYTES = 8 * 1024 * 1024


# ---------------------------------------------------------------------------
# Tile selection helper
# ---------------------------------------------------------------------------

def _pick_tile(dim, target, quantum):
    """Largest quantum-aligned tile <= target that evenly divides dim, else dim."""
    if dim <= target:
        return dim
    t = (target // quantum) * quantum
    while t >= quantum:
        if dim % t == 0:
            return t
        t -= quantum
    return dim


# ---------------------------------------------------------------------------
# Pallas kernels
# ---------------------------------------------------------------------------

def _ln_matmul_kernel(*refs, apply_gelu, has_bias):
    """Fused LayerNorm (f32) -> bf16 matmul (+bias) (+tanh-GELU).

    Grid is (M tiles, N tiles); the LN + bf16 cast is hoisted into a (tm, C)
    bf16 scratch and only recomputed when the N index is 0.
    """
    if has_bias:
        x_ref, g_ref, b_ref, w_ref, bias_ref, o_ref, xn_ref = refs
    else:
        x_ref, g_ref, b_ref, w_ref, o_ref, xn_ref = refs
        bias_ref = None

    @pl.when(pl.program_id(1) == 0)
    def _layernorm():
        x = x_ref[...]                                      # (tm, C) f32 residual
        mean = jnp.mean(x, axis=-1, keepdims=True)
        xc = x - mean
        var = jnp.mean(xc * xc, axis=-1, keepdims=True)
        xn = xc * jax.lax.rsqrt(var + 1e-5) * g_ref[...] + b_ref[...]
        xn_ref[...] = xn.astype(jnp.bfloat16)

    acc = jnp.dot(xn_ref[...], w_ref[...],
                  preferred_element_type=jnp.float32)       # (tm, tn) f32
    if has_bias:
        acc = acc + bias_ref[...]
    if apply_gelu:
        c = 0.7978845608028654                              # sqrt(2/pi)
        acc = 0.5 * acc * (1.0 + jnp.tanh(c * (acc + 0.044715 * acc * acc * acc)))
    o_ref[...] = acc.astype(o_ref.dtype)


def _linear_bias_res_kernel(x_ref, w_ref, bias_ref, res_ref, o_ref, acc_ref):
    """Tiled matmul with K-reduction accumulator; bias + residual fused at finalize."""
    k = pl.program_id(2)

    @pl.when(k == 0)
    def _init():
        acc_ref[...] = jnp.zeros(acc_ref.shape, acc_ref.dtype)

    acc_ref[...] += jnp.dot(x_ref[...], w_ref[...],
                            preferred_element_type=jnp.float32)

    @pl.when(k == pl.num_programs(2) - 1)
    def _finalize():
        o_ref[...] = (acc_ref[...] + bias_ref[...] + res_ref[...]).astype(o_ref.dtype)


def _flash_attn_kernel(q_ref, k_ref, v_ref, o_ref, m_sc, l_sc, acc_sc, *,
                       heads_per_group, head_dim, scale, tq, tkv):
    """Flash-style causal attention over a KV grid axis (online softmax).

    Grid: (B, head_groups, Tq tiles, Tkv tiles).  q/k/v blocks are lane-dense
    (tq|tkv, C/groups) slices of the (B, T, 3C) qkv slab.
    """
    qi = pl.program_id(2)
    ki = pl.program_id(3)

    @pl.when(ki == 0)
    def _init():
        m_sc[...] = jnp.full(m_sc.shape, -jnp.inf, m_sc.dtype)
        l_sc[...] = jnp.zeros(l_sc.shape, l_sc.dtype)
        acc_sc[...] = jnp.zeros(acc_sc.shape, acc_sc.dtype)

    # Skip KV tiles that lie strictly above the causal diagonal.
    @pl.when(ki * tkv <= qi * tq + (tq - 1))
    def _compute():
        row = qi * tq + jax.lax.broadcasted_iota(jnp.int32, (tq, tkv), 0)
        col = ki * tkv + jax.lax.broadcasted_iota(jnp.int32, (tq, tkv), 1)
        causal = col <= row

        q_all = q_ref[0]                                    # (tq,  Cg) bf16
        k_all = k_ref[0]                                    # (tkv, Cg) bf16
        v_all = v_ref[0]                                    # (tkv, Cg) bf16

        # NOTE: head_dim < 128 under-utilizes MXU lanes on v6e/v7x; acceptable
        # since attention FLOPs are small vs the projections at GPT-2 scale.
        for h in range(heads_per_group):
            sl = slice(h * head_dim, (h + 1) * head_dim)
            # fold 1/sqrt(Dh) into q (T*Dh work instead of T*T)
            q = (q_all[:, sl].astype(jnp.float32) * scale).astype(jnp.bfloat16)
            s = jax.lax.dot_general(q, k_all[:, sl], (((1,), (1,)), ((), ())),
                                    preferred_element_type=jnp.float32)
            s = jnp.where(causal, s, -1e30)                 # finite mask: no NaNs

            m_prev = m_sc[h]                                # (tq, 1) f32
            m_new = jnp.maximum(m_prev, jnp.max(s, axis=-1, keepdims=True))
            alpha = jnp.exp(m_prev - m_new)
            p = jnp.exp(s - m_new)
            l_sc[h] = alpha * l_sc[h] + jnp.sum(p, axis=-1, keepdims=True)
            acc_sc[h] = alpha * acc_sc[h] + jnp.dot(
                p.astype(jnp.bfloat16), v_all[:, sl],
                preferred_element_type=jnp.float32)
            m_sc[h] = m_new

    @pl.when(ki == pl.num_programs(3) - 1)
    def _finalize():
        outs = []
        for h in range(heads_per_group):
            inv = pl.reciprocal(l_sc[h], approx=True)
            outs.append((acc_sc[h] * inv).astype(o_ref.dtype))  # bf16 before concat
        o_ref[0] = jnp.concatenate(outs, axis=-1)


# ---------------------------------------------------------------------------
# pallas_call wrappers
# ---------------------------------------------------------------------------

def pallas_ln_linear(x, g, b, w, bias=None, *, apply_gelu=False,
                     out_dtype=jnp.bfloat16, tm_target=1024, tn_target=1024):
    """out = [GELU]( LN(x) @ W (+ bias) ).  x f32 (M,C), W bf16 (C,N)."""
    M, C = x.shape
    N = w.shape[1]
    tm = _pick_tile(M, tm_target, 8)
    if C * N * 2 <= _WEIGHT_RESIDENT_BYTES:
        tn = N                                   # whole weight resident in VMEM
    else:
        tn = _pick_tile(N, tn_target, 128)
    grid = (M // tm, N // tn)
    has_bias = bias is not None

    in_specs = [
        pl.BlockSpec((tm, C), lambda i, j: (i, 0)),
        pl.BlockSpec((1, C), lambda i, j: (0, 0)),
        pl.BlockSpec((1, C), lambda i, j: (0, 0)),
        pl.BlockSpec((C, tn), lambda i, j: (0, j)),
    ]
    args = [x, g.reshape(1, C), b.reshape(1, C), w]
    if has_bias:
        in_specs.append(pl.BlockSpec((1, tn), lambda i, j: (0, j)))
        args.append(bias.reshape(1, N))

    out_itemsize = jnp.dtype(out_dtype).itemsize
    cost = pl.CostEstimate(
        flops=int(2 * M * C * N),
        transcendentals=int(M * N if apply_gelu else 0),
        bytes_accessed=int(M * C * 4 + (M // tm) * C * N * 2 + M * N * out_itemsize),
    )
    return pl.pallas_call(
        functools.partial(_ln_matmul_kernel, apply_gelu=apply_gelu,
                          has_bias=has_bias),
        grid=grid,
        in_specs=in_specs,
        out_specs=pl.BlockSpec((tm, tn), lambda i, j: (i, j)),
        out_shape=jax.ShapeDtypeStruct((M, N), out_dtype),
        scratch_shapes=[pltpu.VMEM((tm, C), jnp.bfloat16)],   # hoisted LN(x)
        compiler_params=pltpu.CompilerParams(
            dimension_semantics=("parallel", "arbitrary"),
            vmem_limit_bytes=_VMEM_LIMIT),
        cost_estimate=cost,
    )(*args)


def pallas_linear_bias_residual(x, w, bias, res, *,
                                tm_target=512, tn_target=512, tk_target=1024):
    """out = x @ W + bias + res, tiled (M,N,K) with f32 VMEM accumulator.

    Small weights stay resident in VMEM (tn=N, tk=K -> constant weight block).
    """
    M, K = x.shape
    N = w.shape[1]
    tm = _pick_tile(M, tm_target, 8)
    if K * N * 2 <= _WEIGHT_RESIDENT_BYTES:
        tn, tk = N, K                            # whole weight resident in VMEM
    else:
        tn = _pick_tile(N, tn_target, 128)
        tk = _pick_tile(K, tk_target, 128)
    grid = (M // tm, N // tn, K // tk)

    cost = pl.CostEstimate(
        flops=int(2 * M * K * N),
        transcendentals=0,
        bytes_accessed=int(M * K * 2 + (M // tm) * K * N * 2 + 2 * M * N * 4 + N * 4),
    )
    return pl.pallas_call(
        _linear_bias_res_kernel,
        grid=grid,
        in_specs=[
            pl.BlockSpec((tm, tk), lambda i, j, k: (i, k)),
            pl.BlockSpec((tk, tn), lambda i, j, k: (k, j)),
            pl.BlockSpec((1, tn), lambda i, j, k: (0, j)),
            pl.BlockSpec((tm, tn), lambda i, j, k: (i, j)),
        ],
        out_specs=pl.BlockSpec((tm, tn), lambda i, j, k: (i, j)),
        out_shape=jax.ShapeDtypeStruct((M, N), res.dtype),
        scratch_shapes=[pltpu.VMEM((tm, tn), jnp.float32)],
        compiler_params=pltpu.CompilerParams(
            dimension_semantics=("parallel", "parallel", "arbitrary"),
            vmem_limit_bytes=_VMEM_LIMIT),
        cost_estimate=cost,
    )(x, w, bias.reshape(1, N), res)


def pallas_attention(qkv, n_heads, *, tq_target=256, tkv_target=256):
    """Causal flash attention.  qkv: (B, T, 3C) bf16 -> (B, T, C) bf16."""
    B, T, threeC = qkv.shape
    C = threeC // 3
    Dh = C // n_heads

    # Head-group grid axis: largest G dividing n_heads with lane-aligned C/G.
    G = 1
    for cand in range(n_heads, 0, -1):
        if n_heads % cand == 0 and (C // cand) % 128 == 0:
            G = cand
            break
    Cg = C // G
    hpg = n_heads // G

    tq = _pick_tile(T, tq_target, 8)
    tkv = _pick_tile(T, tkv_target, 128)
    nq, nkv = T // tq, T // tkv

    cost = pl.CostEstimate(
        flops=int(4 * B * n_heads * T * T * Dh),
        transcendentals=int(B * n_heads * T * T),
        bytes_accessed=int(B * T * C * 2 + 2 * B * T * C * 2 * nq + B * T * C * 2),
    )
    return pl.pallas_call(
        functools.partial(_flash_attn_kernel, heads_per_group=hpg, head_dim=Dh,
                          scale=1.0 / math.sqrt(Dh), tq=tq, tkv=tkv),
        grid=(B, G, nq, nkv),
        in_specs=[
            pl.BlockSpec((1, tq, Cg), lambda b, g, qi, ki: (b, qi, g)),
            pl.BlockSpec((1, tkv, Cg), lambda b, g, qi, ki: (b, ki, G + g)),
            pl.BlockSpec((1, tkv, Cg), lambda b, g, qi, ki: (b, ki, 2 * G + g)),
        ],
        out_specs=pl.BlockSpec((1, tq, Cg), lambda b, g, qi, ki: (b, qi, g)),
        out_shape=jax.ShapeDtypeStruct((B, T, C), jnp.bfloat16),
        scratch_shapes=[
            pltpu.VMEM((hpg, tq, 1), jnp.float32),    # running max
            pltpu.VMEM((hpg, tq, 1), jnp.float32),    # running denom
            pltpu.VMEM((hpg, tq, Dh), jnp.float32),   # running output acc
        ],
        compiler_params=pltpu.CompilerParams(
            dimension_semantics=("parallel", "parallel", "parallel", "arbitrary"),
            vmem_limit_bytes=_VMEM_LIMIT),
        cost_estimate=cost,
    )(qkv, qkv, qkv)


# ---------------------------------------------------------------------------
# GPT forward (Pallas kernels + minimal JAX glue)
# ---------------------------------------------------------------------------

def gpt_forward(params, idx, n_heads):
    B, T = idx.shape
    vocab, C = params["wte"].shape

    # embedding gathers / add left to XLA
    tok_emb = params["wte"][idx]                       # (B, T, C)
    pos_emb = params["wpe"][:T]                        # (T, C)
    x = (tok_emb + pos_emb).reshape(B * T, C).astype(jnp.float32)  # f32 residual

    for blk in params["blocks"]:
        # --- attention sub-block: fused LN1 + qkv projection ---
        qkv = pallas_ln_linear(x, blk["ln1_g"], blk["ln1_b"],
                               blk["attn_w"], blk["attn_b"])        # (M, 3C) bf16
        y = pallas_attention(qkv.reshape(B, T, 3 * C), n_heads)     # (B, T, C) bf16
        x = pallas_linear_bias_residual(y.reshape(B * T, C),
                                        blk["attn_proj_w"], blk["attn_proj_b"], x)

        # --- MLP sub-block: fused LN2 + fc + GELU, then proj with fused residual ---
        h = pallas_ln_linear(x, blk["ln2_g"], blk["ln2_b"],
                             blk["fc_w"], blk["fc_b"], apply_gelu=True)  # (M, 4C) bf16
        x = pallas_linear_bias_residual(h, blk["proj_w"], blk["proj_b"], x)

    # final LN fused into the (bias-free, vocab-padded) tied lm_head
    logits = pallas_ln_linear(x, params["lnf_g"], params["lnf_b"],
                              params["lm_head_w"], None,
                              out_dtype=jnp.float32)
    logits = logits[:, :vocab]                          # drop padding columns
    return logits.reshape(B, T, vocab)


# ---------------------------------------------------------------------------
# Reference forwards (pure JAX, mirror the kernels' bf16 quantization points)
# ---------------------------------------------------------------------------

def _attention_reference(qkv, n_heads):
    B, T, threeC = qkv.shape
    C = threeC // 3
    Dh = C // n_heads
    qkv = qkv.astype(jnp.float32)
    q, k, v = jnp.split(qkv, 3, axis=-1)
    q = q.reshape(B, T, n_heads, Dh).transpose(0, 2, 1, 3)
    k = k.reshape(B, T, n_heads, Dh).transpose(0, 2, 1, 3)
    v = v.reshape(B, T, n_heads, Dh).transpose(0, 2, 1, 3)
    qs = (q * (1.0 / math.sqrt(Dh))).astype(jnp.bfloat16)
    s = jnp.einsum("bhqd,bhkd->bhqk", qs, k.astype(jnp.bfloat16),
                   preferred_element_type=jnp.float32)
    mask = jnp.tril(jnp.ones((T, T), bool))
    s = jnp.where(mask, s, -1e30)
    p = jax.nn.softmax(s, axis=-1)
    y = jnp.einsum("bhqk,bhkd->bhqd", p.astype(jnp.bfloat16), v.astype(jnp.bfloat16),
                   preferred_element_type=jnp.float32)
    return y.transpose(0, 2, 1, 3).reshape(B, T, C)


def ref_forward(params, idx, n_heads):
    B, T = idx.shape
    vocab, C = params["wte"].shape

    def ln(x, g, b):
        mu = jnp.mean(x, axis=-1, keepdims=True)
        var = jnp.mean((x - mu) ** 2, axis=-1, keepdims=True)
        return (x - mu) * jax.lax.rsqrt(var + 1e-5) * g + b

    def mm(a, w):
        return jnp.dot(a.astype(jnp.bfloat16), w.astype(jnp.bfloat16),
                       preferred_element_type=jnp.float32)

    def gelu(x):
        c = 0.7978845608028654
        return 0.5 * x * (1.0 + jnp.tanh(c * (x + 0.044715 * x ** 3)))

    x = params["wte"][idx] + params["wpe"][:T]          # (B, T, C) f32
    for blk in params["blocks"]:
        h = ln(x, blk["ln1_g"], blk["ln1_b"])
        qkv = mm(h.reshape(B * T, C), blk["attn_w"]) + blk["attn_b"]
        qkv = qkv.astype(jnp.bfloat16).reshape(B, T, 3 * C)
        y = _attention_reference(qkv, n_heads).reshape(B * T, C)
        x = x + (mm(y, blk["attn_proj_w"]) + blk["attn_proj_b"]).reshape(B, T, C)

        h = ln(x, blk["ln2_g"], blk["ln2_b"])
        m = gelu(mm(h.reshape(B * T, C), blk["fc_w"]) + blk["fc_b"])
        x = x + (mm(m, blk["proj_w"]) + blk["proj_b"]).reshape(B, T, C)

    x = ln(x, params["lnf_g"], params["lnf_b"])
    logits = mm(x.reshape(B * T, C), params["lm_head_w"][:, :vocab])
    return logits.reshape(B, T, vocab)


# ---------------------------------------------------------------------------
# Deterministic parameter construction (mirrors GPT._init_weights)
# ---------------------------------------------------------------------------

def init_params(key, *, vocab_size, block_size, n_embed, n_layers):
    std = 0.02
    res_std = 0.02 * (2.0 * n_layers) ** (-0.5)
    keys = iter(jax.random.split(key, 4 + 4 * n_layers))

    def nrm(shape, s):
        return (s * jax.random.normal(next(keys), shape)).astype(jnp.float32)

    C = n_embed
    params = {
        "wte": nrm((vocab_size, C), std),        # tied with lm_head
        "wpe": nrm((block_size, C), std),
        "lnf_g": jnp.ones((C,), jnp.float32),
        "lnf_b": jnp.zeros((C,), jnp.float32),
        "blocks": [],
    }
    for _ in range(n_layers):
        params["blocks"].append({
            "ln1_g": jnp.ones((C,), jnp.float32),
            "ln1_b": jnp.zeros((C,), jnp.float32),
            "attn_w": nrm((C, 3 * C), std),       # stored (in, out)
            "attn_b": jnp.zeros((3 * C,), jnp.float32),
            "attn_proj_w": nrm((C, C), res_std),  # RESIDUAL_SCALE_INIT
            "attn_proj_b": jnp.zeros((C,), jnp.float32),
            "ln2_g": jnp.ones((C,), jnp.float32),
            "ln2_b": jnp.zeros((C,), jnp.float32),
            "fc_w": nrm((C, 4 * C), std),
            "fc_b": jnp.zeros((4 * C,), jnp.float32),
            "proj_w": nrm((4 * C, C), res_std),   # RESIDUAL_SCALE_INIT
            "proj_b": jnp.zeros((C,), jnp.float32),
        })
    return params


def prepare_fwd_params(p):
    """Forward-pass layout: bf16 matmul weights, tied lm_head built/padded once."""
    vocab, C = p["wte"].shape
    lm_w = p["wte"].T.astype(jnp.bfloat16)                  # (C, vocab), tied
    n_pad = (-vocab) % 128                                   # lane-align vocab
    if n_pad:
        lm_w = jnp.pad(lm_w, ((0, 0), (0, n_pad)))
    out = {
        "wte": p["wte"],
        "wpe": p["wpe"],
        "lnf_g": p["lnf_g"],
        "lnf_b": p["lnf_b"],
        "lm_head_w": lm_w,
        "blocks": [],
    }
    for blk in p["blocks"]:
        out["blocks"].append({
            "ln1_g": blk["ln1_g"], "ln1_b": blk["ln1_b"],
            "attn_w": blk["attn_w"].astype(jnp.bfloat16),
            "attn_b": blk["attn_b"],
            "attn_proj_w": blk["attn_proj_w"].astype(jnp.bfloat16),
            "attn_proj_b": blk["attn_proj_b"],
            "ln2_g": blk["ln2_g"], "ln2_b": blk["ln2_b"],
            "fc_w": blk["fc_w"].astype(jnp.bfloat16),
            "fc_b": blk["fc_b"],
            "proj_w": blk["proj_w"].astype(jnp.bfloat16),
            "proj_b": blk["proj_b"],
        })
    return out


# ---------------------------------------------------------------------------
# Main
# ---------------------------------------------------------------------------

if __name__ == "__main__":
    VOCAB = 256
    BLOCK = 32
    N_EMBED = 128
    N_HEADS = 4
    N_LAYERS = 2
    B, T = 2, 16

    root = jax.random.PRNGKey(0)
    k_params, k_idx, k_attn = jax.random.split(root, 3)
    raw = init_params(k_params, vocab_size=VOCAB, block_size=BLOCK,
                      n_embed=N_EMBED, n_layers=N_LAYERS)
    params = prepare_fwd_params(raw)
    idx = jax.random.randint(k_idx, (B, T), 0, VOCAB, dtype=jnp.int32)

    # --- full GPT forward ---
    fwd = jax.jit(functools.partial(gpt_forward, n_heads=N_HEADS))
    logits = jax.block_until_ready(fwd(params, idx))

    ref = ref_forward(params, idx, N_HEADS)
    assert logits.shape == (B, T, VOCAB), logits.shape
    err = float(jnp.max(jnp.abs(logits - ref)))
    scale = float(jnp.max(jnp.abs(ref)))
    assert err <= 2e-2 * max(scale, 1.0), (err, scale)

    # --- secondary check: exercise the multi-tile flash (online-softmax) path ---
    Bq, Tq, Cq, Hq = 1, 256, 128, 4
    qkv_t = jax.random.normal(k_attn, (Bq, Tq, 3 * Cq),
                              dtype=jnp.float32).astype(jnp.bfloat16)
    attn_fn = jax.jit(functools.partial(pallas_attention, n_heads=Hq,
                                        tq_target=128, tkv_target=128))
    y_ker = jax.block_until_ready(attn_fn(qkv_t))
    y_ref = _attention_reference(qkv_t, Hq)
    aerr = float(jnp.max(jnp.abs(y_ker.astype(jnp.float32) - y_ref)))
    ascale = float(jnp.max(jnp.abs(y_ref)))
    assert aerr <= 5e-2 * max(ascale, 1.0), (aerr, ascale)

    print("KERNEL_OK")
</pallas_src>

<mosaic_0001>
module attributes {stable_mosaic.version = 11 : i64} {
  func.func @_ln_matmul_kernel(%arg0: i32, %arg1: i32, %arg2: memref<32x128xf32, #tpu.memory_space<vmem>>, %arg3: memref<1x128xf32, #tpu.memory_space<vmem>>, %arg4: memref<1x128xf32, #tpu.memory_space<vmem>>, %arg5: memref<128x384xbf16, #tpu.memory_space<vmem>>, %arg6: memref<1x384xf32, #tpu.memory_space<vmem>>, %arg7: memref<32x384xbf16, #tpu.memory_space<vmem>>, %arg8: memref<32x128xbf16, #tpu.memory_space<vmem>>) attributes {dimension_semantics = [#tpu.dimension_semantics<parallel>, #tpu.dimension_semantics<arbitrary>], iteration_bounds = array<i64: 1, 1>, scalar_prefetch = 0 : i64, scratch_operands = 1 : i64, tpu.core_type = #tpu.core_type<tc>, window_params = [{transform_indices = @transform_0, window_bounds = array<i64: 32, 128>}, {pipeline_mode = #tpu.pipeline_mode<synchronous>, transform_indices = @transform_1, window_bounds = array<i64: 1, 128>}, {pipeline_mode = #tpu.pipeline_mode<synchronous>, transform_indices = @transform_2, window_bounds = array<i64: 1, 128>}, {transform_indices = @transform_3, window_bounds = array<i64: 128, 384>}, {transform_indices = @transform_4, window_bounds = array<i64: 1, 384>}, {transform_indices = @transform_5, window_bounds = array<i64: 32, 384>}]} {
    %c0_i32 = arith.constant 0 : i32
    %0 = arith.cmpi eq, %arg1, %c0_i32 : i32
    %1 = arith.extui %0 : i1 to i32
    %c0_i32_0 = arith.constant 0 : i32
    %2 = arith.cmpi ne, %1, %c0_i32_0 : i32
    scf.if %2 {
      %c0_8 = arith.constant 0 : index
      %c0_9 = arith.constant 0 : index
      %11 = vector.load %arg2[%c0_8, %c0_9] : memref<32x128xf32, #tpu.memory_space<vmem>>, vector<32x128xf32>
      %cst_10 = arith.constant dense<0.000000e+00> : vector<32xf32>
      %12 = vector.multi_reduction <add>, %11, %cst_10 [1] : vector<32x128xf32> to vector<32xf32>
      %13 = vector.shape_cast %12 : vector<32xf32> to vector<32x1xf32>
      %cst_11 = arith.constant 1.280000e+02 : f32
      %14 = vector.broadcast %cst_11 : f32 to vector<32x1xf32>
      %15 = arith.divf %13, %14 : vector<32x1xf32>
      %16 = vector.broadcast %15 : vector<32x1xf32> to vector<32x128xf32>
      %17 = arith.subf %11, %16 : vector<32x128xf32>
      %18 = arith.mulf %17, %17 : vector<32x128xf32>
      %cst_12 = arith.constant dense<0.000000e+00> : vector<32xf32>
      %19 = vector.multi_reduction <add>, %18, %cst_12 [1] : vector<32x128xf32> to vector<32xf32>
      %20 = vector.shape_cast %19 : vector<32xf32> to vector<32x1xf32>
      %cst_13 = arith.constant 1.280000e+02 : f32
      %21 = vector.broadcast %cst_13 : f32 to vector<32x1xf32>
      %22 = arith.divf %20, %21 : vector<32x1xf32>
      %cst_14 = arith.constant 9.99999974E-6 : f32
      %23 = vector.broadcast %cst_14 : f32 to vector<32x1xf32>
      %24 = arith.addf %22, %23 : vector<32x1xf32>
      %25 = math.rsqrt %24 : vector<32x1xf32>
      %26 = vector.broadcast %25 : vector<32x1xf32> to vector<32x128xf32>
      %27 = arith.mulf %17, %26 : vector<32x128xf32>
      %c0_15 = arith.constant 0 : index
      %c0_16 = arith.constant 0 : index
      %28 = vector.load %arg3[%c0_15, %c0_16] : memref<1x128xf32, #tpu.memory_space<vmem>>, vector<1x128xf32>
      %29 = vector.broadcast %28 : vector<1x128xf32> to vector<32x128xf32>
      %30 = arith.mulf %27, %29 : vector<32x128xf32>
      %c0_17 = arith.constant 0 : index
      %c0_18 = arith.constant 0 : index
      %31 = vector.load %arg4[%c0_17, %c0_18] : memref<1x128xf32, #tpu.memory_space<vmem>>, vector<1x128xf32>
      %32 = vector.broadcast %31 : vector<1x128xf32> to vector<32x128xf32>
      %33 = arith.addf %30, %32 : vector<32x128xf32>
      %34 = arith.truncf %33 : vector<32x128xf32> to vector<32x128xbf16>
      %c0_19 = arith.constant 0 : index
      %c0_20 = arith.constant 0 : index
      %35 = vector.load %arg8[%c0_19, %c0_20] : memref<32x128xbf16, #tpu.memory_space<vmem>>, vector<32x128xbf16>
      tpu.vector_store %arg8[%c0_19, %c0_20], %34 {strides = array<i32>} : memref<32x128xbf16, #tpu.memory_space<vmem>>, vector<32x128xbf16>,
    } else {
    }
    %c0 = arith.constant 0 : index
    %c0_1 = arith.constant 0 : index
    %3 = vector.load %arg8[%c0, %c0_1] : memref<32x128xbf16, #tpu.memory_space<vmem>>, vector<32x128xbf16>
    %c0_2 = arith.constant 0 : index
    %c0_3 = arith.constant 0 : index
    %4 = vector.load %arg5[%c0_2, %c0_3] : memref<128x384xbf16, #tpu.memory_space<vmem>>, vector<128x384xbf16>
    %cst = arith.constant dense<0.000000e+00> : vector<32x384xf32>
    %5 = tpu.matmul %3, %4, %cst {dimension_numbers = #tpu.dot_dimension_numbers<[1], [0], [0], [1], [0, 0, 1, 1], [], []>} : vector<32x128xbf16>, vector<128x384xbf16>, vector<32x384xf32> -> vector<32x384xf32>
    %c0_4 = arith.constant 0 : index
    %c0_5 = arith.constant 0 : index
    %6 = vector.load %arg6[%c0_4, %c0_5] : memref<1x384xf32, #tpu.memory_space<vmem>>, vector<1x384xf32>
    %7 = vector.broadcast %6 : vector<1x384xf32> to vector<32x384xf32>
    %8 = arith.addf %5, %7 : vector<32x384xf32>
    %9 = arith.truncf %8 : vector<32x384xf32> to vector<32x384xbf16>
    %c0_6 = arith.constant 0 : index
    %c0_7 = arith.constant 0 : index
    %10 = vector.load %arg7[%c0_6, %c0_7] : memref<32x384xbf16, #tpu.memory_space<vmem>>, vector<32x384xbf16>
    tpu.vector_store %arg7[%c0_6, %c0_7], %9 {strides = array<i32>} : memref<32x384xbf16, #tpu.memory_space<vmem>>, vector<32x384xbf16>,
    return
  }
  func.func @transform_0(%arg0: i32, %arg1: i32) -> (i32, i32) {
    %c0_i32 = arith.constant 0 : i32
    %c0_i32_0 = arith.constant 0 : i32
    return %arg0, %c0_i32 : i32, i32
  }
  func.func @transform_1(%arg0: i32, %arg1: i32) -> (i32, i32) {
    %c0_i32 = arith.constant 0 : i32
    %c0_i32_0 = arith.constant 0 : i32
    %c0_i32_1 = arith.constant 0 : i32
    return %c0_i32, %c0_i32_0 : i32, i32
  }
  func.func @transform_2(%arg0: i32, %arg1: i32) -> (i32, i32) {
    %c0_i32 = arith.constant 0 : i32
    %c0_i32_0 = arith.constant 0 : i32
    %c0_i32_1 = arith.constant 0 : i32
    return %c0_i32, %c0_i32_0 : i32, i32
  }
  func.func @transform_3(%arg0: i32, %arg1: i32) -> (i32, i32) {
    %c0_i32 = arith.constant 0 : i32
    %c0_i32_0 = arith.constant 0 : i32
    return %c0_i32, %arg1 : i32, i32
  }
  func.func @transform_4(%arg0: i32, %arg1: i32) -> (i32, i32) {
    %c0_i32 = arith.constant 0 : i32
    %c0_i32_0 = arith.constant 0 : i32
    return %c0_i32, %arg1 : i32, i32
  }
  func.func @transform_5(%arg0: i32, %arg1: i32) -> (i32, i32) {
    %c0_i32 = arith.constant 0 : i32
    return %arg0, %arg1 : i32, i32
  }
}

module attributes {stable_mosaic.version = 11 : i64} {
  func.func @_linear_bias_res_kernel(%arg0: i32, %arg1: i32, %arg2: i32, %arg3: memref<32x128xbf16, #tpu.memory_space<vmem>>, %arg4: memref<128x128xbf16, #tpu.memory_space<vmem>>, %arg5: memref<1x128xf32, #tpu.memory_space<vmem>>, %arg6: memref<32x128xf32, #tpu.memory_space<vmem>>, %arg7: memref<32x128xf32, #tpu.memory_space<vmem>>, %arg8: memref<32x128xf32, #tpu.memory_space<vmem>>) attributes {dimension_semantics = [#tpu.dimension_semantics<parallel>, #tpu.dimension_semantics<parallel>, #tpu.dimension_semantics<arbitrary>], iteration_bounds = array<i64: 1, 1, 1>, scalar_prefetch = 0 : i64, scratch_operands = 1 : i64, tpu.core_type = #tpu.core_type<tc>, window_params = [{transform_indices = @transform_0, window_bounds = array<i64: 32, 128>}, {transform_indices = @transform_1, window_bounds = array<i64: 128, 128>}, {transform_indices = @transform_2, window_bounds = array<i64: 1, 128>}, {transform_indices = @transform_3, window_bounds = array<i64: 32, 128>}, {transform_indices = @transform_4, window_bounds = array<i64: 32, 128>}]} {
    %c0_i32 = arith.constant 0 : i32
    %0 = arith.cmpi eq, %arg2, %c0_i32 : i32
    %1 = arith.extui %0 : i1 to i32
    %c0_i32_0 = arith.constant 0 : i32
    %2 = arith.cmpi ne, %1, %c0_i32_0 : i32
    scf.if %2 {
      %cst_10 = arith.constant 0.000000e+00 : f32
      %12 = vector.broadcast %cst_10 : f32 to vector<32x128xf32>
      %c0_11 = arith.constant 0 : index
      %c0_12 = arith.constant 0 : index
      %13 = vector.load %arg8[%c0_11, %c0_12] : memref<32x128xf32, #tpu.memory_space<vmem>>, vector<32x128xf32>
      tpu.vector_store %arg8[%c0_11, %c0_12], %12 {strides = array<i32>} : memref<32x128xf32, #tpu.memory_space<vmem>>, vector<32x128xf32>,
    } else {
    }
    %c0 = arith.constant 0 : index
    %c0_1 = arith.constant 0 : index
    %3 = vector.load %arg8[%c0, %c0_1] : memref<32x128xf32, #tpu.memory_space<vmem>>, vector<32x128xf32>
    %c0_2 = arith.constant 0 : index
    %c0_3 = arith.constant 0 : index
    %4 = vector.load %arg3[%c0_2, %c0_3] : memref<32x128xbf16, #tpu.memory_space<vmem>>, vector<32x128xbf16>
    %c0_4 = arith.constant 0 : index
    %c0_5 = arith.constant 0 : index
    %5 = vector.load %arg4[%c0_4, %c0_5] : memref<128x128xbf16, #tpu.memory_space<vmem>>, vector<128x128xbf16>
    %cst = arith.constant dense<0.000000e+00> : vector<32x128xf32>
    %6 = tpu.matmul %4, %5, %cst {dimension_numbers = #tpu.dot_dimension_numbers<[1], [0], [0], [1], [0, 0, 1, 1], [], []>} : vector<32x128xbf16>, vector<128x128xbf16>, vector<32x128xf32> -> vector<32x128xf32>
    %7 = arith.addf %3, %6 : vector<32x128xf32>
    %c0_6 = arith.constant 0 : index
    %c0_7 = arith.constant 0 : index
    %8 = vector.load %arg8[%c0_6, %c0_7] : memref<32x128xf32, #tpu.memory_space<vmem>>, vector<32x128xf32>
    tpu.vector_store %arg8[%c0_6, %c0_7], %7 {strides = array<i32>} : memref<32x128xf32, #tpu.memory_space<vmem>>, vector<32x128xf32>,
    %c0_i32_8 = arith.constant 0 : i32
    %9 = arith.cmpi eq, %arg2, %c0_i32_8 : i32
    %10 = arith.extui %9 : i1 to i32
    %c0_i32_9 = arith.constant 0 : i32
    %11 = arith.cmpi ne, %10, %c0_i32_9 : i32
    scf.if %11 {
      %c0_10 = arith.constant 0 : index
      %c0_11 = arith.constant 0 : index
      %12 = vector.load %arg8[%c0_10, %c0_11] : memref<32x128xf32, #tpu.memory_space<vmem>>, vector<32x128xf32>
      %c0_12 = arith.constant 0 : index
      %c0_13 = arith.constant 0 : index
      %13 = vector.load %arg5[%c0_12, %c0_13] : memref<1x128xf32, #tpu.memory_space<vmem>>, vector<1x128xf32>
      %14 = vector.broadcast %13 : vector<1x128xf32> to vector<32x128xf32>
      %15 = arith.addf %12, %14 : vector<32x128xf32>
      %c0_14 = arith.constant 0 : index
      %c0_15 = arith.constant 0 : index
      %16 = vector.load %arg6[%c0_14, %c0_15] : memref<32x128xf32, #tpu.memory_space<vmem>>, vector<32x128xf32>
      %17 = arith.addf %15, %16 : vector<32x128xf32>
      %c0_16 = arith.constant 0 : index
      %c0_17 = arith.constant 0 : index
      %18 = vector.load %arg7[%c0_16, %c0_17] : memref<32x128xf32, #tpu.memory_space<vmem>>, vector<32x128xf32>
      tpu.vector_store %arg7[%c0_16, %c0_17], %17 {strides = array<i32>} : memref<32x128xf32, #tpu.memory_space<vmem>>, vector<32x128xf32>,
    } else {
    }
    return
  }
  func.func @transform_0(%arg0: i32, %arg1: i32, %arg2: i32) -> (i32, i32) {
    %c0_i32 = arith.constant 0 : i32
    return %arg0, %arg2 : i32, i32
  }
  func.func @transform_1(%arg0: i32, %arg1: i32, %arg2: i32) -> (i32, i32) {
    %c0_i32 = arith.constant 0 : i32
    return %arg2, %arg1 : i32, i32
  }
  func.func @transform_2(%arg0: i32, %arg1: i32, %arg2: i32) -> (i32, i32) {
    %c0_i32 = arith.constant 0 : i32
    %c0_i32_0 = arith.constant 0 : i32
    return %c0_i32, %arg1 : i32, i32
  }
  func.func @transform_3(%arg0: i32, %arg1: i32, %arg2: i32) -> (i32, i32) {
    %c0_i32 = arith.constant 0 : i32
    return %arg0, %arg1 : i32, i32
  }
  func.func @transform_4(%arg0: i32, %arg1: i32, %arg2: i32) -> (i32, i32) {
    %c0_i32 = arith.constant 0 : i32
    return %arg0, %arg1 : i32, i32
  }
}

module attributes {stable_mosaic.version = 11 : i64} {
  func.func @_ln_matmul_kernel(%arg0: i32, %arg1: i32, %arg2: memref<32x128xf32, #tpu.memory_space<vmem>>, %arg3: memref<1x128xf32, #tpu.memory_space<vmem>>, %arg4: memref<1x128xf32, #tpu.memory_space<vmem>>, %arg5: memref<128x512xbf16, #tpu.memory_space<vmem>>, %arg6: memref<1x512xf32, #tpu.memory_space<vmem>>, %arg7: memref<32x512xbf16, #tpu.memory_space<vmem>>, %arg8: memref<32x128xbf16, #tpu.memory_space<vmem>>) attributes {dimension_semantics = [#tpu.dimension_semantics<parallel>, #tpu.dimension_semantics<arbitrary>], iteration_bounds = array<i64: 1, 1>, scalar_prefetch = 0 : i64, scratch_operands = 1 : i64, tpu.core_type = #tpu.core_type<tc>, window_params = [{transform_indices = @transform_0, window_bounds = array<i64: 32, 128>}, {pipeline_mode = #tpu.pipeline_mode<synchronous>, transform_indices = @transform_1, window_bounds = array<i64: 1, 128>}, {pipeline_mode = #tpu.pipeline_mode<synchronous>, transform_indices = @transform_2, window_bounds = array<i64: 1, 128>}, {transform_indices = @transform_3, window_bounds = array<i64: 128, 512>}, {transform_indices = @transform_4, window_bounds = array<i64: 1, 512>}, {transform_indices = @transform_5, window_bounds = array<i64: 32, 512>}]} {
    %c0_i32 = arith.constant 0 : i32
    %0 = arith.cmpi eq, %arg1, %c0_i32 : i32
    %1 = arith.extui %0 : i1 to i32
    %c0_i32_0 = arith.constant 0 : i32
    %2 = arith.cmpi ne, %1, %c0_i32_0 : i32
    scf.if %2 {
      %c0_12 = arith.constant 0 : index
      %c0_13 = arith.constant 0 : index
      %24 = vector.load %arg2[%c0_12, %c0_13] : memref<32x128xf32, #tpu.memory_space<vmem>>, vector<32x128xf32>
      %cst_14 = arith.constant dense<0.000000e+00> : vector<32xf32>
      %25 = vector.multi_reduction <add>, %24, %cst_14 [1] : vector<32x128xf32> to vector<32xf32>
      %26 = vector.shape_cast %25 : vector<32xf32> to vector<32x1xf32>
      %cst_15 = arith.constant 1.280000e+02 : f32
      %27 = vector.broadcast %cst_15 : f32 to vector<32x1xf32>
      %28 = arith.divf %26, %27 : vector<32x1xf32>
      %29 = vector.broadcast %28 : vector<32x1xf32> to vector<32x128xf32>
      %30 = arith.subf %24, %29 : vector<32x128xf32>
      %31 = arith.mulf %30, %30 : vector<32x128xf32>
      %cst_16 = arith.constant dense<0.000000e+00> : vector<32xf32>
      %32 = vector.multi_reduction <add>, %31, %cst_16 [1] : vector<32x128xf32> to vector<32xf32>
      %33 = vector.shape_cast %32 : vector<32xf32> to vector<32x1xf32>
      %cst_17 = arith.constant 1.280000e+02 : f32
      %34 = vector.broadcast %cst_17 : f32 to vector<32x1xf32>
      %35 = arith.divf %33, %34 : vector<32x1xf32>
      %cst_18 = arith.constant 9.99999974E-6 : f32
      %36 = vector.broadcast %cst_18 : f32 to vector<32x1xf32>
      %37 = arith.addf %35, %36 : vector<32x1xf32>
      %38 = math.rsqrt %37 : vector<32x1xf32>
      %39 = vector.broadcast %38 : vector<32x1xf32> to vector<32x128xf32>
      %40 = arith.mulf %30, %39 : vector<32x128xf32>
      %c0_19 = arith.constant 0 : index
      %c0_20 = arith.constant 0 : index
      %41 = vector.load %arg3[%c0_19, %c0_20] : memref<1x128xf32, #tpu.memory_space<vmem>>, vector<1x128xf32>
      %42 = vector.broadcast %41 : vector<1x128xf32> to vector<32x128xf32>
      %43 = arith.mulf %40, %42 : vector<32x128xf32>
      %c0_21 = arith.constant 0 : index
      %c0_22 = arith.constant 0 : index
      %44 = vector.load %arg4[%c0_21, %c0_22] : memref<1x128xf32, #tpu.memory_space<vmem>>, vector<1x128xf32>
      %45 = vector.broadcast %44 : vector<1x128xf32> to vector<32x128xf32>
      %46 = arith.addf %43, %45 : vector<32x128xf32>
      %47 = arith.truncf %46 : vector<32x128xf32> to vector<32x128xbf16>
      %c0_23 = arith.constant 0 : index
      %c0_24 = arith.constant 0 : index
      %48 = vector.load %arg8[%c0_23, %c0_24] : memref<32x128xbf16, #tpu.memory_space<vmem>>, vector<32x128xbf16>
      tpu.vector_store %arg8[%c0_23, %c0_24], %47 {strides = array<i32>} : memref<32x128xbf16, #tpu.memory_space<vmem>>, vector<32x128xbf16>,
    } else {
    }
    %c0 = arith.constant 0 : index
    %c0_1 = arith.constant 0 : index
    %3 = vector.load %arg8[%c0, %c0_1] : memref<32x128xbf16, #tpu.memory_space<vmem>>, vector<32x128xbf16>
    %c0_2 = arith.constant 0 : index
    %c0_3 = arith.constant 0 : index
    %4 = vector.load %arg5[%c0_2, %c0_3] : memref<128x512xbf16, #tpu.memory_space<vmem>>, vector<128x512xbf16>
    %cst = arith.constant dense<0.000000e+00> : vector<32x512xf32>
    %5 = tpu.matmul %3, %4, %cst {dimension_numbers = #tpu.dot_dimension_numbers<[1], [0], [0], [1], [0, 0, 1, 1], [], []>} : vector<32x128xbf16>, vector<128x512xbf16>, vector<32x512xf32> -> vector<32x512xf32>
    %c0_4 = arith.constant 0 : index
    %c0_5 = arith.constant 0 : index
    %6 = vector.load %arg6[%c0_4, %c0_5] : memref<1x512xf32, #tpu.memory_space<vmem>>, vector<1x512xf32>
    %7 = vector.broadcast %6 : vector<1x512xf32> to vector<32x512xf32>
    %8 = arith.addf %5, %7 : vector<32x512xf32>
    %cst_6 = arith.constant 5.000000e-01 : f32
    %9 = vector.broadcast %cst_6 : f32 to vector<32x512xf32>
    %10 = arith.mulf %9, %8 : vector<32x512xf32>
    %cst_7 = arith.constant 4.471500e-02 : f32
    %11 = vector.broadcast %cst_7 : f32 to vector<32x512xf32>
    %12 = arith.mulf %11, %8 : vector<32x512xf32>
    %13 = arith.mulf %12, %8 : vector<32x512xf32>
    %14 = arith.mulf %13, %8 : vector<32x512xf32>
    %15 = arith.addf %8, %14 : vector<32x512xf32>
    %cst_8 = arith.constant 0.797884583 : f32
    %16 = vector.broadcast %cst_8 : f32 to vector<32x512xf32>
    %17 = arith.mulf %16, %15 : vector<32x512xf32>
    %18 = math.tanh %17 : vector<32x512xf32>
    %cst_9 = arith.constant 1.000000e+00 : f32
    %19 = vector.broadcast %cst_9 : f32 to vector<32x512xf32>
    %20 = arith.addf %19, %18 : vector<32x512xf32>
    %21 = arith.mulf %10, %20 : vector<32x512xf32>
    %22 = arith.truncf %21 : vector<32x512xf32> to vector<32x512xbf16>
    %c0_10 = arith.constant 0 : index
    %c0_11 = arith.constant 0 : index
    %23 = vector.load %arg7[%c0_10, %c0_11] : memref<32x512xbf16, #tpu.memory_space<vmem>>, vector<32x512xbf16>
    tpu.vector_store %arg7[%c0_10, %c0_11], %22 {strides = array<i32>} : memref<32x512xbf16, #tpu.memory_space<vmem>>, vector<32x512xbf16>,
    return
  }
  func.func @transform_0(%arg0: i32, %arg1: i32) -> (i32, i32) {
    %c0_i32 = arith.constant 0 : i32
    %c0_i32_0 = arith.constant 0 : i32
    return %arg0, %c0_i32 : i32, i32
  }
  func.func @transform_1(%arg0: i32, %arg1: i32) -> (i32, i32) {
    %c0_i32 = arith.constant 0 : i32
    %c0_i32_0 = arith.constant 0 : i32
    %c0_i32_1 = arith.constant 0 : i32
    return %c0_i32, %c0_i32_0 : i32, i32
  }
  func.func @transform_2(%arg0: i32, %arg1: i32) -> (i32, i32) {
    %c0_i32 = arith.constant 0 : i32
    %c0_i32_0 = arith.constant 0 : i32
    %c0_i32_1 = arith.constant 0 : i32
    return %c0_i32, %c0_i32_0 : i32, i32
  }
  func.func @transform_3(%arg0: i32, %arg1: i32) -> (i32, i32) {
    %c0_i32 = arith.constant 0 : i32
    %c0_i32_0 = arith.constant 0 : i32
    return %c0_i32, %arg1 : i32, i32
  }
  func.func @transform_4(%arg0: i32, %arg1: i32) -> (i32, i32) {
    %c0_i32 = arith.constant 0 : i32
    %c0_i32_0 = arith.constant 0 : i32
    return %c0_i32, %arg1 : i32, i32
  }
  func.func @transform_5(%arg0: i32, %arg1: i32) -> (i32, i32) {
    %c0_i32 = arith.constant 0 : i32
    return %arg0, %arg1 : i32, i32
  }
}

module attributes {stable_mosaic.version = 11 : i64} {
  func.func @_flash_attn_kernel(%arg0: i32, %arg1: i32, %arg2: i32, %arg3: i32, %arg4: memref<1x16x128xbf16, #tpu.memory_space<vmem>>, %arg5: memref<1x16x128xbf16, #tpu.memory_space<vmem>>, %arg6: memref<1x16x128xbf16, #tpu.memory_space<vmem>>, %arg7: memref<1x16x128xbf16, #tpu.memory_space<vmem>>, %arg8: memref<4x16x1xf32, #tpu.memory_space<vmem>>, %arg9: memref<4x16x1xf32, #tpu.memory_space<vmem>>, %arg10: memref<4x16x32xf32, #tpu.memory_space<vmem>>) attributes {dimension_semantics = [#tpu.dimension_semantics<parallel>, #tpu.dimension_semantics<parallel>, #tpu.dimension_semantics<parallel>, #tpu.dimension_semantics<arbitrary>], iteration_bounds = array<i64: 2, 1, 1, 1>, scalar_prefetch = 0 : i64, scratch_operands = 3 : i64, tpu.core_type = #tpu.core_type<tc>, window_params = [{transform_indices = @transform_0, window_bounds = array<i64: 1, 16, 128>}, {transform_indices = @transform_1, window_bounds = array<i64: 1, 16, 128>}, {transform_indices = @transform_2, window_bounds = array<i64: 1, 16, 128>}, {transform_indices = @transform_3, window_bounds = array<i64: 1, 16, 128>}]} {
    %c0_i32 = arith.constant 0 : i32
    %0 = arith.cmpi eq, %arg3, %c0_i32 : i32
    %1 = arith.extui %0 : i1 to i32
    %c0_i32_0 = arith.constant 0 : i32
    %2 = arith.cmpi ne, %1, %c0_i32_0 : i32
    scf.if %2 {
      %cst = arith.constant 0xFF800000 : f32
      %12 = vector.broadcast %cst : f32 to vector<4x16x1xf32>
      %c0 = arith.constant 0 : index
      %c0_5 = arith.constant 0 : index
      %c0_6 = arith.constant 0 : index
      %13 = vector.load %arg8[%c0, %c0_5, %c0_6] : memref<4x16x1xf32, #tpu.memory_space<vmem>>, vector<4x16x1xf32>
      tpu.vector_store %arg8[%c0, %c0_5, %c0_6], %12 {strides = array<i32>} : memref<4x16x1xf32, #tpu.memory_space<vmem>>, vector<4x16x1xf32>,
      %cst_7 = arith.constant 0.000000e+00 : f32
      %14 = vector.broadcast %cst_7 : f32 to vector<4x16x1xf32>
      %c0_8 = arith.constant 0 : index
      %c0_9 = arith.constant 0 : index
      %c0_10 = arith.constant 0 : index
      %15 = vector.load %arg9[%c0_8, %c0_9, %c0_10] : memref<4x16x1xf32, #tpu.memory_space<vmem>>, vector<4x16x1xf32>
      tpu.vector_store %arg9[%c0_8, %c0_9, %c0_10], %14 {strides = array<i32>} : memref<4x16x1xf32, #tpu.memory_space<vmem>>, vector<4x16x1xf32>,
      %cst_11 = arith.constant 0.000000e+00 : f32
      %16 = vector.broadcast %cst_11 : f32 to vector<4x16x32xf32>
      %c0_12 = arith.constant 0 : index
      %c0_13 = arith.constant 0 : index
      %c0_14 = arith.constant 0 : index
      %17 = vector.load %arg10[%c0_12, %c0_13, %c0_14] : memref<4x16x32xf32, #tpu.memory_space<vmem>>, vector<4x16x32xf32>
      tpu.vector_store %arg10[%c0_12, %c0_13, %c0_14], %16 {strides = array<i32>} : memref<4x16x32xf32, #tpu.memory_space<vmem>>, vector<4x16x32xf32>,
    } else {
    }
    %c16_i32 = arith.constant 16 : i32
    %3 = arith.muli %arg3, %c16_i32 : i32
    %c16_i32_1 = arith.constant 16 : i32
    %4 = arith.muli %arg2, %c16_i32_1 : i32
    %c15_i32 = arith.constant 15 : i32
    %5 = arith.addi %4, %c15_i32 : i32
    %6 = arith.cmpi sle, %3, %5 : i32
    %7 = arith.extui %6 : i1 to i32
    %c0_i32_2 = arith.constant 0 : i32
    %8 = arith.cmpi ne, %7, %c0_i32_2 : i32
    scf.if %8 {
      %c16_i32_5 = arith.constant 16 : i32
      %12 = arith.muli %arg2, %c16_i32_5 : i32
      %13 = tpu.iota {dimensions = array<i32: 0>} : vector<16x16xi32>
      %14 = vector.broadcast %12 : i32 to vector<16x16xi32>
      %15 = arith.addi %14, %13 : vector<16x16xi32>
      %c16_i32_6 = arith.constant 16 : i32
      %16 = arith.muli %arg3, %c16_i32_6 : i32
      %17 = tpu.iota {dimensions = array<i32: 1>} : vector<16x16xi32>
      %18 = vector.broadcast %16 : i32 to vector<16x16xi32>
      %19 = arith.addi %18, %17 : vector<16x16xi32>
      %20 = arith.cmpi sle, %19, %15 : vector<16x16xi32>
      %c0 = arith.constant 0 : index
      %c0_7 = arith.constant 0 : index
      %c0_8 = arith.constant 0 : index
      %21 = vector.load %arg4[%c0, %c0_7, %c0_8] : memref<1x16x128xbf16, #tpu.memory_space<vmem>>, vector<1x16x128xbf16>
      %22 = vector.shape_cast %21 : vector<1x16x128xbf16> to vector<16x128xbf16>
      %c0_9 = arith.constant 0 : index
      %c0_10 = arith.constant 0 : index
      %c0_11 = arith.constant 0 : index
      %23 = vector.load %arg5[%c0_9, %c0_10, %c0_11] : memref<1x16x128xbf16, #tpu.memory_space<vmem>>, vector<1x16x128xbf16>
      %24 = vector.shape_cast %23 : vector<1x16x128xbf16> to vector<16x128xbf16>
      %c0_12 = arith.constant 0 : index
      %c0_13 = arith.constant 0 : index
      %c0_14 = arith.constant 0 : index
      %25 = vector.load %arg6[%c0_12, %c0_13, %c0_14] : memref<1x16x128xbf16, #tpu.memory_space<vmem>>, vector<1x16x128xbf16>
      %26 = vector.shape_cast %25 : vector<1x16x128xbf16> to vector<16x128xbf16>
      %27 = vector.extract_strided_slice %22 {offsets = [0, 0], sizes = [16, 32], strides = [1, 1]} : vector<16x128xbf16> to vector<16x32xbf16>
      %28 = arith.extf %27 : vector<16x32xbf16> to vector<16x32xf32>
      %cst = arith.constant 0.176776692 : f32
      %29 = vector.broadcast %cst : f32 to vector<16x32xf32>
      %30 = arith.mulf %28, %29 : vector<16x32xf32>
      %31 = arith.truncf %30 : vector<16x32xf32> to vector<16x32xbf16>
      %32 = vector.extract_strided_slice %24 {offsets = [0, 0], sizes = [16, 32], strides = [1, 1]} : vector<16x128xbf16> to vector<16x32xbf16>
      %cst_15 = arith.constant dense<0.000000e+00> : vector<16x16xf32>
      %33 = tpu.matmul %31, %32, %cst_15 {dimension_numbers = #tpu.dot_dimension_numbers<[1], [1], [0], [0], [0, 0, 1, 0], [], []>} : vector<16x32xbf16>, vector<16x32xbf16>, vector<16x16xf32> -> vector<16x16xf32>
      %cst_16 = arith.constant -1.000000e+30 : f32
      %34 = vector.broadcast %cst_16 : f32 to vector<16x16xf32>
      %35 = arith.select %20, %33, %34 : vector<16x16xi1>, vector<16x16xf32>
      %c0_17 = arith.constant 0 : index
      %c0_18 = arith.constant 0 : index
      %c0_19 = arith.constant 0 : index
      %36 = vector.load %arg8[%c0_17, %c0_18, %c0_19] : memref<4x16x1xf32, #tpu.memory_space<vmem>>, vector<1x16x1xf32>
      %37 = vector.shape_cast %36 : vector<1x16x1xf32> to vector<16x1xf32>
      %cst_20 = arith.constant dense<0xFF800000> : vector<16xf32>
      %38 = vector.multi_reduction <maximumf>, %35, %cst_20 [1] : vector<16x16xf32> to vector<16xf32>
      %39 = vector.shape_cast %38 : vector<16xf32> to vector<16x1xf32>
      %40 = arith.maximumf %37, %39 : vector<16x1xf32>
      %41 = arith.subf %37, %40 : vector<16x1xf32>
      %42 = math.exp %41 : vector<16x1xf32>
      %43 = vector.broadcast %40 : vector<16x1xf32> to vector<16x16xf32>
      %44 = arith.subf %35, %43 : vector<16x16xf32>
      %45 = math.exp %44 : vector<16x16xf32>
      %c0_21 = arith.constant 0 : index
      %c0_22 = arith.constant 0 : index
      %c0_23 = arith.constant 0 : index
      %46 = vector.load %arg9[%c0_21, %c0_22, %c0_23] : memref<4x16x1xf32, #tpu.memory_space<vmem>>, vector<1x16x1xf32>
      %47 = vector.shape_cast %46 : vector<1x16x1xf32> to vector<16x1xf32>
      %48 = arith.mulf %42, %47 : vector<16x1xf32>
      %cst_24 = arith.constant dense<0.000000e+00> : vector<16xf32>
      %49 = vector.multi_reduction <add>, %45, %cst_24 [1] : vector<16x16xf32> to vector<16xf32>
      %50 = vector.shape_cast %49 : vector<16xf32> to vector<16x1xf32>
      %51 = arith.addf %48, %50 : vector<16x1xf32>
      %c0_25 = arith.constant 0 : index
      %c0_26 = arith.constant 0 : index
      %c0_27 = arith.constant 0 : index
      %52 = vector.load %arg9[%c0_25, %c0_26, %c0_27] : memref<4x16x1xf32, #tpu.memory_space<vmem>>, vector<1x16x1xf32>
      %53 = vector.shape_cast %52 : vector<1x16x1xf32> to vector<16x1xf32>
      %54 = vector.shape_cast %51 : vector<16x1xf32> to vector<1x16x1xf32>
      tpu.vector_store %arg9[%c0_25, %c0_26, %c0_27], %54 {strides = array<i32>} : memref<4x16x1xf32, #tpu.memory_space<vmem>>, vector<1x16x1xf32>,
      %c0_28 = arith.constant 0 : index
      %c0_29 = arith.constant 0 : index
      %c0_30 = arith.constant 0 : index
      %55 = vector.load %arg10[%c0_28, %c0_29, %c0_30] : memref<4x16x32xf32, #tpu.memory_space<vmem>>, vector<1x16x32xf32>
      %56 = vector.shape_cast %55 : vector<1x16x32xf32> to vector<16x32xf32>
      %57 = vector.broadcast %42 : vector<16x1xf32> to vector<16x32xf32>
      %58 = arith.mulf %57, %56 : vector<16x32xf32>
      %59 = arith.truncf %45 : vector<16x16xf32> to vector<16x16xbf16>
      %60 = vector.extract_strided_slice %26 {offsets = [0, 0], sizes = [16, 32], strides = [1, 1]} : vector<16x128xbf16> to vector<16x32xbf16>
      %cst_31 = arith.constant dense<0.000000e+00> : vector<16x32xf32>
      %61 = tpu.matmul %59, %60, %cst_31 {dimension_numbers = #tpu.dot_dimension_numbers<[1], [0], [0], [1], [0, 0, 1, 1], [], []>} : vector<16x16xbf16>, vector<16x32xbf16>, vector<16x32xf32> -> vector<16x32xf32>
      %62 = arith.addf %58, %61 : vector<16x32xf32>
      %c0_32 = arith.constant 0 : index
      %c0_33 = arith.constant 0 : index
      %c0_34 = arith.constant 0 : index
      %63 = vector.load %arg10[%c0_32, %c0_33, %c0_34] : memref<4x16x32xf32, #tpu.memory_space<vmem>>, vector<1x16x32xf32>
      %64 = vector.shape_cast %63 : vector<1x16x32xf32> to vector<16x32xf32>
      %65 = vector.shape_cast %62 : vector<16x32xf32> to vector<1x16x32xf32>
      tpu.vector_store %arg10[%c0_32, %c0_33, %c0_34], %65 {strides = array<i32>} : memref<4x16x32xf32, #tpu.memory_space<vmem>>, vector<1x16x32xf32>,
      %c0_35 = arith.constant 0 : index
      %c0_36 = arith.constant 0 : index
      %c0_37 = arith.constant 0 : index
      %66 = vector.load %arg8[%c0_35, %c0_36, %c0_37] : memref<4x16x1xf32, #tpu.memory_space<vmem>>, vector<1x16x1xf32>
      %67 = vector.shape_cast %66 : vector<1x16x1xf32> to vector<16x1xf32>
      %68 = vector.shape_cast %40 : vector<16x1xf32> to vector<1x16x1xf32>
      tpu.vector_store %arg8[%c0_35, %c0_36, %c0_37], %68 {strides = array<i32>} : memref<4x16x1xf32, #tpu.memory_space<vmem>>, vector<1x16x1xf32>,
      %69 = vector.extract_strided_slice %22 {offsets = [0, 32], sizes = [16, 32], strides = [1, 1]} : vector<16x128xbf16> to vector<16x32xbf16>
      %70 = arith.extf %69 : vector<16x32xbf16> to vector<16x32xf32>
      %cst_38 = arith.constant 0.176776692 : f32
      %71 = vector.broadcast %cst_38 : f32 to vector<16x32xf32>
      %72 = arith.mulf %70, %71 : vector<16x32xf32>
      %73 = arith.truncf %72 : vector<16x32xf32> to vector<16x32xbf16>
      %74 = vector.extract_strided_slice %24 {offsets = [0, 32], sizes = [16, 32], strides = [1, 1]} : vector<16x128xbf16> to vector<16x32xbf16>
      %cst_39 = arith.constant dense<0.000000e+00> : vector<16x16xf32>
      %75 = tpu.matmul %73, %74, %cst_39 {dimension_numbers = #tpu.dot_dimension_numbers<[1], [1], [0], [0], [0, 0, 1, 0], [], []>} : vector<16x32xbf16>, vector<16x32xbf16>, vector<16x16xf32> -> vector<16x16xf32>
      %cst_40 = arith.constant -1.000000e+30 : f32
      %76 = vector.broadcast %cst_40 : f32 to vector<16x16xf32>
      %77 = arith.select %20, %75, %76 : vector<16x16xi1>, vector<16x16xf32>
      %c1 = arith.constant 1 : index
      %c0_41 = arith.constant 0 : index
      %c0_42 = arith.constant 0 : index
      %78 = vector.load %arg8[%c1, %c0_41, %c0_42] : memref<4x16x1xf32, #tpu.memory_space<vmem>>, vector<1x16x1xf32>
      %79 = vector.shape_cast %78 : vector<1x16x1xf32> to vector<16x1xf32>
      %cst_43 = arith.constant dense<0xFF800000> : vector<16xf32>
      %80 = vector.multi_reduction <maximumf>, %77, %cst_43 [1] : vector<16x16xf32> to vector<16xf32>
      %81 = vector.shape_cast %80 : vector<16xf32> to vector<16x1xf32>
      %82 = arith.maximumf %79, %81 : vector<16x1xf32>
      %83 = arith.subf %79, %82 : vector<16x1xf32>
      %84 = math.exp %83 : vector<16x1xf32>
      %85 = vector.broadcast %82 : vector<16x1xf32> to vector<16x16xf32>
      %86 = arith.subf %77, %85 : vector<16x16xf32>
      %87 = math.exp %86 : vector<16x16xf32>
      %c1_44 = arith.constant 1 : index
      %c0_45 = arith.constant 0 : index
      %c0_46 = arith.constant 0 : index
      %88 = vector.load %arg9[%c1_44, %c0_45, %c0_46] : memref<4x16x1xf32, #tpu.memory_space<vmem>>, vector<1x16x1xf32>
      %89 = vector.shape_cast %88 : vector<1x16x1xf32> to vector<16x1xf32>
      %90 = arith.mulf %84, %89 : vector<16x1xf32>
      %cst_47 = arith.constant dense<0.000000e+00> : vector<16xf32>
      %91 = vector.multi_reduction <add>, %87, %cst_47 [1] : vector<16x16xf32> to vector<16xf32>
      %92 = vector.shape_cast %91 : vector<16xf32> to vector<16x1xf32>
      %93 = arith.addf %90, %92 : vector<16x1xf32>
      %c1_48 = arith.constant 1 : index
      %c0_49 = arith.constant 0 : index
      %c0_50 = arith.constant 0 : index
      %94 = vector.load %arg9[%c1_48, %c0_49, %c0_50] : memref<4x16x1xf32, #tpu.memory_space<vmem>>, vector<1x16x1xf32>
      %95 = vector.shape_cast %94 : vector<1x16x1xf32> to vector<16x1xf32>
      %96 = vector.shape_cast %93 : vector<16x1xf32> to vector<1x16x1xf32>
      tpu.vector_store %arg9[%c1_48, %c0_49, %c0_50], %96 {strides = array<i32>} : memref<4x16x1xf32, #tpu.memory_space<vmem>>, vector<1x16x1xf32>,
      %c1_51 = arith.constant 1 : index
      %c0_52 = arith.constant 0 : index
      %c0_53 = arith.constant 0 : index
      %97 = vector.load %arg10[%c1_51, %c0_52, %c0_53] : memref<4x16x32xf32, #tpu.memory_space<vmem>>, vector<1x16x32xf32>
      %98 = vector.shape_cast %97 : vector<1x16x32xf32> to vector<16x32xf32>
      %99 = vector.broadcast %84 : vector<16x1xf32> to vector<16x32xf32>
      %100 = arith.mulf %99, %98 : vector<16x32xf32>
      %101 = arith.truncf %87 : vector<16x16xf32> to vector<16x16xbf16>
      %102 = vector.extract_strided_slice %26 {offsets = [0, 32], sizes = [16, 32], strides = [1, 1]} : vector<16x128xbf16> to vector<16x32xbf16>
      %cst_54 = arith.constant dense<0.000000e+00> : vector<16x32xf32>
      %103 = tpu.matmul %101, %102, %cst_54 {dimension_numbers = #tpu.dot_dimension_numbers<[1], [0], [0], [1], [0, 0, 1, 1], [], []>} : vector<16x16xbf16>, vector<16x32xbf16>, vector<16x32xf32> -> vector<16x32xf32>
      %104 = arith.addf %100, %103 : vector<16x32xf32>
      %c1_55 = arith.constant 1 : index
      %c0_56 = arith.constant 0 : index
      %c0_57 = arith.constant 0 : index
      %105 = vector.load %arg10[%c1_55, %c0_56, %c0_57] : memref<4x16x32xf32, #tpu.memory_space<vmem>>, vector<1x16x32xf32>
      %106 = vector.shape_cast %105 : vector<1x16x32xf32> to vector<16x32xf32>
      %107 = vector.shape_cast %104 : vector<16x32xf32> to vector<1x16x32xf32>
      tpu.vector_store %arg10[%c1_55, %c0_56, %c0_57], %107 {strides = array<i32>} : memref<4x16x32xf32, #tpu.memory_space<vmem>>, vector<1x16x32xf32>,
      %c1_58 = arith.constant 1 : index
      %c0_59 = arith.constant 0 : index
      %c0_60 = arith.constant 0 : index
      %108 = vector.load %arg8[%c1_58, %c0_59, %c0_60] : memref<4x16x1xf32, #tpu.memory_space<vmem>>, vector<1x16x1xf32>
      %109 = vector.shape_cast %108 : vector<1x16x1xf32> to vector<16x1xf32>
      %110 = vector.shape_cast %82 : vector<16x1xf32> to vector<1x16x1xf32>
      tpu.vector_store %arg8[%c1_58, %c0_59, %c0_60], %110 {strides = array<i32>} : memref<4x16x1xf32, #tpu.memory_space<vmem>>, vector<1x16x1xf32>,
      %111 = vector.extract_strided_slice %22 {offsets = [0, 64], sizes = [16, 32], strides = [1, 1]} : vector<16x128xbf16> to vector<16x32xbf16>
      %112 = arith.extf %111 : vector<16x32xbf16> to vector<16x32xf32>
      %cst_61 = arith.constant 0.176776692 : f32
      %113 = vector.broadcast %cst_61 : f32 to vector<16x32xf32>
      %114 = arith.mulf %112, %113 : vector<16x32xf32>
      %115 = arith.truncf %114 : vector<16x32xf32> to vector<16x32xbf16>
      %116 = vector.extract_strided_slice %24 {offsets = [0, 64], sizes = [16, 32], strides = [1, 1]} : vector<16x128xbf16> to vector<16x32xbf16>
      %cst_62 = arith.constant dense<0.000000e+00> : vector<16x16xf32>
      %117 = tpu.matmul %115, %116, %cst_62 {dimension_numbers = #tpu.dot_dimension_numbers<[1], [1], [0], [0], [0, 0, 1, 0], [], []>} : vector<16x32xbf16>, vector<16x32xbf16>, vector<16x16xf32> -> vector<16x16xf32>
      %cst_63 = arith.constant -1.000000e+30 : f32
      %118 = vector.broadcast %cst_63 : f32 to vector<16x16xf32>
      %119 = arith.select %20, %117, %118 : vector<16x16xi1>, vector<16x16xf32>
      %c2 = arith.constant 2 : index
      %c0_64 = arith.constant 0 : index
      %c0_65 = arith.constant 0 : index
      %120 = vector.load %arg8[%c2, %c0_64, %c0_65] : memref<4x16x1xf32, #tpu.memory_space<vmem>>, vector<1x16x1xf32>
      %121 = vector.shape_cast %120 : vector<1x16x1xf32> to vector<16x1xf32>
      %cst_66 = arith.constant dense<0xFF800000> : vector<16xf32>
      %122 = vector.multi_reduction <maximumf>, %119, %cst_66 [1] : vector<16x16xf32> to vector<16xf32>
      %123 = vector.shape_cast %122 : vector<16xf32> to vector<16x1xf32>
      %124 = arith.maximumf %121, %123 : vector<16x1xf32>
      %125 = arith.subf %121, %124 : vector<16x1xf32>
      %126 = math.exp %125 : vector<16x1xf32>
      %127 = vector.broadcast %124 : vector<16x1xf32> to vector<16x16xf32>
      %128 = arith.subf %119, %127 : vector<16x16xf32>
      %129 = math.exp %128 : vector<16x16xf32>
      %c2_67 = arith.constant 2 : index
      %c0_68 = arith.constant 0 : index
      %c0_69 = arith.constant 0 : index
      %130 = vector.load %arg9[%c2_67, %c0_68, %c0_69] : memref<4x16x1xf32, #tpu.memory_space<vmem>>, vector<1x16x1xf32>
      %131 = vector.shape_cast %130 : vector<1x16x1xf32> to vector<16x1xf32>
      %132 = arith.mulf %126, %131 : vector<16x1xf32>
      %cst_70 = arith.constant dense<0.000000e+00> : vector<16xf32>
      %133 = vector.multi_reduction <add>, %129, %cst_70 [1] : vector<16x16xf32> to vector<16xf32>
      %134 = vector.shape_cast %133 : vector<16xf32> to vector<16x1xf32>
      %135 = arith.addf %132, %134 : vector<16x1xf32>
      %c2_71 = arith.constant 2 : index
      %c0_72 = arith.constant 0 : index
      %c0_73 = arith.constant 0 : index
      %136 = vector.load %arg9[%c2_71, %c0_72, %c0_73] : memref<4x16x1xf32, #tpu.memory_space<vmem>>, vector<1x16x1xf32>
      %137 = vector.shape_cast %136 : vector<1x16x1xf32> to vector<16x1xf32>
      %138 = vector.shape_cast %135 : vector<16x1xf32> to vector<1x16x1xf32>
      tpu.vector_store %arg9[%c2_71, %c0_72, %c0_73], %138 {strides = array<i32>} : memref<4x16x1xf32, #tpu.memory_space<vmem>>, vector<1x16x1xf32>,
      %c2_74 = arith.constant 2 : index
      %c0_75 = arith.constant 0 : index
      %c0_76 = arith.constant 0 : index
      %139 = vector.load %arg10[%c2_74, %c0_75, %c0_76] : memref<4x16x32xf32, #tpu.memory_space<vmem>>, vector<1x16x32xf32>
      %140 = vector.shape_cast %139 : vector<1x16x32xf32> to vector<16x32xf32>
      %141 = vector.broadcast %126 : vector<16x1xf32> to vector<16x32xf32>
      %142 = arith.mulf %141, %140 : vector<16x32xf32>
      %143 = arith.truncf %129 : vector<16x16xf32> to vector<16x16xbf16>
      %144 = vector.extract_strided_slice %26 {offsets = [0, 64], sizes = [16, 32], strides = [1, 1]} : vector<16x128xbf16> to vector<16x32xbf16>
      %cst_77 = arith.constant dense<0.000000e+00> : vector<16x32xf32>
      %145 = tpu.matmul %143, %144, %cst_77 {dimension_numbers = #tpu.dot_dimension_numbers<[1], [0], [0], [1], [0, 0, 1, 1], [], []>} : vector<16x16xbf16>, vector<16x32xbf16>, vector<16x32xf32> -> vector<16x32xf32>
      %146 = arith.addf %142, %145 : vector<16x32xf32>
      %c2_78 = arith.constant 2 : index
      %c0_79 = arith.constant 0 : index
      %c0_80 = arith.constant 0 : index
      %147 = vector.load %arg10[%c2_78, %c0_79, %c0_80] : memref<4x16x32xf32, #tpu.memory_space<vmem>>, vector<1x16x32xf32>
      %148 = vector.shape_cast %147 : vector<1x16x32xf32> to vector<16x32xf32>
      %149 = vector.shape_cast %146 : vector<16x32xf32> to vector<1x16x32xf32>
      tpu.vector_store %arg10[%c2_78, %c0_79, %c0_80], %149 {strides = array<i32>} : memref<4x16x32xf32, #tpu.memory_space<vmem>>, vector<1x16x32xf32>,
      %c2_81 = arith.constant 2 : index
      %c0_82 = arith.constant 0 : index
      %c0_83 = arith.constant 0 : index
      %150 = vector.load %arg8[%c2_81, %c0_82, %c0_83] : memref<4x16x1xf32, #tpu.memory_space<vmem>>, vector<1x16x1xf32>
      %151 = vector.shape_cast %150 : vector<1x16x1xf32> to vector<16x1xf32>
      %152 = vector.shape_cast %124 : vector<16x1xf32> to vector<1x16x1xf32>
      tpu.vector_store %arg8[%c2_81, %c0_82, %c0_83], %152 {strides = array<i32>} : memref<4x16x1xf32, #tpu.memory_space<vmem>>, vector<1x16x1xf32>,
      %153 = vector.extract_strided_slice %22 {offsets = [0, 96], sizes = [16, 32], strides = [1, 1]} : vector<16x128xbf16> to vector<16x32xbf16>
      %154 = arith.extf %153 : vector<16x32xbf16> to vector<16x32xf32>
      %cst_84 = arith.constant 0.176776692 : f32
      %155 = vector.broadcast %cst_84 : f32 to vector<16x32xf32>
      %156 = arith.mulf %154, %155 : vector<16x32xf32>
      %157 = arith.truncf %156 : vector<16x32xf32> to vector<16x32xbf16>
      %158 = vector.extract_strided_slice %24 {offsets = [0, 96], sizes = [16, 32], strides = [1, 1]} : vector<16x128xbf16> to vector<16x32xbf16>
      %cst_85 = arith.constant dense<0.000000e+00> : vector<16x16xf32>
      %159 = tpu.matmul %157, %158, %cst_85 {dimension_numbers = #tpu.dot_dimension_numbers<[1], [1], [0], [0], [0, 0, 1, 0], [], []>} : vector<16x32xbf16>, vector<16x32xbf16>, vector<16x16xf32> -> vector<16x16xf32>
      %cst_86 = arith.constant -1.000000e+30 : f32
      %160 = vector.broadcast %cst_86 : f32 to vector<16x16xf32>
      %161 = arith.select %20, %159, %160 : vector<16x16xi1>, vector<16x16xf32>
      %c3 = arith.constant 3 : index
      %c0_87 = arith.constant 0 : index
      %c0_88 = arith.constant 0 : index
      %162 = vector.load %arg8[%c3, %c0_87, %c0_88] : memref<4x16x1xf32, #tpu.memory_space<vmem>>, vector<1x16x1xf32>
      %163 = vector.shape_cast %162 : vector<1x16x1xf32> to vector<16x1xf32>
      %cst_89 = arith.constant dense<0xFF800000> : vector<16xf32>
      %164 = vector.multi_reduction <maximumf>, %161, %cst_89 [1] : vector<16x16xf32> to vector<16xf32>
      %165 = vector.shape_cast %164 : vector<16xf32> to vector<16x1xf32>
      %166 = arith.maximumf %163, %165 : vector<16x1xf32>
      %167 = arith.subf %163, %166 : vector<16x1xf32>
      %168 = math.exp %167 : vector<16x1xf32>
      %169 = vector.broadcast %166 : vector<16x1xf32> to vector<16x16xf32>
      %170 = arith.subf %161, %169 : vector<16x16xf32>
      %171 = math.exp %170 : vector<16x16xf32>
      %c3_90 = arith.constant 3 : index
      %c0_91 = arith.constant 0 : index
      %c0_92 = arith.constant 0 : index
      %172 = vector.load %arg9[%c3_90, %c0_91, %c0_92] : memref<4x16x1xf32, #tpu.memory_space<vmem>>, vector<1x16x1xf32>
      %173 = vector.shape_cast %172 : vector<1x16x1xf32> to vector<16x1xf32>
      %174 = arith.mulf %168, %173 : vector<16x1xf32>
      %cst_93 = arith.constant dense<0.000000e+00> : vector<16xf32>
      %175 = vector.multi_reduction <add>, %171, %cst_93 [1] : vector<16x16xf32> to vector<16xf32>
      %176 = vector.shape_cast %175 : vector<16xf32> to vector<16x1xf32>
      %177 = arith.addf %174, %176 : vector<16x1xf32>
      %c3_94 = arith.constant 3 : index
      %c0_95 = arith.constant 0 : index
      %c0_96 = arith.constant 0 : index
      %178 = vector.load %arg9[%c3_94, %c0_95, %c0_96] : memref<4x16x1xf32, #tpu.memory_space<vmem>>, vector<1x16x1xf32>
      %179 = vector.shape_cast %178 : vector<1x16x1xf32> to vector<16x1xf32>
      %180 = vector.shape_cast %177 : vector<16x1xf32> to vector<1x16x1xf32>
      tpu.vector_store %arg9[%c3_94, %c0_95, %c0_96], %180 {strides = array<i32>} : memref<4x16x1xf32, #tpu.memory_space<vmem>>, vector<1x16x1xf32>,
      %c3_97 = arith.constant 3 : index
      %c0_98 = arith.constant 0 : index
      %c0_99 = arith.constant 0 : index
      %181 = vector.load %arg10[%c3_97, %c0_98, %c0_99] : memref<4x16x32xf32, #tpu.memory_space<vmem>>, vector<1x16x32xf32>
      %182 = vector.shape_cast %181 : vector<1x16x32xf32> to vector<16x32xf32>
      %183 = vector.broadcast %168 : vector<16x1xf32> to vector<16x32xf32>
      %184 = arith.mulf %183, %182 : vector<16x32xf32>
      %185 = arith.truncf %171 : vector<16x16xf32> to vector<16x16xbf16>
      %186 = vector.extract_strided_slice %26 {offsets = [0, 96], sizes = [16, 32], strides = [1, 1]} : vector<16x128xbf16> to vector<16x32xbf16>
      %cst_100 = arith.constant dense<0.000000e+00> : vector<16x32xf32>
      %187 = tpu.matmul %185, %186, %cst_100 {dimension_numbers = #tpu.dot_dimension_numbers<[1], [0], [0], [1], [0, 0, 1, 1], [], []>} : vector<16x16xbf16>, vector<16x32xbf16>, vector<16x32xf32> -> vector<16x32xf32>
      %188 = arith.addf %184, %187 : vector<16x32xf32>
      %c3_101 = arith.constant 3 : index
      %c0_102 = arith.constant 0 : index
      %c0_103 = arith.constant 0 : index
      %189 = vector.load %arg10[%c3_101, %c0_102, %c0_103] : memref<4x16x32xf32, #tpu.memory_space<vmem>>, vector<1x16x32xf32>
      %190 = vector.shape_cast %189 : vector<1x16x32xf32> to vector<16x32xf32>
      %191 = vector.shape_cast %188 : vector<16x32xf32> to vector<1x16x32xf32>
      tpu.vector_store %arg10[%c3_101, %c0_102, %c0_103], %191 {strides = array<i32>} : memref<4x16x32xf32, #tpu.memory_space<vmem>>, vector<1x16x32xf32>,
      %c3_104 = arith.constant 3 : index
      %c0_105 = arith.constant 0 : index
      %c0_106 = arith.constant 0 : index
      %192 = vector.load %arg8[%c3_104, %c0_105, %c0_106] : memref<4x16x1xf32, #tpu.memory_space<vmem>>, vector<1x16x1xf32>
      %193 = vector.shape_cast %192 : vector<1x16x1xf32> to vector<16x1xf32>
      %194 = vector.shape_cast %166 : vector<16x1xf32> to vector<1x16x1xf32>
      tpu.vector_store %arg8[%c3_104, %c0_105, %c0_106], %194 {strides = array<i32>} : memref<4x16x1xf32, #tpu.memory_space<vmem>>, vector<1x16x1xf32>,
    } else {
    }
    %c0_i32_3 = arith.constant 0 : i32
    %9 = arith.cmpi eq, %arg3, %c0_i32_3 : i32
    %10 = arith.extui %9 : i1 to i32
    %c0_i32_4 = arith.constant 0 : i32
    %11 = arith.cmpi ne, %10, %c0_i32_4 : i32
    scf.if %11 {
      %c0 = arith.constant 0 : index
      %c0_5 = arith.constant 0 : index
      %c0_6 = arith.constant 0 : index
      %12 = vector.load %arg9[%c0, %c0_5, %c0_6] : memref<4x16x1xf32, #tpu.memory_space<vmem>>, vector<1x16x1xf32>
      %13 = vector.shape_cast %12 : vector<1x16x1xf32> to vector<16x1xf32>
      %14 = tpu.reciprocal %13 {approx = true} : vector<16x1xf32> -> vector<16x1xf32>
      %c0_7 = arith.constant 0 : index
      %c0_8 = arith.constant 0 : index
      %c0_9 = arith.constant 0 : index
      %15 = vector.load %arg10[%c0_7, %c0_8, %c0_9] : memref<4x16x32xf32, #tpu.memory_space<vmem>>, vector<1x16x32xf32>
      %16 = vector.shape_cast %15 : vector<1x16x32xf32> to vector<16x32xf32>
      %17 = vector.broadcast %14 : vector<16x1xf32> to vector<16x32xf32>
      %18 = arith.mulf %16, %17 : vector<16x32xf32>
      %19 = arith.truncf %18 : vector<16x32xf32> to vector<16x32xbf16>
      %c1 = arith.constant 1 : index
      %c0_10 = arith.constant 0 : index
      %c0_11 = arith.constant 0 : index
      %20 = vector.load %arg9[%c1, %c0_10, %c0_11] : memref<4x16x1xf32, #tpu.memory_space<vmem>>, vector<1x16x1xf32>
      %21 = vector.shape_cast %20 : vector<1x16x1xf32> to vector<16x1xf32>
      %22 = tpu.reciprocal %21 {approx = true} : vector<16x1xf32> -> vector<16x1xf32>
      %c1_12 = arith.constant 1 : index
      %c0_13 = arith.constant 0 : index
      %c0_14 = arith.constant 0 : index
      %23 = vector.load %arg10[%c1_12, %c0_13, %c0_14] : memref<4x16x32xf32, #tpu.memory_space<vmem>>, vector<1x16x32xf32>
      %24 = vector.shape_cast %23 : vector<1x16x32xf32> to vector<16x32xf32>
      %25 = vector.broadcast %22 : vector<16x1xf32> to vector<16x32xf32>
      %26 = arith.mulf %24, %25 : vector<16x32xf32>
      %27 = arith.truncf %26 : vector<16x32xf32> to vector<16x32xbf16>
      %c2 = arith.constant 2 : index
      %c0_15 = arith.constant 0 : index
      %c0_16 = arith.constant 0 : index
      %28 = vector.load %arg9[%c2, %c0_15, %c0_16] : memref<4x16x1xf32, #tpu.memory_space<vmem>>, vector<1x16x1xf32>
      %29 = vector.shape_cast %28 : vector<1x16x1xf32> to vector<16x1xf32>
      %30 = tpu.reciprocal %29 {approx = true} : vector<16x1xf32> -> vector<16x1xf32>
      %c2_17 = arith.constant 2 : index
      %c0_18 = arith.constant 0 : index
      %c0_19 = arith.constant 0 : index
      %31 = vector.load %arg10[%c2_17, %c0_18, %c0_19] : memref<4x16x32xf32, #tpu.memory_space<vmem>>, vector<1x16x32xf32>
      %32 = vector.shape_cast %31 : vector<1x16x32xf32> to vector<16x32xf32>
      %33 = vector.broadcast %30 : vector<16x1xf32> to vector<16x32xf32>
      %34 = arith.mulf %32, %33 : vector<16x32xf32>
      %35 = arith.truncf %34 : vector<16x32xf32> to vector<16x32xbf16>
      %c3 = arith.constant 3 : index
      %c0_20 = arith.constant 0 : index
      %c0_21 = arith.constant 0 : index
      %36 = vector.load %arg9[%c3, %c0_20, %c0_21] : memref<4x16x1xf32, #tpu.memory_space<vmem>>, vector<1x16x1xf32>
      %37 = vector.shape_cast %36 : vector<1x16x1xf32> to vector<16x1xf32>
      %38 = tpu.reciprocal %37 {approx = true} : vector<16x1xf32> -> vector<16x1xf32>
      %c3_22 = arith.constant 3 : index
      %c0_23 = arith.constant 0 : index
      %c0_24 = arith.constant 0 : index
      %39 = vector.load %arg10[%c3_22, %c0_23, %c0_24] : memref<4x16x32xf32, #tpu.memory_space<vmem>>, vector<1x16x32xf32>
      %40 = vector.shape_cast %39 : vector<1x16x32xf32> to vector<16x32xf32>
      %41 = vector.broadcast %38 : vector<16x1xf32> to vector<16x32xf32>
      %42 = arith.mulf %40, %41 : vector<16x32xf32>
      %43 = arith.truncf %42 : vector<16x32xf32> to vector<16x32xbf16>
      %44 = tpu.concatenate %19, %27, %35, %43 in 1 : vector<16x32xbf16>, vector<16x32xbf16>, vector<16x32xbf16>, vector<16x32xbf16> -> vector<16x128xbf16>
      %c0_25 = arith.constant 0 : index
      %c0_26 = arith.constant 0 : index
      %c0_27 = arith.constant 0 : index
      %45 = vector.load %arg7[%c0_25, %c0_26, %c0_27] : memref<1x16x128xbf16, #tpu.memory_space<vmem>>, vector<1x16x128xbf16>
      %46 = vector.shape_cast %45 : vector<1x16x128xbf16> to vector<16x128xbf16>
      %47 = vector.shape_cast %44 : vector<16x128xbf16> to vector<1x16x128xbf16>
      tpu.vector_store %arg7[%c0_25, %c0_26, %c0_27], %47 {strides = array<i32>} : memref<1x16x128xbf16, #tpu.memory_space<vmem>>, vector<1x16x128xbf16>,
    } else {
    }
    return
  }
  func.func @transform_0(%arg0: i32, %arg1: i32, %arg2: i32, %arg3: i32) -> (i32, i32, i32) {
    %c0_i32 = arith.constant 0 : i32
    return %arg0, %arg2, %arg1 : i32, i32, i32
  }
  func.func @transform_1(%arg0: i32, %arg1: i32, %arg2: i32, %arg3: i32) -> (i32, i32, i32) {
    %c1_i32 = arith.constant 1 : i32
    %0 = arith.addi %c1_i32, %arg1 : i32
    %c0_i32 = arith.constant 0 : i32
    return %arg0, %arg3, %0 : i32, i32, i32
  }
  func.func @transform_2(%arg0: i32, %arg1: i32, %arg2: i32, %arg3: i32) -> (i32, i32, i32) {
    %c2_i32 = arith.constant 2 : i32
    %0 = arith.addi %c2_i32, %arg1 : i32
    %c0_i32 = arith.constant 0 : i32
    return %arg0, %arg3, %0 : i32, i32, i32
  }
  func.func @transform_3(%arg0: i32, %arg1: i32, %arg2: i32, %arg3: i32) -> (i32, i32, i32) {
    %c0_i32 = arith.constant 0 : i32
    return %arg0, %arg2, %arg1 : i32, i32, i32
  }
}

module attributes {stable_mosaic.version = 11 : i64} {
  func.func @_linear_bias_res_kernel(%arg0: i32, %arg1: i32, %arg2: i32, %arg3: memref<32x512xbf16, #tpu.memory_space<vmem>>, %arg4: memref<512x128xbf16, #tpu.memory_space<vmem>>, %arg5: memref<1x128xf32, #tpu.memory_space<vmem>>, %arg6: memref<32x128xf32, #tpu.memory_space<vmem>>, %arg7: memref<32x128xf32, #tpu.memory_space<vmem>>, %arg8: memref<32x128xf32, #tpu.memory_space<vmem>>) attributes {dimension_semantics = [#tpu.dimension_semantics<parallel>, #tpu.dimension_semantics<parallel>, #tpu.dimension_semantics<arbitrary>], iteration_bounds = array<i64: 1, 1, 1>, scalar_prefetch = 0 : i64, scratch_operands = 1 : i64, tpu.core_type = #tpu.core_type<tc>, window_params = [{transform_indices = @transform_0, window_bounds = array<i64: 32, 512>}, {transform_indices = @transform_1, window_bounds = array<i64: 512, 128>}, {transform_indices = @transform_2, window_bounds = array<i64: 1, 128>}, {transform_indices = @transform_3, window_bounds = array<i64: 32, 128>}, {transform_indices = @transform_4, window_bounds = array<i64: 32, 128>}]} {
    %c0_i32 = arith.constant 0 : i32
    %0 = arith.cmpi eq, %arg2, %c0_i32 : i32
    %1 = arith.extui %0 : i1 to i32
    %c0_i32_0 = arith.constant 0 : i32
    %2 = arith.cmpi ne, %1, %c0_i32_0 : i32
    scf.if %2 {
      %cst_10 = arith.constant 0.000000e+00 : f32
      %12 = vector.broadcast %cst_10 : f32 to vector<32x128xf32>
      %c0_11 = arith.constant 0 : index
      %c0_12 = arith.constant 0 : index
      %13 = vector.load %arg8[%c0_11, %c0_12] : memref<32x128xf32, #tpu.memory_space<vmem>>, vector<32x128xf32>
      tpu.vector_store %arg8[%c0_11, %c0_12], %12 {strides = array<i32>} : memref<32x128xf32, #tpu.memory_space<vmem>>, vector<32x128xf32>,
    } else {
    }
    %c0 = arith.constant 0 : index
    %c0_1 = arith.constant 0 : index
    %3 = vector.load %arg8[%c0, %c0_1] : memref<32x128xf32, #tpu.memory_space<vmem>>, vector<32x128xf32>
    %c0_2 = arith.constant 0 : index
    %c0_3 = arith.constant 0 : index
    %4 = vector.load %arg3[%c0_2, %c0_3] : memref<32x512xbf16, #tpu.memory_space<vmem>>, vector<32x512xbf16>
    %c0_4 = arith.constant 0 : index
    %c0_5 = arith.constant 0 : index
    %5 = vector.load %arg4[%c0_4, %c0_5] : memref<512x128xbf16, #tpu.memory_space<vmem>>, vector<512x128xbf16>
    %cst = arith.constant dense<0.000000e+00> : vector<32x128xf32>
    %6 = tpu.matmul %4, %5, %cst {dimension_numbers = #tpu.dot_dimension_numbers<[1], [0], [0], [1], [0, 0, 1, 1], [], []>} : vector<32x512xbf16>, vector<512x128xbf16>, vector<32x128xf32> -> vector<32x128xf32>
    %7 = arith.addf %3, %6 : vector<32x128xf32>
    %c0_6 = arith.constant 0 : index
    %c0_7 = arith.constant 0 : index
    %8 = vector.load %arg8[%c0_6, %c0_7] : memref<32x128xf32, #tpu.memory_space<vmem>>, vector<32x128xf32>
    tpu.vector_store %arg8[%c0_6, %c0_7], %7 {strides = array<i32>} : memref<32x128xf32, #tpu.memory_space<vmem>>, vector<32x128xf32>,
    %c0_i32_8 = arith.constant 0 : i32
    %9 = arith.cmpi eq, %arg2, %c0_i32_8 : i32
    %10 = arith.extui %9 : i1 to i32
    %c0_i32_9 = arith.constant 0 : i32
    %11 = arith.cmpi ne, %10, %c0_i32_9 : i32
    scf.if %11 {
      %c0_10 = arith.constant 0 : index
      %c0_11 = arith.constant 0 : index
      %12 = vector.load %arg8[%c0_10, %c0_11] : memref<32x128xf32, #tpu.memory_space<vmem>>, vector<32x128xf32>
      %c0_12 = arith.constant 0 : index
      %c0_13 = arith.constant 0 : index
      %13 = vector.load %arg5[%c0_12, %c0_13] : memref<1x128xf32, #tpu.memory_space<vmem>>, vector<1x128xf32>
      %14 = vector.broadcast %13 : vector<1x128xf32> to vector<32x128xf32>
      %15 = arith.addf %12, %14 : vector<32x128xf32>
      %c0_14 = arith.constant 0 : index
      %c0_15 = arith.constant 0 : index
      %16 = vector.load %arg6[%c0_14, %c0_15] : memref<32x128xf32, #tpu.memory_space<vmem>>, vector<32x128xf32>
      %17 = arith.addf %15, %16 : vector<32x128xf32>
      %c0_16 = arith.constant 0 : index
      %c0_17 = arith.constant 0 : index
      %18 = vector.load %arg7[%c0_16, %c0_17] : memref<32x128xf32, #tpu.memory_space<vmem>>, vector<32x128xf32>
      tpu.vector_store %arg7[%c0_16, %c0_17], %17 {strides = array<i32>} : memref<32x128xf32, #tpu.memory_space<vmem>>, vector<32x128xf32>,
    } else {
    }
    return
  }
  func.func @transform_0(%arg0: i32, %arg1: i32, %arg2: i32) -> (i32, i32) {
    %c0_i32 = arith.constant 0 : i32
    return %arg0, %arg2 : i32, i32
  }
  func.func @transform_1(%arg0: i32, %arg1: i32, %arg2: i32) -> (i32, i32) {
    %c0_i32 = arith.constant 0 : i32
    return %arg2, %arg1 : i32, i32
  }
  func.func @transform_2(%arg0: i32, %arg1: i32, %arg2: i32) -> (i32, i32) {
    %c0_i32 = arith.constant 0 : i32
    %c0_i32_0 = arith.constant 0 : i32
    return %c0_i32, %arg1 : i32, i32
  }
  func.func @transform_3(%arg0: i32, %arg1: i32, %arg2: i32) -> (i32, i32) {
    %c0_i32 = arith.constant 0 : i32
    return %arg0, %arg1 : i32, i32
  }
  func.func @transform_4(%arg0: i32, %arg1: i32, %arg2: i32) -> (i32, i32) {
    %c0_i32 = arith.constant 0 : i32
    return %arg0, %arg1 : i32, i32
  }
}

module attributes {stable_mosaic.version = 11 : i64} {
  func.func @_ln_matmul_kernel(%arg0: i32, %arg1: i32, %arg2: memref<32x128xf32, #tpu.memory_space<vmem>>, %arg3: memref<1x128xf32, #tpu.memory_space<vmem>>, %arg4: memref<1x128xf32, #tpu.memory_space<vmem>>, %arg5: memref<128x256xbf16, #tpu.memory_space<vmem>>, %arg6: memref<32x256xf32, #tpu.memory_space<vmem>>, %arg7: memref<32x128xbf16, #tpu.memory_space<vmem>>) attributes {dimension_semantics = [#tpu.dimension_semantics<parallel>, #tpu.dimension_semantics<arbitrary>], iteration_bounds = array<i64: 1, 1>, scalar_prefetch = 0 : i64, scratch_operands = 1 : i64, tpu.core_type = #tpu.core_type<tc>, window_params = [{transform_indices = @transform_0, window_bounds = array<i64: 32, 128>}, {pipeline_mode = #tpu.pipeline_mode<synchronous>, transform_indices = @transform_1, window_bounds = array<i64: 1, 128>}, {pipeline_mode = #tpu.pipeline_mode<synchronous>, transform_indices = @transform_2, window_bounds = array<i64: 1, 128>}, {transform_indices = @transform_3, window_bounds = array<i64: 128, 256>}, {transform_indices = @transform_4, window_bounds = array<i64: 32, 256>}]} {
    %c0_i32 = arith.constant 0 : i32
    %0 = arith.cmpi eq, %arg1, %c0_i32 : i32
    %1 = arith.extui %0 : i1 to i32
    %c0_i32_0 = arith.constant 0 : i32
    %2 = arith.cmpi ne, %1, %c0_i32_0 : i32
    scf.if %2 {
      %c0_6 = arith.constant 0 : index
      %c0_7 = arith.constant 0 : index
      %7 = vector.load %arg2[%c0_6, %c0_7] : memref<32x128xf32, #tpu.memory_space<vmem>>, vector<32x128xf32>
      %cst_8 = arith.constant dense<0.000000e+00> : vector<32xf32>
      %8 = vector.multi_reduction <add>, %7, %cst_8 [1] : vector<32x128xf32> to vector<32xf32>
      %9 = vector.shape_cast %8 : vector<32xf32> to vector<32x1xf32>
      %cst_9 = arith.constant 1.280000e+02 : f32
      %10 = vector.broadcast %cst_9 : f32 to vector<32x1xf32>
      %11 = arith.divf %9, %10 : vector<32x1xf32>
      %12 = vector.broadcast %11 : vector<32x1xf32> to vector<32x128xf32>
      %13 = arith.subf %7, %12 : vector<32x128xf32>
      %14 = arith.mulf %13, %13 : vector<32x128xf32>
      %cst_10 = arith.constant dense<0.000000e+00> : vector<32xf32>
      %15 = vector.multi_reduction <add>, %14, %cst_10 [1] : vector<32x128xf32> to vector<32xf32>
      %16 = vector.shape_cast %15 : vector<32xf32> to vector<32x1xf32>
      %cst_11 = arith.constant 1.280000e+02 : f32
      %17 = vector.broadcast %cst_11 : f32 to vector<32x1xf32>
      %18 = arith.divf %16, %17 : vector<32x1xf32>
      %cst_12 = arith.constant 9.99999974E-6 : f32
      %19 = vector.broadcast %cst_12 : f32 to vector<32x1xf32>
      %20 = arith.addf %18, %19 : vector<32x1xf32>
      %21 = math.rsqrt %20 : vector<32x1xf32>
      %22 = vector.broadcast %21 : vector<32x1xf32> to vector<32x128xf32>
      %23 = arith.mulf %13, %22 : vector<32x128xf32>
      %c0_13 = arith.constant 0 : index
      %c0_14 = arith.constant 0 : index
      %24 = vector.load %arg3[%c0_13, %c0_14] : memref<1x128xf32, #tpu.memory_space<vmem>>, vector<1x128xf32>
      %25 = vector.broadcast %24 : vector<1x128xf32> to vector<32x128xf32>
      %26 = arith.mulf %23, %25 : vector<32x128xf32>
      %c0_15 = arith.constant 0 : index
      %c0_16 = arith.constant 0 : index
      %27 = vector.load %arg4[%c0_15, %c0_16] : memref<1x128xf32, #tpu.memory_space<vmem>>, vector<1x128xf32>
      %28 = vector.broadcast %27 : vector<1x128xf32> to vector<32x128xf32>
      %29 = arith.addf %26, %28 : vector<32x128xf32>
      %30 = arith.truncf %29 : vector<32x128xf32> to vector<32x128xbf16>
      %c0_17 = arith.constant 0 : index
      %c0_18 = arith.constant 0 : index
      %31 = vector.load %arg7[%c0_17, %c0_18] : memref<32x128xbf16, #tpu.memory_space<vmem>>, vector<32x128xbf16>
      tpu.vector_store %arg7[%c0_17, %c0_18], %30 {strides = array<i32>} : memref<32x128xbf16, #tpu.memory_space<vmem>>, vector<32x128xbf16>,
    } else {
    }
    %c0 = arith.constant 0 : index
    %c0_1 = arith.constant 0 : index
    %3 = vector.load %arg7[%c0, %c0_1] : memref<32x128xbf16, #tpu.memory_space<vmem>>, vector<32x128xbf16>
    %c0_2 = arith.constant 0 : index
    %c0_3 = arith.constant 0 : index
    %4 = vector.load %arg5[%c0_2, %c0_3] : memref<128x256xbf16, #tpu.memory_space<vmem>>, vector<128x256xbf16>
    %cst = arith.constant dense<0.000000e+00> : vector<32x256xf32>
    %5 = tpu.matmul %3, %4, %cst {dimension_numbers = #tpu.dot_dimension_numbers<[1], [0], [0], [1], [0, 0, 1, 1], [], []>} : vector<32x128xbf16>, vector<128x256xbf16>, vector<32x256xf32> -> vector<32x256xf32>
    %c0_4 = arith.constant 0 : index
    %c0_5 = arith.constant 0 : index
    %6 = vector.load %arg6[%c0_4, %c0_5] : memref<32x256xf32, #tpu.memory_space<vmem>>, vector<32x256xf32>
    tpu.vector_store %arg6[%c0_4, %c0_5], %5 {strides = array<i32>} : memref<32x256xf32, #tpu.memory_space<vmem>>, vector<32x256xf32>,
    return
  }
  func.func @transform_0(%arg0: i32, %arg1: i32) -> (i32, i32) {
    %c0_i32 = arith.constant 0 : i32
    %c0_i32_0 = arith.constant 0 : i32
    return %arg0, %c0_i32 : i32, i32
  }
  func.func @transform_1(%arg0: i32, %arg1: i32) -> (i32, i32) {
    %c0_i32 = arith.constant 0 : i32
    %c0_i32_0 = arith.constant 0 : i32
    %c0_i32_1 = arith.constant 0 : i32
    return %c0_i32, %c0_i32_0 : i32, i32
  }
  func.func @transform_2(%arg0: i32, %arg1: i32) -> (i32, i32) {
    %c0_i32 = arith.constant 0 : i32
    %c0_i32_0 = arith.constant 0 : i32
    %c0_i32_1 = arith.constant 0 : i32
    return %c0_i32, %c0_i32_0 : i32, i32
  }
  func.func @transform_3(%arg0: i32, %arg1: i32) -> (i32, i32) {
    %c0_i32 = arith.constant 0 : i32
    %c0_i32_0 = arith.constant 0 : i32
    return %c0_i32, %arg1 : i32, i32
  }
  func.func @transform_4(%arg0: i32, %arg1: i32) -> (i32, i32) {
    %c0_i32 = arith.constant 0 : i32
    return %arg0, %arg1 : i32, i32
  }
}

</mosaic_0001>

<bundles_post_ra>
// kernel: gpt_forward.13
= control target key start
LH: loop header
LB: loop body
LE: loop exit
PB: predicated region body
PF: predicated region fallthrough
CT: control target
= control target key end

     0   :  { %s334_s1 = inlined_call_operand.vmem [shape: bf16[128,128], index: 1, kind: input, shape index: {}]   ;;  %s335_s0 = inlined_call_operand.vmem [shape: bf16[32,128], index: 0, kind: input, shape index: {}]   ;;  %s336_s2 = inlined_call_operand.vmem [shape: f32[1,128], index: 2, kind: input, shape index: {}]   ;;  %s337_s3 = inlined_call_operand.vmem [shape: f32[32,128], index: 3, kind: input, shape index: {}]   ;;  %s338_s4 = inlined_call_operand.vmem [shape: f32[32,128], index: 4, kind: output, shape index: {}]  }
   0x1   :  { %v242_v0 = vld [vmem:[%s334_s1] sm:$0xff]   ;;  %v243_v1 = vld [vmem:[%s334_s1 + $0x8] sm:$0xff]   ;;  %v244_v2 = vld [vmem:[%s334_s1 + $0x10] sm:$0xff]  }
   0x2   :  { %222 = vmatprep.subr.bf16.mxu0 %v242_v0  ;;  %v245_v3 = vld [vmem:[%s334_s1 + $0x18] sm:$0xff]   ;;  %v250_v4 = vld [vmem:[%s335_s0] sm:$0xff]   ;;  %v247_v6 = vld [vmem:[%s334_s1 + $0x28] sm:$0xff]  }
   0x3   :  { %223 = vmatpush3.bf16.msra.mxu0 %v242_v0  ;;  %238 = vmatprep.mubr.bf16.mxu0 %v250_v4  ;;  %v246_v5 = vld [vmem:[%s334_s1 + $0x20] sm:$0xff]   ;;  %v248_v7 = vld [vmem:[%s334_s1 + $0x30] sm:$0xff]   ;;  %v249_v8 = vld [vmem:[%s334_s1 + $0x38] sm:$0xff]  }
   0x4   :  { %224 = vmatprep.subr.bf16.mxu0 %v243_v1  ;;  %v251_v9 = vld [vmem:[%s335_s0 + $0x8] sm:$0xff]   ;;  %v211_v10 = vld [vmem:[%s336_s2] ss:$0 sm:$0xff]  ;;  %v187_v12 = vld [vmem:[%s337_s3 + $0x10] sm:$0xff] }
   0x5   :  { %v185_v15 = vld [vmem:[%s337_s3] sm:$0xff]  ;;  %v188_v18 = vld [vmem:[%s337_s3 + $0x18] sm:$0xff]  ;;  %v186_v22 = vld [vmem:[%s337_s3 + $0x8] sm:$0xff] }
   0x7   :  { %225 = vmatpush3.bf16.msra.mxu0 %v243_v1 }
   0x8   :  { %226 = vmatprep.subr.bf16.mxu0 %v244_v2 }
   0xb   :  { %227 = vmatpush3.bf16.msra.mxu0 %v244_v2 }
   0xc   :  { %228 = vmatprep.subr.bf16.mxu0 %v245_v3 }
   0xf   :  { %229 = vmatpush3.bf16.msra.mxu0 %v245_v3 }
  0x10   :  { %230 = vmatprep.subr.bf16.mxu0 %v246_v5 }
  0x13   :  { %231 = vmatpush3.bf16.msra.mxu0 %v246_v5 }
  0x14   :  { %232 = vmatprep.subr.bf16.mxu0 %v247_v6 }
  0x17   :  { %233 = vmatpush3.bf16.msra.mxu0 %v247_v6 }
  0x18   :  { %234 = vmatprep.subr.bf16.mxu0 %v248_v7 }
  0x1b   :  { %235 = vmatpush3.bf16.msra.mxu0 %v248_v7 }
  0x1c   :  { %236 = vmatprep.subr.bf16.mxu0 %v249_v8 }
  0x1f   :  { %237 = vmatpush3.bf16.msra.mxu0 %v249_v8 }
  0x22   :  { %239 = vmatmul.mubr.bf16.vlgmr.msra.gmra.mrb[0].mxu0 %v251_v9 }
  0xf5   :  { %v240_v11 = vpop.f32.mrb[0].mxu0 }
  0xf6   :  { %v183_v13 = vadd.f32 %v240_v11, %v211_v10  ;;  %v144_v14 = vpop.f32.mrb[1].mxu0 }
  0xf7   :  { %v181_v16 = vadd.f32 %v211_v10, %v144_v14  ;;  %v241_v17 = vpop.f32.mrb[2].mxu0 }
  0xf8   :  { %v191_v19 = vadd.f32 %v187_v12, %v183_v13  ;;  %v184_v20 = vadd.f32 %v241_v17, %v211_v10  ;;  %v147_v21 = vpop.f32.mrb[3].mxu0 }
  0xf9   :  { %v189_v23 = vadd.f32 %v185_v15, %v181_v16  ;;  %v182_v24 = vadd.f32 %v211_v10, %v147_v21 }
  0xfa   :  { %195 = vst [vmem:[%s338_s4 + $0x10] sm:$0xff] %v191_v19  ;;  %v192_v25 = vadd.f32 %v188_v18, %v184_v20 }
  0xfb   :  { %193 = vst [vmem:[%s338_s4] sm:$0xff] %v189_v23  ;;  %v190_v26 = vadd.f32 %v186_v22, %v182_v24 }
  0xfc   :  { %196 = vst [vmem:[%s338_s4 + $0x18] sm:$0xff] %v192_v25 }
  0xfd   :  { %194 = vst [vmem:[%s338_s4 + $0x8] sm:$0xff] %v190_v26 }

// kernel: gpt_forward.11
= control target key start
LH: loop header
LB: loop body
LE: loop exit
PB: predicated region body
PF: predicated region fallthrough
CT: control target
= control target key end

     0   :  { %v546_v39 = vmov 0   ;;  %s714_s0 = inlined_call_operand.vmem [shape: f32[32,128], index: 0, kind: input, shape index: {}]   ;;  %s715_s3 = inlined_call_operand.vmem [shape: bf16[128,384], index: 3, kind: input, shape index: {}]   ;;  %s716_s1 = inlined_call_operand.vmem [shape: f32[1,128], index: 1, kind: input, shape index: {}]   ;;  %s717_s2 = inlined_call_operand.vmem [shape: f32[1,128], index: 2, kind: input, shape index: {}]   ;;  %s718_s4 = inlined_call_operand.vmem [shape: f32[1,384], index: 4, kind: input, shape index: {}]   ;;  %s719_s5 = inlined_call_operand.vmem [shape: bf16[32,384], index: 5, kind: output, shape index: {}]  }
   0x1   :  { %v25_v0 = vld [vmem:[%s714_s0] sm:$0xff]  ;;  %v27_v1 = vld [vmem:[%s714_s0 + $0x10] sm:$0xff]  ;;  %v26_v2 = vld [vmem:[%s714_s0 + $0x8] sm:$0xff]  ;;  %311 = vmatprep.mubr.bf16.mxu0 %v546_v39 }
   0x2   :  { %29 = vadd.xlane.f32.xlu0 %v25_v0  ;;  %33 = vadd.xlane.f32.xlu1 %v27_v1  ;;  %v28_v3 = vld [vmem:[%s714_s0 + $0x18] sm:$0xff]  ;;  %v506_v4 = vld [vmem:[%s715_s3 + $0x4] ss:$12 sps:$4 sm:$0xff]   ;;  %v508_v5 = vld [vmem:[%s715_s3] ss:$12 sps:$4 sm:$0xff]  }
   0x3   :  { %279 = vmatprep.subr.bf16.mxu0 %v506_v4  ;;  %v509_v6 = vld [vmem:[%s715_s3 + $0x1c] ss:$12 sps:$4 sm:$0xff]   ;;  %v512_v24 = vld [vmem:[%s715_s3 + $0x18] ss:$12 sps:$4 sm:$0xff]   ;;  %v513_v25 = vld [vmem:[%s715_s3 + $0x34] ss:$12 sps:$4 sm:$0xff]  }
   0x4   :  { %280 = vmatpush1.bf16.msra.mxu0 %v508_v5  ;;  %v511_v7 = vld [vmem:[%s715_s3 + $0x8] ss:$12 sps:$4 sm:$0xff]   ;;  %v515_v26 = vld [vmem:[%s715_s3 + $0x20] ss:$12 sps:$4 sm:$0xff]   ;;  %v516_v27 = vld [vmem:[%s715_s3 + $0x30] ss:$12 sps:$4 sm:$0xff]  }
   0x5   :  { %281 = vmatprep.subr.bf16.mxu0 %v509_v6  ;;  %485 = vmatprep.subr.bf16.mxu1 %v511_v7  ;;  %v517_v28 = vld [vmem:[%s715_s3 + $0x4c] ss:$12 sps:$4 sm:$0xff]   ;;  %v520_v30 = vld [vmem:[%s715_s3 + $0x48] ss:$12 sps:$4 sm:$0xff]   ;;  %v521_v31 = vld [vmem:[%s715_s3 + $0x64] ss:$12 sps:$4 sm:$0xff]  }
   0x6   :  { %31 = vadd.xlane.f32.xlu0 %v26_v2  ;;  %35 = vadd.xlane.f32.xlu1 %v28_v3  ;;  %v519_v29 = vld [vmem:[%s715_s3 + $0x38] ss:$12 sps:$4 sm:$0xff]   ;;  %v523_v32 = vld [vmem:[%s715_s3 + $0x50] ss:$12 sps:$4 sm:$0xff]   ;;  %v524_v33 = vld [vmem:[%s715_s3 + $0x60] ss:$12 sps:$4 sm:$0xff]  }
   0x7   :  { %486 = vmatpush3.bf16.msra.mxu1 %v511_v7  ;;  %v525_v34 = vld [vmem:[%s715_s3 + $0x7c] ss:$12 sps:$4 sm:$0xff]   ;;  %v528_v36 = vld [vmem:[%s715_s3 + $0x78] ss:$12 sps:$4 sm:$0xff]   ;;  %v529_v37 = vld [vmem:[%s715_s3 + $0x94] ss:$12 sps:$4 sm:$0xff]  }
   0x8   :  { %282 = vmatpush1.bf16.msra.mxu0 %v512_v24  ;;  %487 = vmatprep.subr.bf16.mxu1 %v515_v26  ;;  %v527_v35 = vld [vmem:[%s715_s3 + $0x68] ss:$12 sps:$4 sm:$0xff]   ;;  %v531_v38 = vld [vmem:[%s715_s3 + $0x80] ss:$12 sps:$4 sm:$0xff]   ;;  %v532_v40 = vld [vmem:[%s715_s3 + $0x90] ss:$12 sps:$4 sm:$0xff]  }
   0x9   :  { %283 = vmatprep.subr.bf16.mxu0 %v513_v25  ;;  %v533_v41 = vld [vmem:[%s715_s3 + $0xac] ss:$12 sps:$4 sm:$0xff]   ;;  %v536_v43 = vld [vmem:[%s715_s3 + $0xa8] ss:$12 sps:$4 sm:$0xff]   ;;  %v537_v44 = vld [vmem:[%s715_s3 + $0xb0] ss:$12 sps:$4 sm:$0xff]  }
   0xa   :  { %v535_v42 = vld [vmem:[%s715_s3 + $0x98] ss:$12 sps:$4 sm:$0xff]   ;;  %v433_v59 = vld [vmem:[%s716_s1] ss:$0 sm:$0xff] }
   0xb   :  { %488 = vmatpush3.bf16.msra.mxu1 %v515_v26 }
   0xc   :  { %284 = vmatpush1.bf16.msra.mxu0 %v516_v27  ;;  %489 = vmatprep.subr.bf16.mxu1 %v519_v29 }
   0xd   :  { %285 = vmatprep.subr.bf16.mxu0 %v517_v28 }
   0xf   :  { %490 = vmatpush3.bf16.msra.mxu1 %v519_v29 }
  0x10   :  { %286 = vmatpush1.bf16.msra.mxu0 %v520_v30  ;;  %491 = vmatprep.subr.bf16.mxu1 %v523_v32 }
  0x11   :  { %287 = vmatprep.subr.bf16.mxu0 %v521_v31 }
  0x13   :  { %492 = vmatpush3.bf16.msra.mxu1 %v523_v32 }
  0x14   :  { %288 = vmatpush1.bf16.msra.mxu0 %v524_v33  ;;  %493 = vmatprep.subr.bf16.mxu1 %v527_v35 }
  0x15   :  { %289 = vmatprep.subr.bf16.mxu0 %v525_v34 }
  0x17   :  { %494 = vmatpush3.bf16.msra.mxu1 %v527_v35 }
  0x18   :  { %290 = vmatpush1.bf16.msra.mxu0 %v528_v36  ;;  %495 = vmatprep.subr.bf16.mxu1 %v531_v38 }
  0x19   :  { %291 = vmatprep.subr.bf16.mxu0 %v529_v37 }
  0x1b   :  { %496 = vmatpush3.bf16.msra.mxu1 %v531_v38 }
  0x1c   :  { %292 = vmatpush1.bf16.msra.mxu0 %v532_v40  ;;  %497 = vmatprep.subr.bf16.mxu1 %v535_v42 }
  0x1d   :  { %293 = vmatprep.subr.bf16.mxu0 %v533_v41 }
  0x1f   :  { %498 = vmatpush3.bf16.msra.mxu1 %v535_v42 }
  0x20   :  { %294 = vmatpush1.bf16.msra.mxu0 %v536_v43  ;;  %499 = vmatprep.subr.bf16.mxu1 %v537_v44 }
  0x23   :  { %500 = vmatpush3.bf16.msra.mxu1 %v537_v44 }
  0x8f   :  { %v30_v8 = vpop.xlane.xlu0 %29  ;;  %v34_v9 = vpop.xlane.xlu1 %33 }
  0x90   :  { %v38_v10 = vmul.f32 0.0078125, %v30_v8  ;;  %v40_v11 = vmul.f32 0.0078125, %v34_v9 }
  0x92   :  { %v601_v12 = vsub.f32 %v25_v0, %v38_v10  ;;  %v603_v13 = vsub.f32 %v27_v1, %v40_v11  ;;  %v434_v0 = vld [vmem:[%s717_s2] ss:$0 sm:$0xff] }
  0x93   :  { %v32_v14 = vpop.xlane.xlu0 %31  ;;  %v36_v15 = vpop.xlane.xlu1 %35 }
  0x94   :  { %v39_v16 = vmul.f32 0.0078125, %v32_v14  ;;  %v46_v17 = vmul.f32 %v601_v12, %v601_v12  ;;  %v41_v18 = vmul.f32 0.0078125, %v36_v15  ;;  %v48_v21 = vmul.f32 %v603_v13, %v603_v13 }
  0x95   :  { %v136_v14 = vlaneseq }
  0x96   :  { %v607_v19 = vsub.f32 %v26_v2, %v39_v16  ;;  %50 = vadd.xlane.f32.xlu0 %v46_v17  ;;  %v609_v20 = vsub.f32 %v28_v3, %v41_v18  ;;  %v134_v16 = vld [vmem:[%s718_s4] sm:$0x7] }
  0x97   :  { %v137_v15 = vshrl.u32 %v136_v14, 7 }
  0x98   :  { %v47_v22 = vmul.f32 %v607_v19, %v607_v19  ;;  %v49_v23 = vmul.f32 %v609_v20, %v609_v20 }
  0x99   :  { %v142_v17 = vsub.s32 1, %v137_v15 }
  0x9a   :  { %54 = vadd.xlane.f32.xlu0 %v48_v21  ;;  %52 = vadd.xlane.f32.xlu1 %v47_v22 }
  0x9e   :  { %56 = vadd.xlane.f32.xlu1 %v49_v23 }
 0x123   :  { %v51_v45 = vpop.xlane.xlu0 %50 }
 0x124   :  { %v58_v46 = vmul.f32 0.0078125, %v51_v45 }
 0x126   :  { %v62_v47 = vadd.f32 1e-05, %v58_v46 }
 0x127   :  { %v53_v48 = vpop.xlane.xlu1 %52  ;;  %v55_v49 = vpop.xlane.xlu0 %54 }
 0x128   :  { %538 = vrsqrt.f32 %v62_v47  ;;  %v59_v50 = vmul.f32 0.0078125, %v53_v48  ;;  %v60_v51 = vmul.f32 0.0078125, %v55_v49 }
 0x12a   :  { %v63_v52 = vadd.f32 1e-05, %v59_v50  ;;  %v64_v53 = vadd.f32 1e-05, %v60_v51 }
 0x12b   :  { %v57_v54 = vpop.xlane.xlu1 %56 }
 0x12c   :  { %540 = vrsqrt.f32 %v63_v52  ;;  %v61_v55 = vmul.f32 0.0078125, %v57_v54 }
 0x12d   :  { %542 = vrsqrt.f32 %v64_v53 }
 0x12e   :  { %v65_v56 = vadd.f32 1e-05, %v61_v55 }
 0x130   :  { %544 = vrsqrt.f32 %v65_v56 }
 0x132   :  { %v539_v57 = vpop.eup %538 }
 0x133   :  { %v70_v58 = vmul.f32 %v539_v57, %v601_v12 }
 0x135   :  { %v81_v63 = vmul.f32 %v433_v59, %v70_v58 }
 0x136   :  { %v541_v60 = vpop.eup %540 }
 0x137   :  { %v543_v61 = vpop.eup %542  ;;  %v71_v62 = vmul.f32 %v541_v60, %v607_v19  ;;  %v92_v4 = vadd.f32 %v434_v0, %v81_v63  ;;  %v146_v19 = vsub.s32 2, %v137_v15 }
 0x138   :  { %v72_v1 = vmul.f32 %v543_v61, %v603_v13  ;;  %v138_v13 = vsub.s32 0, %v137_v15 }
 0x139   :  { %v82_v2 = vmul.f32 %v433_v59, %v71_v62  ;;  %v147_v24 = vrot.slane %v134_v16, %v146_v19 }
 0x13a   :  { %v545_v3 = vpop.eup %544  ;;  %v83_v7 = vmul.f32 %v433_v59, %v72_v1  ;;  %v139_v18 = vrot.slane %v134_v16, %v138_v13 }
 0x13b   :  { %v93_v5 = vadd.f32 %v434_v0, %v82_v2  ;;  %v73_v6 = vmul.f32 %v545_v3, %v609_v20  ;;  %v143_v20 = vrot.slane %v134_v16, %v142_v17 }
 0x13c   :  { %v94_v10 = vadd.f32 %v434_v0, %v83_v7 }
 0x13d   :  { %v96_v8 = vpack.c.bf16 %v93_v5, %v92_v4  ;;  %v84_v9 = vmul.f32 %v433_v59, %v73_v6 }
 0x13f   :  { %312 = vmatmul.mubr.bf16.vlgmr.msra.gmra.mrb[0].mxu0 %v96_v8  ;;  %501 = vmatprep.mubr.bf16.mxu1 %v96_v8  ;;  %v95_v11 = vadd.f32 %v434_v0, %v84_v9 }
 0x140   :  { %321 = vmatprep.mubr.bf16.mxu0 %v546_v39 }
 0x141   :  { %v97_v12 = vpack.c.bf16 %v95_v11, %v94_v10 }
 0x143   :  { %502 = vmatmul.mubr.bf16.vlgmr.msra.gmra.mrb[0].mxu1 %v97_v12 }
 0x147   :  { %322 = vmatmul.mubr.bf16.gmra.mrb[4].mxu0 %v97_v12 }
 0x212   :  { %v313_v21 = vpop.f32.mrb[0].mxu0 }
 0x213   :  { %v314_v22 = vadd.f32 %v313_v21, %v139_v18  ;;  %v315_v23 = vpop.f32.mrb[1].mxu0 }
 0x214   :  { %v316_v25 = vadd.f32 %v315_v23, %v143_v20  ;;  %v317_v26 = vpop.f32.mrb[2].mxu0 }
 0x215   :  { %v318_v27 = vadd.f32 %v317_v26, %v139_v18  ;;  %v319_v28 = vpop.f32.mrb[3].mxu0 }
 0x216   :  { %v467_v29 = vpack.c.bf16 %v316_v25, %v314_v22  ;;  %v320_v30 = vadd.f32 %v319_v28, %v143_v20  ;;  %v503_v31 = vpop.f32.mrb[0].mxu1 }
 0x217   :  { %v375_v32 = vadd.f32 %v503_v31, %v147_v24  ;;  %v366_v33 = vpop.f32.mrb[1].mxu1 }
 0x218   :  { %421 = vst [vmem:[%s719_s5] sm:$0xff] %v467_v29  ;;  %v469_v34 = vpack.c.bf16 %v320_v30, %v318_v27  ;;  %v367_v35 = vadd.f32 %v366_v33, %v147_v24  ;;  %v504_v36 = vpop.f32.mrb[2].mxu1 }
 0x219   :  { %v472_v37 = vpack.c.bf16 %v375_v32, %v375_v32  ;;  %v378_v38 = vadd.f32 %v504_v36, %v147_v24  ;;  %v369_v39 = vpop.f32.mrb[3].mxu1 }
 0x21a   :  { %423 = vst [vmem:[%s719_s5 + $0xc] sm:$0xff] %v469_v34  ;;  %v468_v40 = vpack.c.bf16 %v367_v35, %v367_v35  ;;  %v370_v41 = vadd.f32 %v369_v39, %v147_v24  ;;  %v323_v42 = vpop.f32.mrb[4].mxu0 }
 0x21b   :  { %426 = vst [vmem:[%s719_s5 + $0x20] sm:$0xf] %v472_v37  ;;  %v474_v43 = vpack.c.bf16 %v378_v38, %v378_v38  ;;  %v324_v44 = vadd.f32 %v323_v42, %v139_v18  ;;  %v325_v45 = vpop.f32.mrb[5].mxu0 }
 0x21c   :  { %422 = vst [vmem:[%s719_s5 + $0x8] sm:$0xf] %v468_v40  ;;  %v470_v46 = vpack.c.bf16 %v370_v41, %v370_v41  ;;  %v326_v47 = vadd.f32 %v325_v45, %v143_v20  ;;  %v327_v48 = vpop.f32.mrb[6].mxu0 }
 0x21d   :  { %428 = vst [vmem:[%s719_s5 + $0x2c] sm:$0xf] %v474_v43  ;;  %v328_v49 = vadd.f32 %v327_v48, %v139_v18  ;;  %v329_v50 = vpop.f32.mrb[7].mxu0 }
 0x21e   :  { %424 = vst [vmem:[%s719_s5 + $0x14] sm:$0xf] %v470_v46  ;;  %v471_v51 = vpack.c.bf16 %v326_v47, %v324_v44  ;;  %v330_v52 = vadd.f32 %v329_v50, %v143_v20 }
 0x220   :  { %425 = vst [vmem:[%s719_s5 + $0x18] sm:$0xff] %v471_v51  ;;  %v473_v53 = vpack.c.bf16 %v330_v52, %v328_v49 }
 0x222   :  { %427 = vst [vmem:[%s719_s5 + $0x24] sm:$0xff] %v473_v53 }

// kernel: gpt_forward.14
= control target key start
LH: loop header
LB: loop body
LE: loop exit
PB: predicated region body
PF: predicated region fallthrough
CT: control target
= control target key end

     0   :  { %v765_v50 = vmov 0   ;;  %s1088_s0 = inlined_call_operand.vmem [shape: f32[32,128], index: 0, kind: input, shape index: {}]   ;;  %s1089_s3 = inlined_call_operand.vmem [shape: bf16[128,512], index: 3, kind: input, shape index: {}]   ;;  %s1090_s1 = inlined_call_operand.vmem [shape: f32[1,128], index: 1, kind: input, shape index: {}]   ;;  %s1091_s2 = inlined_call_operand.vmem [shape: f32[1,128], index: 2, kind: input, shape index: {}]   ;;  %s1092_s4 = inlined_call_operand.vmem [shape: f32[1,512], index: 4, kind: input, shape index: {}]   ;;  %s1093_s5 = inlined_call_operand.vmem [shape: bf16[32,512], index: 5, kind: output, shape index: {}]  }
   0x1   :  { %v25_v0 = vld [vmem:[%s1088_s0] sm:$0xff]  ;;  %v27_v1 = vld [vmem:[%s1088_s0 + $0x10] sm:$0xff]  ;;  %v26_v2 = vld [vmem:[%s1088_s0 + $0x8] sm:$0xff]  ;;  %348 = vmatprep.mubr.bf16.mxu0 %v765_v50  ;;  %401 = vmatprep.mubr.bf16.mxu1 %v765_v50 }
   0x2   :  { %29 = vadd.xlane.f32.xlu0 %v25_v0  ;;  %33 = vadd.xlane.f32.xlu1 %v27_v1  ;;  %v28_v3 = vld [vmem:[%s1088_s0 + $0x18] sm:$0xff]  ;;  %v677_v4 = vld [vmem:[%s1089_s3 + $0x4] ss:$16 sps:$4 sm:$0xff]   ;;  %v681_v6 = vld [vmem:[%s1089_s3] ss:$16 sps:$4 sm:$0xff]  }
   0x3   :  { %v679_v5 = vld [vmem:[%s1089_s3 + $0xc] ss:$16 sps:$4 sm:$0xff]   ;;  %316 = vmatprep.subr.bf16.mxu0 %v677_v4  ;;  %v682_v7 = vld [vmem:[%s1089_s3 + $0x8] ss:$16 sps:$4 sm:$0xff]   ;;  %v683_v8 = vld [vmem:[%s1089_s3 + $0x24] ss:$16 sps:$4 sm:$0xff]  }
   0x4   :  { %369 = vmatprep.subr.bf16.mxu1 %v679_v5  ;;  %317 = vmatpush1.bf16.msra.mxu0 %v681_v6  ;;  %v685_v9 = vld [vmem:[%s1089_s3 + $0x2c] ss:$16 sps:$4 sm:$0xff]   ;;  %v687_v26 = vld [vmem:[%s1089_s3 + $0x20] ss:$16 sps:$4 sm:$0xff]   ;;  %v688_v27 = vld [vmem:[%s1089_s3 + $0x28] ss:$16 sps:$4 sm:$0xff]  }
   0x5   :  { %370 = vmatpush1.bf16.msra.mxu1 %v682_v7  ;;  %318 = vmatprep.subr.bf16.mxu0 %v683_v8  ;;  %v689_v28 = vld [vmem:[%s1089_s3 + $0x44] ss:$16 sps:$4 sm:$0xff]   ;;  %v691_v29 = vld [vmem:[%s1089_s3 + $0x4c] ss:$16 sps:$4 sm:$0xff]   ;;  %v693_v30 = vld [vmem:[%s1089_s3 + $0x40] ss:$16 sps:$4 sm:$0xff]  }
   0x6   :  { %31 = vadd.xlane.f32.xlu0 %v26_v2  ;;  %35 = vadd.xlane.f32.xlu1 %v28_v3  ;;  %v694_v31 = vld [vmem:[%s1089_s3 + $0x48] ss:$16 sps:$4 sm:$0xff]   ;;  %v695_v32 = vld [vmem:[%s1089_s3 + $0x64] ss:$16 sps:$4 sm:$0xff]   ;;  %v697_v33 = vld [vmem:[%s1089_s3 + $0x6c] ss:$16 sps:$4 sm:$0xff]  }
   0x7   :  { %371 = vmatprep.subr.bf16.mxu1 %v685_v9  ;;  %v699_v34 = vld [vmem:[%s1089_s3 + $0x60] ss:$16 sps:$4 sm:$0xff]   ;;  %v700_v35 = vld [vmem:[%s1089_s3 + $0x68] ss:$16 sps:$4 sm:$0xff]   ;;  %v701_v36 = vld [vmem:[%s1089_s3 + $0x84] ss:$16 sps:$4 sm:$0xff]  }
   0x8   :  { %319 = vmatpush1.bf16.msra.mxu0 %v687_v26  ;;  %v703_v37 = vld [vmem:[%s1089_s3 + $0x8c] ss:$16 sps:$4 sm:$0xff]   ;;  %v705_v38 = vld [vmem:[%s1089_s3 + $0x80] ss:$16 sps:$4 sm:$0xff]   ;;  %v706_v39 = vld [vmem:[%s1089_s3 + $0x88] ss:$16 sps:$4 sm:$0xff]  }
   0x9   :  { %372 = vmatpush1.bf16.msra.mxu1 %v688_v27  ;;  %320 = vmatprep.subr.bf16.mxu0 %v689_v28  ;;  %v707_v40 = vld [vmem:[%s1089_s3 + $0xa4] ss:$16 sps:$4 sm:$0xff]   ;;  %v709_v41 = vld [vmem:[%s1089_s3 + $0xac] ss:$16 sps:$4 sm:$0xff]   ;;  %v711_v42 = vld [vmem:[%s1089_s3 + $0xa0] ss:$16 sps:$4 sm:$0xff]  }
   0xa   :  { %373 = vmatprep.subr.bf16.mxu1 %v691_v29  ;;  %v712_v43 = vld [vmem:[%s1089_s3 + $0xa8] ss:$16 sps:$4 sm:$0xff]   ;;  %v713_v44 = vld [vmem:[%s1089_s3 + $0xc4] ss:$16 sps:$4 sm:$0xff]   ;;  %v715_v45 = vld [vmem:[%s1089_s3 + $0xcc] ss:$16 sps:$4 sm:$0xff]  }
   0xb   :  { %v717_v46 = vld [vmem:[%s1089_s3 + $0xc0] ss:$16 sps:$4 sm:$0xff]   ;;  %v718_v47 = vld [vmem:[%s1089_s3 + $0xc8] ss:$16 sps:$4 sm:$0xff]   ;;  %v719_v48 = vld [vmem:[%s1089_s3 + $0xe4] ss:$16 sps:$4 sm:$0xff]  }
   0xc   :  { %321 = vmatpush1.bf16.msra.mxu0 %v693_v30  ;;  %v721_v49 = vld [vmem:[%s1089_s3 + $0xec] ss:$16 sps:$4 sm:$0xff]   ;;  %v723_v51 = vld [vmem:[%s1089_s3 + $0xe0] ss:$16 sps:$4 sm:$0xff]   ;;  %v724_v52 = vld [vmem:[%s1089_s3 + $0xe8] ss:$16 sps:$4 sm:$0xff]  }
   0xd   :  { %374 = vmatpush1.bf16.msra.mxu1 %v694_v31  ;;  %322 = vmatprep.subr.bf16.mxu0 %v695_v32  ;;  %v627_v8 = vld [vmem:[%s1091_s2] ss:$0 sm:$0xff] }
   0xe   :  { %375 = vmatprep.subr.bf16.mxu1 %v697_v33 }
  0x10   :  { %323 = vmatpush1.bf16.msra.mxu0 %v699_v34 }
  0x11   :  { %376 = vmatpush1.bf16.msra.mxu1 %v700_v35  ;;  %324 = vmatprep.subr.bf16.mxu0 %v701_v36 }
  0x12   :  { %377 = vmatprep.subr.bf16.mxu1 %v703_v37 }
  0x14   :  { %325 = vmatpush1.bf16.msra.mxu0 %v705_v38 }
  0x15   :  { %378 = vmatpush1.bf16.msra.mxu1 %v706_v39  ;;  %326 = vmatprep.subr.bf16.mxu0 %v707_v40 }
  0x16   :  { %379 = vmatprep.subr.bf16.mxu1 %v709_v41 }
  0x18   :  { %327 = vmatpush1.bf16.msra.mxu0 %v711_v42 }
  0x19   :  { %380 = vmatpush1.bf16.msra.mxu1 %v712_v43  ;;  %328 = vmatprep.subr.bf16.mxu0 %v713_v44 }
  0x1a   :  { %381 = vmatprep.subr.bf16.mxu1 %v715_v45 }
  0x1c   :  { %329 = vmatpush1.bf16.msra.mxu0 %v717_v46 }
  0x1d   :  { %382 = vmatpush1.bf16.msra.mxu1 %v718_v47  ;;  %330 = vmatprep.subr.bf16.mxu0 %v719_v48 }
  0x1e   :  { %383 = vmatprep.subr.bf16.mxu1 %v721_v49 }
  0x20   :  { %331 = vmatpush1.bf16.msra.mxu0 %v723_v51 }
  0x21   :  { %384 = vmatpush1.bf16.msra.mxu1 %v724_v52 }
  0x8f   :  { %v30_v10 = vpop.xlane.xlu0 %29  ;;  %v34_v11 = vpop.xlane.xlu1 %33 }
  0x90   :  { %v38_v12 = vmul.f32 0.0078125, %v30_v10  ;;  %v40_v13 = vmul.f32 0.0078125, %v34_v11 }
  0x92   :  { %v826_v14 = vsub.f32 %v25_v0, %v38_v12  ;;  %v828_v15 = vsub.f32 %v27_v1, %v40_v13 }
  0x93   :  { %v32_v16 = vpop.xlane.xlu0 %31  ;;  %v36_v17 = vpop.xlane.xlu1 %35 }
  0x94   :  { %v39_v18 = vmul.f32 0.0078125, %v32_v16  ;;  %v46_v19 = vmul.f32 %v826_v14, %v826_v14  ;;  %v41_v20 = vmul.f32 0.0078125, %v36_v17  ;;  %v48_v23 = vmul.f32 %v828_v15, %v828_v15 }
  0x96   :  { %v832_v21 = vsub.f32 %v26_v2, %v39_v18  ;;  %50 = vadd.xlane.f32.xlu0 %v46_v19  ;;  %v834_v22 = vsub.f32 %v28_v3, %v41_v20  ;;  %v626_v3 = vld [vmem:[%s1090_s1] ss:$0 sm:$0xff] }
  0x98   :  { %v47_v24 = vmul.f32 %v832_v21, %v832_v21  ;;  %v49_v25 = vmul.f32 %v834_v22, %v834_v22 }
  0x9a   :  { %54 = vadd.xlane.f32.xlu0 %v48_v23  ;;  %52 = vadd.xlane.f32.xlu1 %v47_v24  ;;  %v136_v23 = vlaneseq }
  0x9c   :  { %v137_v24 = vshrl.u32 %v136_v23, 7 }
  0x9e   :  { %56 = vadd.xlane.f32.xlu1 %v49_v25  ;;  %v138_v25 = vsub.s32 0, %v137_v24  ;;  %v146_v26 = vsub.s32 2, %v137_v24  ;;  %v150_v27 = vsub.s32 3, %v137_v24 }
 0x123   :  { %v51_v53 = vpop.xlane.xlu0 %50 }
 0x124   :  { %v58_v54 = vmul.f32 0.0078125, %v51_v53 }
 0x126   :  { %v62_v55 = vadd.f32 1e-05, %v58_v54 }
 0x127   :  { %v53_v56 = vpop.xlane.xlu1 %52  ;;  %v55_v57 = vpop.xlane.xlu0 %54 }
 0x128   :  { %725 = vrsqrt.f32 %v62_v55  ;;  %v59_v58 = vmul.f32 0.0078125, %v53_v56  ;;  %v60_v59 = vmul.f32 0.0078125, %v55_v57 }
 0x12a   :  { %v63_v60 = vadd.f32 1e-05, %v59_v58  ;;  %v64_v61 = vadd.f32 1e-05, %v60_v59 }
 0x12b   :  { %v57_v62 = vpop.xlane.xlu1 %56 }
 0x12c   :  { %727 = vrsqrt.f32 %v63_v60  ;;  %v61_v63 = vmul.f32 0.0078125, %v57_v62 }
 0x12d   :  { %729 = vrsqrt.f32 %v64_v61 }
 0x12e   :  { %v65_v0 = vadd.f32 1e-05, %v61_v63 }
 0x130   :  { %731 = vrsqrt.f32 %v65_v0 }
 0x132   :  { %v726_v1 = vpop.eup %725 }
 0x133   :  { %v70_v2 = vmul.f32 %v726_v1, %v826_v14 }
 0x135   :  { %v81_v6 = vmul.f32 %v626_v3, %v70_v2 }
 0x136   :  { %v728_v4 = vpop.eup %727 }
 0x137   :  { %v71_v5 = vmul.f32 %v728_v4, %v832_v21  ;;  %v730_v7 = vpop.eup %729  ;;  %v92_v11 = vadd.f32 %v627_v8, %v81_v6 }
 0x138   :  { %v72_v13 = vmul.f32 %v730_v7, %v828_v15  ;;  %v134_v15 = vld [vmem:[%s1092_s4] sm:$0xf] }
 0x139   :  { %v82_v9 = vmul.f32 %v626_v3, %v71_v5  ;;  %v933_v28 = vrot.slane %v134_v15, %v138_v25  ;;  %v935_v29 = vrot.slane %v134_v15, %v146_v26  ;;  %v939_v31 = vrot.slane %v134_v15, %v150_v27 }
 0x13a   :  { %v732_v10 = vpop.eup %731  ;;  %v83_v18 = vmul.f32 %v626_v3, %v72_v13 }
 0x13b   :  { %v93_v12 = vadd.f32 %v627_v8, %v82_v9  ;;  %v73_v14 = vmul.f32 %v732_v10, %v834_v22  ;;  %v142_v22 = vsub.s32 1, %v137_v24 }
 0x13c   :  { %v94_v20 = vadd.f32 %v627_v8, %v83_v18 }
 0x13d   :  { %v96_v16 = vpack.c.bf16 %v93_v12, %v92_v11  ;;  %v84_v17 = vmul.f32 %v626_v3, %v73_v14  ;;  %v937_v30 = vrot.slane %v134_v15, %v142_v22 }
 0x13f   :  { %349 = vmatmul.mubr.bf16.vlgmr.msra.gmra.mrb[0].mxu0 %v96_v16  ;;  %402 = vmatmul.mubr.bf16.vlgmr.msra.gmra.mrb[0].mxu1 %v96_v16  ;;  %v95_v19 = vadd.f32 %v627_v8, %v84_v17 }
 0x140   :  { %358 = vmatprep.mubr.bf16.mxu0 %v765_v50  ;;  %411 = vmatprep.mubr.bf16.mxu1 %v765_v50 }
 0x141   :  { %v97_v21 = vpack.c.bf16 %v95_v19, %v94_v20 }
 0x147   :  { %359 = vmatmul.mubr.bf16.gmra.mrb[4].mxu0 %v97_v21  ;;  %412 = vmatmul.mubr.bf16.gmra.mrb[4].mxu1 %v97_v21 }
 0x212   :  { %v350_v32 = vpop.f32.mrb[0].mxu0  ;;  %v403_v33 = vpop.f32.mrb[0].mxu1 }
 0x213   :  { %v942_v34 = vadd.f32 %v350_v32, %v933_v28  ;;  %v945_v35 = vadd.f32 %v403_v33, %v935_v29  ;;  %v352_v36 = vpop.f32.mrb[1].mxu0  ;;  %v405_v37 = vpop.f32.mrb[1].mxu1 }
 0x214   :  { %v948_v38 = vadd.f32 %v352_v36, %v937_v30  ;;  %v951_v39 = vadd.f32 %v405_v37, %v939_v31  ;;  %v354_v40 = vpop.f32.mrb[2].mxu0  ;;  %v407_v41 = vpop.f32.mrb[2].mxu1 }
 0x215   :  { %v438_v42 = vmul.f32 0.044715, %v942_v34  ;;  %v440_v43 = vmul.f32 0.044715, %v945_v35  ;;  %v960_v48 = vadd.f32 %v354_v40, %v933_v28  ;;  %v963_v49 = vadd.f32 %v407_v41, %v935_v29  ;;  %v356_v50 = vpop.f32.mrb[3].mxu0  ;;  %v409_v51 = vpop.f32.mrb[3].mxu1 }
 0x216   :  { %v439_v44 = vmul.f32 0.044715, %v948_v38  ;;  %v441_v45 = vmul.f32 0.044715, %v951_v39  ;;  %v968_v54 = vadd.f32 %v356_v50, %v937_v30  ;;  %v980_v2 = vadd.f32 %v409_v51, %v939_v31 }
 0x217   :  { %v454_v46 = vmul.f32 %v438_v42, %v942_v34  ;;  %v456_v47 = vmul.f32 %v440_v43, %v945_v35  ;;  %v442_v57 = vmul.f32 0.044715, %v960_v48  ;;  %v444_v60 = vmul.f32 0.044715, %v963_v49 }
 0x218   :  { %v455_v52 = vmul.f32 %v439_v44, %v948_v38  ;;  %v457_v53 = vmul.f32 %v441_v45, %v951_v39  ;;  %v443_v8 = vmul.f32 0.044715, %v968_v54  ;;  %v445_v23 = vmul.f32 0.044715, %v980_v2 }
 0x219   :  { %v470_v55 = vmul.f32 %v454_v46, %v942_v34  ;;  %v472_v56 = vmul.f32 %v456_v47, %v945_v35  ;;  %v458_v1 = vmul.f32 %v442_v57, %v960_v48  ;;  %v460_v7 = vmul.f32 %v444_v60, %v963_v49 }
 0x21a   :  { %v471_v58 = vmul.f32 %v455_v52, %v948_v38  ;;  %v473_v59 = vmul.f32 %v457_v53, %v951_v39  ;;  %v360_v61 = vpop.f32.mrb[4].mxu0  ;;  %v413_v62 = vpop.f32.mrb[4].mxu1  ;;  %v459_v19 = vmul.f32 %v443_v8, %v968_v54  ;;  %v461_v27 = vmul.f32 %v445_v23, %v980_v2 }
 0x21b   :  { %v486_v63 = vadd.f32 %v470_v55, %v942_v34  ;;  %v488_v0 = vadd.f32 %v472_v56, %v945_v35  ;;  %v362_v3 = vpop.f32.mrb[5].mxu0  ;;  %v415_v4 = vpop.f32.mrb[5].mxu1  ;;  %v474_v13 = vmul.f32 %v458_v1, %v960_v48  ;;  %v476_v18 = vmul.f32 %v460_v7, %v963_v49 }
 0x21c   :  { %v487_v5 = vadd.f32 %v471_v58, %v948_v38  ;;  %v489_v6 = vadd.f32 %v473_v59, %v951_v39  ;;  %v364_v9 = vpop.f32.mrb[6].mxu0  ;;  %v986_v10 = vpop.f32.mrb[6].mxu1  ;;  %v998_v24 = vadd.f32 %v360_v61, %v933_v28  ;;  %v475_v26 = vmul.f32 %v459_v19, %v968_v54 }
 0x21d   :  { %v502_v11 = vmul.f32 0.7978846, %v486_v63  ;;  %v504_v12 = vmul.f32 0.7978846, %v488_v0  ;;  %v989_v14 = vpop.f32.mrb[7].mxu0  ;;  %v993_v20 = vpop.f32.mrb[7].mxu1  ;;  %v490_v21 = vadd.f32 %v474_v13, %v960_v48  ;;  %v492_v25 = vadd.f32 %v476_v18, %v963_v49 }
 0x21e   :  { %v503_v16 = vmul.f32 0.7978846, %v487_v5  ;;  %v505_v17 = vmul.f32 0.7978846, %v489_v6  ;;  %v1003_v15 = vadd.f32 %v413_v62, %v935_v29  ;;  %v491_v33 = vadd.f32 %v475_v26, %v968_v54 }
 0x21f   :  { %733 = vtanh.f32 %v502_v11  ;;  %v506_v22 = vmul.f32 0.7978846, %v490_v21  ;;  %v508_v32 = vmul.f32 0.7978846, %v492_v25  ;;  %v446_v36 = vmul.f32 0.044715, %v998_v24 }
 0x220   :  { %735 = vtanh.f32 %v504_v12  ;;  %v422_v37 = vmul.f32 0.5, %v942_v34  ;;  %v477_v40 = vmul.f32 %v461_v27, %v980_v2  ;;  %v448_v41 = vmul.f32 0.044715, %v1003_v15 }
 0x221   :  { %737 = vtanh.f32 %v503_v16  ;;  %v507_v42 = vmul.f32 0.7978846, %v491_v33  ;;  %v462_v43 = vmul.f32 %v446_v36, %v998_v24  ;;  %v1013_v44 = vadd.f32 %v362_v3, %v937_v30 }
 0x222   :  { %739 = vtanh.f32 %v505_v17  ;;  %v493_v45 = vadd.f32 %v477_v40, %v980_v2  ;;  %v464_v46 = vmul.f32 %v448_v41, %v1003_v15  ;;  %v1018_v47 = vadd.f32 %v415_v4, %v939_v31 }
 0x223   :  { %741 = vtanh.f32 %v506_v22  ;;  %v1021_v34 = vadd.f32 %v364_v9, %v933_v28  ;;  %v424_v50 = vmul.f32 0.5, %v945_v35  ;;  %v478_v51 = vmul.f32 %v462_v43, %v998_v24 }
 0x224   :  { %743 = vtanh.f32 %v508_v32  ;;  %v447_v52 = vmul.f32 0.044715, %v1013_v44  ;;  %v423_v53 = vmul.f32 0.5, %v948_v38  ;;  %v509_v55 = vmul.f32 0.7978846, %v493_v45 }
 0x225   :  { %745 = vtanh.f32 %v507_v42  ;;  %v480_v56 = vmul.f32 %v464_v46, %v1003_v15  ;;  %v449_v57 = vmul.f32 0.044715, %v1018_v47  ;;  %v425_v58 = vmul.f32 0.5, %v951_v39 }
 0x226   :  { %v494_v59 = vadd.f32 %v478_v51, %v998_v24  ;;  %v463_v28 = vmul.f32 %v447_v52, %v1013_v44  ;;  %v450_v35 = vmul.f32 0.044715, %v1021_v34  ;;  %v426_v61 = vmul.f32 0.5, %v960_v48 }
 0x227   :  { %747 = vtanh.f32 %v509_v55  ;;  %v496_v62 = vadd.f32 %v480_v56, %v1003_v15  ;;  %v465_v38 = vmul.f32 %v449_v57, %v1018_v47  ;;  %v1041_v48 = vadd.f32 %v986_v10, %v935_v29 }
 0x228   :  { %v510_v1 = vmul.f32 0.7978846, %v494_v59  ;;  %v479_v3 = vmul.f32 %v463_v28, %v1013_v44  ;;  %v466_v39 = vmul.f32 %v450_v35, %v1021_v34  ;;  %v427_v10 = vmul.f32 0.5, %v968_v54 }
 0x229   :  { %v734_v60 = vpop.eup %733  ;;  %v512_v6 = vmul.f32 0.7978846, %v496_v62  ;;  %v481_v7 = vmul.f32 %v465_v38, %v1018_v47  ;;  %v452_v27 = vmul.f32 0.044715, %v1041_v48  ;;  %v428_v43 = vmul.f32 0.5, %v963_v49 }
 0x22a   :  { %v736_v63 = vpop.eup %735  ;;  %v534_v0 = vadd.f32 1.0, %v734_v60  ;;  %749 = vtanh.f32 %v510_v1  ;;  %v495_v12 = vadd.f32 %v479_v3, %v1013_v44  ;;  %v482_v26 = vmul.f32 %v466_v39, %v1021_v34 }
 0x22b   :  { %v738_v4 = vpop.eup %737  ;;  %v536_v5 = vadd.f32 1.0, %v736_v63  ;;  %751 = vtanh.f32 %v512_v6  ;;  %v497_v18 = vadd.f32 %v481_v7, %v1018_v47  ;;  %v468_v54 = vmul.f32 %v452_v27, %v1041_v48 }
 0x22c   :  { %v740_v8 = vpop.eup %739  ;;  %v550_v9 = vmul.f32 %v534_v0, %v422_v37  ;;  %v535_v11 = vadd.f32 1.0, %v738_v4  ;;  %v511_v25 = vmul.f32 0.7978846, %v495_v12  ;;  %v498_v42 = vadd.f32 %v482_v26, %v1021_v34 }
 0x22d   :  { %v742_v13 = vpop.eup %741  ;;  %v552_v16 = vmul.f32 %v536_v5, %v424_v50  ;;  %v537_v17 = vadd.f32 1.0, %v740_v8  ;;  %v513_v22 = vmul.f32 0.7978846, %v497_v18  ;;  %v367_v45 = vadd.f32 %v989_v14, %v937_v30 }
 0x22e   :  { %v744_v19 = vpop.eup %743  ;;  %v551_v21 = vmul.f32 %v535_v11, %v423_v53  ;;  %v538_v23 = vadd.f32 1.0, %v742_v13  ;;  %753 = vtanh.f32 %v511_v25  ;;  %v420_v46 = vadd.f32 %v993_v20, %v939_v31 }
 0x22f   :  { %v553_v29 = vmul.f32 %v537_v17, %v425_v58  ;;  %v746_v32 = vpop.eup %745  ;;  %v540_v37 = vadd.f32 1.0, %v744_v19  ;;  %755 = vtanh.f32 %v513_v22  ;;  %v429_v53 = vmul.f32 0.5, %v980_v2 }
 0x230   :  { %v668_v33 = vpack.c.bf16 %v551_v21, %v550_v9  ;;  %v554_v36 = vmul.f32 %v538_v23, %v426_v61  ;;  %v539_v41 = vadd.f32 1.0, %v746_v32  ;;  %v484_v49 = vmul.f32 %v468_v54, %v1041_v48 }
 0x231   :  { %v669_v40 = vpack.c.bf16 %v553_v29, %v552_v16  ;;  %v748_v50 = vpop.eup %747  ;;  %v556_v52 = vmul.f32 %v540_v37, %v428_v43  ;;  %v514_v57 = vmul.f32 0.7978846, %v498_v42  ;;  %v451_v58 = vmul.f32 0.044715, %v367_v45 }
 0x232   :  { %614 = vst [vmem:[%s1093_s5] sm:$0xff] %v668_v33  ;;  %v555_v51 = vmul.f32 %v539_v41, %v427_v10  ;;  %v541_v55 = vadd.f32 1.0, %v748_v50  ;;  %v453_v59 = vmul.f32 0.044715, %v420_v46  ;;  %v500_v31 = vadd.f32 %v484_v49, %v1041_v48 }
 0x233   :  { %615 = vst [vmem:[%s1093_s5 + $0x8] sm:$0xff] %v669_v40  ;;  %v467_v35 = vmul.f32 %v451_v58, %v367_v45  ;;  %v430_v38 = vmul.f32 0.5, %v998_v24  ;;  %757 = vtanh.f32 %v514_v57  ;;  %v432_v3 = vmul.f32 0.5, %v1003_v15 }
 0x234   :  { %v670_v56 = vpack.c.bf16 %v555_v51, %v554_v36  ;;  %v750_v30 = vpop.eup %749  ;;  %v557_v14 = vmul.f32 %v541_v55, %v429_v53  ;;  %v469_v60 = vmul.f32 %v453_v59, %v420_v46  ;;  %v516_v62 = vmul.f32 0.7978846, %v500_v31 }
 0x235   :  { %v752_v20 = vpop.eup %751  ;;  %v542_v28 = vadd.f32 1.0, %v750_v30  ;;  %v483_v63 = vmul.f32 %v467_v35, %v367_v45  ;;  %v431_v39 = vmul.f32 0.5, %v1013_v44  ;;  %v433_v24 = vmul.f32 0.5, %v1018_v47 }
 0x236   :  { %616 = vst [vmem:[%s1093_s5 + $0x10] sm:$0xff] %v670_v56  ;;  %v671_v2 = vpack.c.bf16 %v557_v14, %v556_v52  ;;  %v544_v61 = vadd.f32 1.0, %v752_v20  ;;  %v485_v0 = vmul.f32 %v469_v60, %v420_v46  ;;  %759 = vtanh.f32 %v516_v62 }
 0x237   :  { %v558_v5 = vmul.f32 %v542_v28, %v430_v38  ;;  %v499_v7 = vadd.f32 %v483_v63, %v367_v45  ;;  %v434_v23 = vmul.f32 0.5, %v1021_v34  ;;  %v436_v26 = vmul.f32 0.5, %v1041_v48 }
 0x238   :  { %v754_v1 = vpop.eup %753  ;;  %617 = vst [vmem:[%s1093_s5 + $0x18] sm:$0xff] %v671_v2  ;;  %v501_v8 = vadd.f32 %v485_v0, %v420_v46  ;;  %v560_v9 = vmul.f32 %v544_v61, %v432_v3  ;;  %v435_v22 = vmul.f32 0.5, %v367_v45  ;;  %v437_v33 = vmul.f32 0.5, %v420_v46 }
 0x239   :  { %v756_v4 = vpop.eup %755  ;;  %v543_v6 = vadd.f32 1.0, %v754_v1  ;;  %v515_v13 = vmul.f32 0.7978846, %v499_v7 }
 0x23a   :  { %v545_v11 = vadd.f32 1.0, %v756_v4  ;;  %v517_v16 = vmul.f32 0.7978846, %v501_v8 }
 0x23b   :  { %v559_v12 = vmul.f32 %v543_v6, %v431_v39  ;;  %761 = vtanh.f32 %v515_v13 }
 0x23c   :  { %v561_v17 = vmul.f32 %v545_v11, %v433_v24  ;;  %763 = vtanh.f32 %v517_v16 }
 0x23d   :  { %v672_v18 = vpack.c.bf16 %v559_v12, %v558_v5  ;;  %v758_v15 = vpop.eup %757 }
 0x23e   :  { %v673_v19 = vpack.c.bf16 %v561_v17, %v560_v9  ;;  %v546_v47 = vadd.f32 1.0, %v758_v15 }
 0x23f   :  { %618 = vst [vmem:[%s1093_s5 + $0x20] sm:$0xff] %v672_v18 }
 0x240   :  { %619 = vst [vmem:[%s1093_s5 + $0x28] sm:$0xff] %v673_v19  ;;  %v760_v44 = vpop.eup %759  ;;  %v562_v10 = vmul.f32 %v546_v47, %v434_v23 }
 0x241   :  { %v548_v21 = vadd.f32 1.0, %v760_v44 }
 0x243   :  { %v564_v32 = vmul.f32 %v548_v21, %v436_v26 }
 0x245   :  { %v762_v25 = vpop.eup %761 }
 0x246   :  { %v764_v29 = vpop.eup %763  ;;  %v547_v27 = vadd.f32 1.0, %v762_v25 }
 0x247   :  { %v549_v36 = vadd.f32 1.0, %v764_v29 }
 0x248   :  { %v563_v37 = vmul.f32 %v547_v27, %v435_v22 }
 0x249   :  { %v565_v40 = vmul.f32 %v549_v36, %v437_v33 }
 0x24a   :  { %v674_v41 = vpack.c.bf16 %v563_v37, %v562_v10 }
 0x24b   :  { %v675_v42 = vpack.c.bf16 %v565_v40, %v564_v32 }
 0x24c   :  { %620 = vst [vmem:[%s1093_s5 + $0x30] sm:$0xff] %v674_v41 }
 0x24d   :  { %621 = vst [vmem:[%s1093_s5 + $0x38] sm:$0xff] %v675_v42 }

// kernel: gpt_forward.12
= control target key start
LH: loop header
LB: loop body
LE: loop exit
PB: predicated region body
PF: predicated region fallthrough
CT: control target
= control target key end

     0   :  { %s1711_s12 = smov 0   ;;  %s1713_s13 = smov 0   ;;  %s2118_s0 = inlined_call_operand.vmem [shape: bf16[2,16,384], index: 0, kind: input, shape index: {}, may-alias: {0,1,2}]   ;;  %s2119_s1 = inlined_call_operand.vmem [shape: bf16[2,16,384], index: 1, kind: input, shape index: {}, may-alias: {0,1,2}]   ;;  %s2120_s2 = inlined_call_operand.vmem [shape: bf16[2,16,384], index: 2, kind: input, shape index: {}, may-alias: {0,1,2}]   ;;  %s2121_s3 = inlined_call_operand.vmem [shape: bf16[2,16,128], index: 3, kind: output, shape index: {}]  }
   0x1   :  { %s1715_s14 = smov 0   ;;  %s1717_s15 = smov 0  }
   0x2   :  { %s1719_s16 = smov 0  }
   0x3 LB: > { %s39_s17 = sadd.s32 1, %s1678_s15  ;;  %p57_p1 = scmp.ne.s32.totalorder %s1670_s13, %s1666_s12  ;;  %s1682_s16 = sphi %s1719_s16, %s13_s16   ;;  %s1678_s15 = sphi %s1717_s15, %s2126_s15   ;;  %s1674_s14 = sphi %s1715_s14, %s2125_s14   ;;  %s1670_s13 = sphi %s1713_s13, %s2124_s13   ;;  %s1666_s12 = sphi %s1711_s12, %s2123_s12  }
   0x4   : > { %p41_p0 = scmp.ge.s32.totalorder %s39_s17, 2  ;;  %p58_p2 = scmp.eq.s32.totalorder %s1682_s16, 0 }
   0x5   : > { %s50_s20 = sadd.s32 1, %s1670_s13  ;;  %p1444_p5 = scmp.ge.s32.totalorder %s1682_s16, 2 }
   0x6   : > { %s2128_s17 = smov (%p41_p0, %s39_s17), 0  ;;  %p1742_p3 = por %p58_p2, %p57_p1 }
   0x7   : > { %s43_s19 = ssub.s32 %s1678_s15, %s2128_s17  ;;  %177 = sbr.rel (%p1444_p5) target bundleno = 35 (0x23), region = 16 }
   0x8   : > { %p48_p4 = scmp.eq.s32.totalorder %s43_s19, 0 }
   0xa   : > { %s1750_s21 = scalar_select %p48_p4, %s1670_s13, %s50_s20  }
   0xe   : > { %180 = sbr.rel (!%p1742_p3) target bundleno = 21 (0x15), region = 20  ;;  %s182_s22 = sand.u32 (%p1742_p3), 1, %s1670_s13  }
   0xf   : > { %s1544_s23 = smul.u32 (%p1742_p3), 24, %s1678_s15  ;;  %s1445_s24 = sshll.u32 (%p1742_p3), %s182_s22, 3 }
  0x10   : > { %s184_s28 = scalar_lea.vmem (%p1742_p3), [#allocation5], %s1445_s24 }
  0x11   : > { %s191_s27 = scalar_lea.vmem (%p1742_p3), %s2118_s0, %s1544_s23 }
  0x12   : > { %v207_v0 = vld [vmem:[%s191_s27] sm:$0xf] (%p1742_p3)  ;;  %v209_v1 = vld [vmem:[%s191_s27 + $0xc] sm:$0xf] (%p1742_p3) }
  0x13   : > { %208 = vst [vmem:[%s184_s28] sm:$0xf] (%p1742_p3), %v207_v0  ;;  %210 = vst [vmem:[%s184_s28 + $0x4] sm:$0xf] (%p1742_p3), %v209_v1 }
  0x15 PF: > { %237 = sbr.rel (!%p1742_p3) target bundleno = 28 (0x1c), region = 61  ;;  %s239_s29 = sand.u32 (%p1742_p3), 1, %s1670_s13  }
  0x16   : > { %s1448_s30 = smul.u32 (%p1742_p3), 24, %s1678_s15  ;;  %s1447_s4 = sshll.u32 (%p1742_p3), %s239_s29, 3 }
  0x17   : > { %s241_s8 = scalar_lea.vmem (%p1742_p3), [#allocation6], %s1447_s4 }
  0x18   : > { %s1339_s7 = scalar_lea.vmem (%p1742_p3), %s2119_s1, %s1448_s30 }
  0x19   : > { %v1449_v2 = vld [vmem:[%s1339_s7 + $0x4] sm:$0xf] (%p1742_p3)  ;;  %v1450_v3 = vld [vmem:[%s1339_s7 + $0x10] sm:$0xf] (%p1742_p3) }
  0x1a   : > { %266 = vst [vmem:[%s241_s8] sm:$0xf] (%p1742_p3), %v1449_v2  ;;  %268 = vst [vmem:[%s241_s8 + $0x4] sm:$0xf] (%p1742_p3), %v1450_v3 }
  0x1c PF: > { %295 = sbr.rel (!%p1742_p3) target bundleno = 35 (0x23), region = 102  ;;  %s297_s9 = sand.u32 (%p1742_p3), 1, %s1670_s13  }
  0x1d   : > { %s1452_s10 = smul.u32 (%p1742_p3), 24, %s1678_s15  ;;  %s1451_s11 = sshll.u32 (%p1742_p3), %s297_s9, 3 }
  0x1e   : > { %s299_s23 = scalar_lea.vmem (%p1742_p3), [#allocation7], %s1451_s11 }
  0x1f   : > { %s1348_s22 = scalar_lea.vmem (%p1742_p3), %s2120_s2, %s1452_s10 }
  0x20   : > { %v1453_v4 = vld [vmem:[%s1348_s22 + $0x8] sm:$0xf] (%p1742_p3)  ;;  %v1454_v5 = vld [vmem:[%s1348_s22 + $0x14] sm:$0xf] (%p1742_p3) }
  0x21   : > { %324 = vst [vmem:[%s299_s23] sm:$0xf] (%p1742_p3), %v1453_v4  ;;  %326 = vst [vmem:[%s299_s23 + $0x4] sm:$0xf] (%p1742_p3), %v1454_v5 }
  0x23 PF: > { %p1455_p6 = scmp.ge.s32.totalorder %s1682_s16, 1  ;;  %p352_p7 = scmp.lt.s32.totalorder %s1682_s16, 3 }
  0x25   : > { %p353_p8 = pnand %p1455_p6, %p352_p7 }
  0x26   : > { %s359_s18 = sand.u32 (!%p353_p8), 1, %s1666_s12   ;;  %vm451_vm0 = vcmask (!%p353_p8), 261120   ;;  %v1684_v6 = vmov (!%p353_p8), 0.0   ;;  %vm1685_vm1 = vmmov (!%p353_p8), 0   ;;  %vm434_vm2 = vcmask (!%p353_p8), 7168   ;;  %s1688_s26 = smov (!%p353_p8), 96  }
  0x27   : > { %356 = sbr.rel (%p353_p8) target bundleno = 1501 (0x5dd), region = 143  ;;  %1496 = vmatprep.subr.bf16.mxu0 (!%p353_p8), %v1684_v6  ;;  %s1778_s24 = sshll.u32 (!%p353_p8), %s359_s18, 3  ;;  %452 = vst.msk [vmem:[#allocation4] sm:$0xff] (!%p353_p8), %vm451_vm0, %v1684_v6  ;;  %453 = vst.msk [vmem:[#allocation4 + $0x8] sm:$0xff] (!%p353_p8), %vm451_vm0, %v1684_v6  ;;  %1498 = vmatprep.mubr.msk.bf16.mxu0 (!%p353_p8), %vm1685_vm1, %v1684_v6  ;;  %v1686_v15 = vmov (!%p353_p8), -inf   ;;  %v467_v16 = vlaneseq (!%p353_p8)  ;;  %vm547_vm4 = vcmask (!%p353_p8), 130048  }
  0x28   : > { %454 = vst.msk [vmem:[#allocation4 + $0x10] sm:$0xff] (!%p353_p8), %vm451_vm0, %v1684_v6  ;;  %455 = vst.msk [vmem:[#allocation4 + $0x18] sm:$0xff] (!%p353_p8), %vm451_vm0, %v1684_v6  ;;  %1502 = vmatprep.subr.bf16.mxu1 (!%p353_p8), %v1684_v6  ;;  %1504 = vmatprep.mubr.msk.bf16.mxu1 (!%p353_p8), %vm1685_vm1, %v1684_v6  ;;  %s368_s12 = scalar_lea.vmem (!%p353_p8), [#allocation6], %s1778_s24  ;;  %s361_s25 = scalar_lea.vmem (!%p353_p8), [#allocation5], %s1778_s24  ;;  %v1687_v28 = vmov (!%p353_p8), 0   ;;  %vm1273_vm6 = vcmask (!%p353_p8), 523264  }
  0x29   : > { %456 = vst.msk [vmem:[#allocation4 + $0x20] sm:$0xff] (!%p353_p8), %vm451_vm0, %v1684_v6  ;;  %457 = vst.msk [vmem:[#allocation4 + $0x28] sm:$0xff] (!%p353_p8), %vm451_vm0, %v1684_v6  ;;  %v1802_v7 = vld [vmem:[%s368_s12] sm:$0xff] (!%p353_p8)   ;;  %v1477_v8 = vld [vmem:[%s361_s25] sm:$0xff] (!%p353_p8)   ;;  %v1838_v17 = vshrl.u32 (!%p353_p8), %v467_v16, 7  ;;  %v1840_v18 = vand.u32 (!%p353_p8), 127, %v467_v16  ;;  %1592 = vset.pattern.permute.xlu1 (!%p353_p8), %v1687_v28  ;;  %1593 = vset.pattern.permute.xlu0 (!%p353_p8), %v1687_v28 }
  0x2a   : > { %458 = vst.msk [vmem:[#allocation4 + $0x30] sm:$0xff] (!%p353_p8), %vm451_vm0, %v1684_v6  ;;  %459 = vst.msk [vmem:[#allocation4 + $0x38] sm:$0xff] (!%p353_p8), %vm451_vm0, %v1684_v6  ;;  %v500_v9 = vsel (!%p353_p8), %vm451_vm0, %v1802_v7, 0  ;;  %v1478_v10 = vunpack.c.l.bf16 (!%p353_p8), %v1477_v8  ;;  %v1479_v11 = vunpack.c.h.bf16 (!%p353_p8), %v1477_v8  ;;  %s375_s27 = scalar_lea.vmem (!%p353_p8), [#allocation7], %s1778_s24  ;;  %s1689_s28 = smov (!%p353_p8), 64   ;;  %vm1276_vm7 = vcmask (!%p353_p8), 785408  }
  0x2b   : > { %1497 = vmatpush3.bf16.xpose.msra.mxu0 (!%p353_p8), %v500_v9  ;;  %435 = vst.msk [vmem:[#allocation2] sm:$0xff] (!%p353_p8), %vm434_vm2, %v1686_v15  ;;  %436 = vst.msk [vmem:[#allocation2 + $0x8] sm:$0xff] (!%p353_p8), %vm434_vm2, %v1686_v15  ;;  %v1843_v19 = vadd.s32 (!%p353_p8), 8, %v1838_v17  ;;  %vm477_vm3 = vcmp.le.s32.totalorder (!%p353_p8), %v1840_v18, %v1838_v17  ;;  %v1882_v37 = vld [vmem:[%s375_s27] sm:$0xff] (!%p353_p8)   ;;  %s1690_s29 = smov (!%p353_p8), 32   ;;  %p417_p9 = scmp.lt.s32.totalorder (!%p353_p8), %s1674_s14, 1 }
  0x2c   : > { %v487_v12 = vmul.f32 (!%p353_p8), 0.17677669, %v1478_v10  ;;  %v488_v13 = vmul.f32 (!%p353_p8), 0.17677669, %v1479_v11  ;;  %1514 = vmatprep.subr.bf16.mxu0 (!%p353_p8), %v1684_v6  ;;  %437 = vst.msk [vmem:[#allocation2 + $0x10] sm:$0xff] (!%p353_p8), %vm434_vm2, %v1686_v15  ;;  %438 = vst.msk [vmem:[#allocation2 + $0x18] sm:$0xff] (!%p353_p8), %vm434_vm2, %v1686_v15  ;;  %1503 = vmatpush3.bf16.msra.mxu1 (!%p353_p8), %v1882_v37 }
  0x2d   : > { %439 = vst.msk [vmem:[#allocation2 + $0x20] sm:$0xff] (!%p353_p8), %vm434_vm2, %v1686_v15  ;;  %440 = vst.msk [vmem:[#allocation2 + $0x28] sm:$0xff] (!%p353_p8), %vm434_vm2, %v1686_v15  ;;  %vm478_vm5 = vcmp.le.s32.totalorder (!%p353_p8), %v1840_v18, %v1843_v19  ;;  %1508 = vmatprep.subr.bf16.mxu1 (!%p353_p8), %v1684_v6 }
  0x2e   : > { %v1808_v14 = vpack.c.bf16 %v488_v13, %v487_v12  ;;  %441 = vst.msk [vmem:[#allocation2 + $0x30] sm:$0xff] %vm434_vm2, %v1686_v15  ;;  %442 = vst.msk [vmem:[#allocation2 + $0x38] sm:$0xff] %vm434_vm2, %v1686_v15  ;;  %s2130_s14 = smov (!%p417_p9, %s1674_s14), 1 }
  0x2f   : > { %443 = vst.msk [vmem:[#allocation3] sm:$0xff] %vm434_vm2, %v1684_v6  ;;  %444 = vst.msk [vmem:[#allocation3 + $0x8] sm:$0xff] %vm434_vm2, %v1684_v6  ;;  %s1475_s30 = sshll.u32 %s2130_s14, 3 }
  0x30   : > { %445 = vst.msk [vmem:[#allocation3 + $0x10] sm:$0xff] %vm434_vm2, %v1684_v6  ;;  %446 = vst.msk [vmem:[#allocation3 + $0x18] sm:$0xff] %vm434_vm2, %v1684_v6  ;;  %s427_s6 = scalar_lea.vmem %s2121_s3, %s1475_s30 }
  0x31   : > { %447 = vst.msk [vmem:[#allocation3 + $0x20] sm:$0xff] %vm434_vm2, %v1684_v6  ;;  %448 = vst.msk [vmem:[#allocation3 + $0x28] sm:$0xff] %vm434_vm2, %v1684_v6 }
  0x32   : > { %1499 = vmatmul.mubr.msk.bf16.vlgmr.msra.gmra.mrb[0].mxu0 %vm451_vm0, %v1808_v14  ;;  %449 = vst.msk [vmem:[#allocation3 + $0x30] sm:$0xff] %vm434_vm2, %v1684_v6  ;;  %450 = vst.msk [vmem:[#allocation3 + $0x38] sm:$0xff] %vm434_vm2, %v1684_v6  ;;  %v1859_v29 = vld [vmem:[#allocation2] sm:$0xff]  ;;  %v1864_v32 = vld [vmem:[#allocation2 + $0x8] sm:$0xff] }
  0x33   : > { %1516 = vmatprep.mubr.msk.bf16.mxu0 %vm1685_vm1, %v1684_v6 }
 0x105   : > { %v536_v20 = vpop.f32.mrb[0].mxu0 }
 0x106   : > { %v543_v21 = vsel %vm477_vm3, %v536_v20, -1e+30  ;;  %v1500_v22 = vpop.f32.mrb[1].mxu0 }
 0x107   : > { %v539_v23 = vpop.f32.mrb[2].mxu0  ;;  %v548_v24 = vsel %vm547_vm4, %v543_v21, -inf }
 0x108   : > { %v544_v25 = vsel %vm478_vm5, %v539_v23, -1e+30  ;;  %549 = vmax.xlane.f32.xlu0 %v548_v24  ;;  %v1501_v26 = vpop.f32.mrb[3].mxu0  ;;  %v1961_v24 = vld [vmem:[#allocation2 + $0x10] sm:$0xff] }
 0x109   : > { %v551_v27 = vsel %vm547_vm4, %v544_v25, -inf }
 0x10c   : > { %552 = vmax.xlane.f32.xlu0 %v551_v27 }
 0x122   : > { %667 = vrot.lane.b32.xlu0 %v1802_v7, %s1688_s26 }
 0x195   : > { %v550_v30 = vpop.xlane.xlu0 %549 }
 0x196   : > { %v1862_v31 = vmax.f32 %v1859_v29, %v550_v30  ;;  %v1981_v30 = vld [vmem:[#allocation2 + $0x20] sm:$0xff] }
 0x198   : > { %v556_v33 = vsub.f32 %v1859_v29, %v1862_v31  ;;  %662 = vst.msk [vmem:[#allocation2] sm:$0xff] %vm434_vm2, %v1862_v31  ;;  %564 = vperm.xlu1 %1592, %v1862_v31  }
 0x199   : > { %v553_v34 = vpop.xlane.xlu0 %552 }
 0x19a   : > { %v1872_v35 = vmax.f32 %v1864_v32, %v553_v34 }
 0x19c   : > { %v557_v36 = vsub.f32 %v1864_v32, %v1872_v35  ;;  %663 = vst.msk [vmem:[#allocation2 + $0x8] sm:$0xff] %vm434_vm2, %v1872_v35  ;;  %569 = vperm.xlu1 %1592, %v1872_v35   ;;  %v558_v32 = vmul.f32 1.442695, %v556_v33 }
 0x19d   : > { %v668_v45 = vpop.permute.xlu0 %667 }
 0x19e   : > { %v673_v48 = vsel %vm451_vm0, %v668_v45, 0 }
 0x1a0   : > { %665 = vrot.lane.b32.xlu1 %v1808_v14, %s1688_s26 }
 0x1a4   : > { %837 = vrot.lane.b32.xlu1 %v1802_v7, %s1689_s28 }
 0x1a8   : > { %835 = vrot.lane.b32.xlu1 %v1808_v14, %s1689_s28 }
 0x1ac   : > { %1007 = vrot.lane.b32.xlu1 %v1802_v7, %s1690_s29 }
 0x1b0   : > { %1005 = vrot.lane.b32.xlu1 %v1808_v14, %s1690_s29 }
 0x217   : > { %v565_v38 = vpop.permute.xlu1 %564 }
 0x218   : > { %v572_v39 = vsub.f32 %v543_v21, %v565_v38  ;;  %v1985_v38 = vld [vmem:[#allocation2 + $0x28] sm:$0xff] }
 0x21a   : > { %v574_v40 = vmul.f32 1.442695, %v572_v39 }
 0x21b   : > { %v570_v41 = vpop.permute.xlu1 %569 }
 0x21c   : > { %v573_v42 = vsub.f32 %v544_v25, %v570_v41  ;;  %1596 = vpow2.f32 %v574_v40  ;;  %v1963_v25 = vld [vmem:[#allocation2 + $0x18] sm:$0xff] }
 0x21e   : > { %v576_v43 = vmul.f32 1.442695, %v573_v42 }
 0x21f   : > { %v666_v44 = vpop.permute.xlu1 %665 }
 0x220   : > { %1598 = vpow2.f32 %v576_v43 }
 0x223   : > { %v838_v50 = vpop.permute.xlu1 %837 }
 0x224   : > { %v843_v52 = vsel %vm451_vm0, %v838_v50, 0 }
 0x226   : > { %v1894_v46 = vpop.eup %1596 }
 0x227   : > { %v836_v51 = vpop.permute.xlu1 %835 }
 0x22a   : > { %v1896_v47 = vpop.eup %1598 }
 0x22b   : > { %v607_v49 = vpack.c.bf16 %v1896_v47, %v1894_v46  ;;  %v1008_v53 = vpop.permute.xlu1 %1007 }
 0x22c   : > { %v1013_v54 = vsel %vm451_vm0, %v1008_v53, 0 }
 0x22d   : > { %1505 = vmatmul.mubr.msk.bf16.vlgmr.msra.gmra.mrb[0].mxu1 %vm547_vm4, %v607_v49 }
 0x22e   : > { %1509 = vmatpush3.bf16.xpose.msra.mxu1 %v673_v48  ;;  %1510 = vmatprep.mubr.msk.bf16.mxu1 %vm1685_vm1, %v1684_v6  ;;  %v2005_v48 = vld [vmem:[#allocation2 + $0x38] sm:$0xff] }
 0x22f   : > { %1520 = vmatprep.subr.bf16.mxu1 %v1684_v6  ;;  %v1006_v55 = vpop.permute.xlu1 %1005 }
 0x235   : > { %1511 = vmatmul.mubr.msk.bf16.vlgmr.msra.gmra.mrb[4].mxu1 %vm451_vm0, %v666_v44  ;;  %v2002_v44 = vld [vmem:[#allocation2 + $0x30] sm:$0xff] }
 0x236   : > { %1521 = vmatpush3.bf16.xpose.msra.mxu1 %v843_v52  ;;  %1522 = vmatprep.mubr.msk.bf16.mxu1 %vm1685_vm1, %v1684_v6 }
 0x237   : > { %1532 = vmatprep.subr.bf16.mxu1 %v1684_v6 }
 0x23d   : > { %1523 = vmatmul.mubr.msk.bf16.vlgmr.msra.gmra.mrb[8].mxu1 %vm451_vm0, %v836_v51 }
 0x23e   : > { %1533 = vmatpush3.bf16.xpose.msra.mxu1 %v1013_v54  ;;  %1534 = vmatprep.mubr.msk.bf16.mxu1 %vm1685_vm1, %v1684_v6  ;;  %v585_v54 = vsel %vm547_vm4, %v1896_v47, 0.0 }
 0x245   : > { %1535 = vmatmul.mubr.msk.bf16.vlgmr.msra.gmra.mrb[12].mxu1 %vm451_vm0, %v1006_v55  ;;  %v582_v55 = vsel %vm547_vm4, %v1894_v46, 0.0 }
 0x300   : > { %v1915_v56 = vpop.f32.mrb[0].mxu1 }
 0x301   : > { %v1506_v57 = vpop.f32.mrb[1].mxu1 }
 0x302   : > { %v1917_v58 = vpop.f32.mrb[2].mxu1 }
 0x303   : > { %v1507_v59 = vpop.f32.mrb[3].mxu1 }
 0x308   : > { %v709_v60 = vpop.f32.mrb[4].mxu1 }
 0x309   : > { %v1922_v61 = vsel %vm477_vm3, %v709_v60, -1e+30  ;;  %v1512_v62 = vpop.f32.mrb[5].mxu1 }
 0x30a   : > { %v712_v63 = vpop.f32.mrb[6].mxu1  ;;  %v721_v0 = vsel %vm547_vm4, %v1922_v61, -inf }
 0x30b   : > { %v1929_v1 = vsel %vm478_vm5, %v712_v63, -1e+30  ;;  %722 = vmax.xlane.f32.xlu1 %v721_v0  ;;  %v1513_v2 = vpop.f32.mrb[7].mxu1 }
 0x30c   : > { %v724_v3 = vsel %vm547_vm4, %v1929_v1, -inf }
 0x30d   : > { %725 = vmax.xlane.f32.xlu0 %v724_v3 }
 0x310   : > { %v879_v4 = vpop.f32.mrb[8].mxu1 }
 0x311   : > { %v1936_v5 = vsel %vm477_vm3, %v879_v4, -1e+30  ;;  %v1524_v7 = vpop.f32.mrb[9].mxu1 }
 0x312   : > { %v882_v8 = vpop.f32.mrb[10].mxu1  ;;  %v891_v9 = vsel %vm547_vm4, %v1936_v5, -inf }
 0x313   : > { %v1943_v10 = vsel %vm478_vm5, %v882_v8, -1e+30  ;;  %892 = vmax.xlane.f32.xlu0 %v891_v9  ;;  %v1525_v11 = vpop.f32.mrb[11].mxu1 }
 0x314   : > { %v894_v12 = vsel %vm547_vm4, %v1943_v10, -inf }
 0x315   : > { %895 = vmax.xlane.f32.xlu1 %v894_v12 }
 0x318   : > { %v1049_v13 = vpop.f32.mrb[12].mxu1 }
 0x319   : > { %v1950_v14 = vsel %vm477_vm3, %v1049_v13, -1e+30  ;;  %v1536_v15 = vpop.f32.mrb[13].mxu1 }
 0x31a   : > { %v1052_v16 = vpop.f32.mrb[14].mxu1  ;;  %v1061_v20 = vsel %vm547_vm4, %v1950_v14, -inf }
 0x31b   : > { %v1957_v21 = vsel %vm478_vm5, %v1052_v16, -1e+30  ;;  %1062 = vmax.xlane.f32.xlu0 %v1061_v20  ;;  %v1537_v22 = vpop.f32.mrb[15].mxu1 }
 0x31c   : > { %v1064_v23 = vsel %vm547_vm4, %v1957_v21, -inf }
 0x31d   : > { %1065 = vmax.xlane.f32.xlu1 %v1064_v23 }
 0x398   : > { %v723_v17 = vpop.xlane.xlu1 %722 }
 0x399   : > { %v1966_v26 = vmax.f32 %v1961_v24, %v723_v17 }
 0x39a   : > { %v726_v27 = vpop.xlane.xlu0 %725 }
 0x39b   : > { %v729_v18 = vsub.f32 %v1961_v24, %v1966_v26  ;;  %833 = vst.msk [vmem:[#allocation2 + $0x10] sm:$0xff] %vm434_vm2, %v1966_v26  ;;  %v1973_v19 = vmax.f32 %v1963_v25, %v726_v27  ;;  %737 = vperm.xlu0 %1593, %v1966_v26   ;;  %v560_v27 = vmul.f32 1.442695, %v557_v36 }
 0x39d   : > { %v730_v28 = vsub.f32 %v1963_v25, %v1973_v19  ;;  %834 = vst.msk [vmem:[#allocation2 + $0x18] sm:$0xff] %vm434_vm2, %v1973_v19  ;;  %742 = vperm.xlu1 %1592, %v1973_v19  }
 0x39f   : > { %1122 = vrot.lane.b32.xlu0 %v1882_v37, %s1690_s29  ;;  %v733_v36 = vmul.f32 1.442695, %v730_v28 }
 0x3a0   : > { %v893_v34 = vpop.xlane.xlu0 %892 }
 0x3a1   : > { %v1988_v39 = vmax.f32 %v1981_v30, %v893_v34 }
 0x3a2   : > { %v896_v40 = vpop.xlane.xlu1 %895 }
 0x3a3   : > { %v899_v41 = vsub.f32 %v1981_v30, %v1988_v39  ;;  %1003 = vst.msk [vmem:[#allocation2 + $0x20] sm:$0xff] %vm434_vm2, %v1988_v39  ;;  %v1995_v42 = vmax.f32 %v1985_v38, %v896_v40  ;;  %907 = vperm.xlu1 %1592, %v1988_v39  }
 0x3a5   : > { %v900_v43 = vsub.f32 %v1985_v38, %v1995_v42  ;;  %1004 = vst.msk [vmem:[#allocation2 + $0x28] sm:$0xff] %vm434_vm2, %v1995_v42 }
 0x3a7   : > { %912 = vperm.xlu1 %1592, %v1995_v42   ;;  %v903_v29 = vmul.f32 1.442695, %v900_v43 }
 0x3a8   : > { %v1063_v45 = vpop.xlane.xlu0 %1062 }
 0x3a9   : > { %v2008_v49 = vmax.f32 %v2002_v44, %v1063_v45 }
 0x3aa   : > { %v1066_v50 = vpop.xlane.xlu1 %1065 }
 0x3ab   : > { %v1069_v51 = vsub.f32 %v2002_v44, %v2008_v49  ;;  %1173 = vst.msk [vmem:[#allocation2 + $0x30] sm:$0xff] %vm434_vm2, %v2008_v49  ;;  %v2015_v52 = vmax.f32 %v2005_v48, %v1066_v50  ;;  %1077 = vperm.xlu1 %1592, %v2008_v49   ;;  %v578_v44 = vld [vmem:[#allocation3] sm:$0xff] }
 0x3ad   : > { %v1070_v53 = vsub.f32 %v2005_v48, %v2015_v52  ;;  %1174 = vst.msk [vmem:[#allocation2 + $0x38] sm:$0xff] %vm434_vm2, %v2015_v52  ;;  %v1071_v24 = vmul.f32 1.442695, %v1069_v51 }
 0x3af   : > { %1082 = vperm.xlu1 %1592, %v2015_v52   ;;  %v1073_v26 = vmul.f32 1.442695, %v1070_v53 }
 0x3b3   : > { %782 = vrot.lane.b32.xlu1 %v1882_v37, %s1688_s26 }
 0x3b7   : > { %952 = vrot.lane.b32.xlu1 %v1882_v37, %s1689_s28 }
 0x3be   : > { %586 = vadd.xlane.f32.xlu0 %v585_v54 }
 0x3db   : > { %583 = vadd.xlane.f32.xlu1 %v582_v55  ;;  %v731_v55 = vmul.f32 1.442695, %v729_v18 }
 0x41a   : > { %v738_v57 = vpop.permute.xlu0 %737 }
 0x41b   : > { %v745_v59 = vsub.f32 %v1922_v61, %v738_v57 }
 0x41c   : > { %v743_v60 = vpop.permute.xlu1 %742 }
 0x41d   : > { %v747_v62 = vmul.f32 1.442695, %v745_v59  ;;  %v746_v63 = vsub.f32 %v1929_v1, %v743_v60  ;;  %v579_v59 = vld [vmem:[#allocation3 + $0x8] sm:$0xff]  ;;  %v752_v60 = vld [vmem:[#allocation3 + $0x10] sm:$0xff] }
 0x41e   : > { %v1123_v45 = vpop.permute.xlu0 %1122 }
 0x41f   : > { %1600 = vpow2.f32 %v747_v62  ;;  %v749_v0 = vmul.f32 1.442695, %v746_v63  ;;  %v753_v62 = vld [vmem:[#allocation3 + $0x18] sm:$0xff] }
 0x421   : > { %1602 = vpow2.f32 %v749_v0 }
 0x422   : > { %v908_v2 = vpop.permute.xlu1 %907 }
 0x423   : > { %v915_v37 = vsub.f32 %v1936_v5, %v908_v2 }
 0x425   : > { %v917_v3 = vmul.f32 1.442695, %v915_v37 }
 0x426   : > { %v913_v47 = vpop.permute.xlu1 %912 }
 0x427   : > { %1604 = vpow2.f32 %v917_v3  ;;  %v916_v4 = vsub.f32 %v1943_v10, %v913_v47 }
 0x429   : > { %v1601_v46 = vpop.eup %1600  ;;  %v919_v7 = vmul.f32 1.442695, %v916_v4  ;;  %v922_v4 = vld [vmem:[#allocation3 + $0x20] sm:$0xff] }
 0x42a   : > { %v1078_v8 = vpop.permute.xlu1 %1077  ;;  %v756_v61 = vsel %vm547_vm4, %v1601_v46, 0.0 }
 0x42b   : > { %v1603_v9 = vpop.eup %1602  ;;  %1606 = vpow2.f32 %v919_v7  ;;  %v1085_v1 = vsub.f32 %v1950_v14, %v1078_v8  ;;  %757 = vadd.xlane.f32.xlu1 %v756_v61  ;;  %v923_v8 = vld [vmem:[#allocation3 + $0x28] sm:$0xff] }
 0x42c   : > { %v759_v11 = vsel %vm547_vm4, %v1603_v9, 0.0  ;;  %v781_v22 = vpack.c.bf16 %v1603_v9, %v1601_v46 }
 0x42d   : > { %v1087_v12 = vmul.f32 1.442695, %v1085_v1  ;;  %760 = vadd.xlane.f32.xlu0 %v759_v11 }
 0x42e   : > { %v1083_v5 = vpop.permute.xlu1 %1082 }
 0x42f   : > { %1608 = vpow2.f32 %v1087_v12  ;;  %v1086_v13 = vsub.f32 %v1957_v21, %v1083_v5  ;;  %v1092_v12 = vld [vmem:[#allocation3 + $0x30] sm:$0xff] }
 0x431   : > { %v1605_v15 = vpop.eup %1604  ;;  %v1089_v10 = vmul.f32 1.442695, %v1086_v13 }
 0x432   : > { %v783_v16 = vpop.permute.xlu1 %782  ;;  %v926_v20 = vsel %vm547_vm4, %v1605_v15, 0.0 }
 0x433   : > { %1610 = vpow2.f32 %v1089_v10  ;;  %927 = vadd.xlane.f32.xlu0 %v926_v20  ;;  %1515 = vmatpush3.bf16.msra.mxu0 %v783_v16  ;;  %v1093_v16 = vld [vmem:[#allocation3 + $0x38] sm:$0xff] }
 0x434   : > { %1526 = vmatprep.subr.bf16.mxu0 %v1684_v6  ;;  %1612 = vpow2.f32 %v560_v27  ;;  %v593_v27 = vld [vmem:[#allocation4] sm:$0xff] }
 0x435   : > { %v1607_v14 = vpop.eup %1606  ;;  %1614 = vpow2.f32 %v558_v32 }
 0x436   : > { %1517 = vmatmul.mubr.msk.bf16.vlgmr.msra.gmra.mrb[4].mxu0 %vm547_vm4, %v781_v22  ;;  %v929_v23 = vsel %vm547_vm4, %v1607_v14, 0.0  ;;  %v953_v17 = vpop.permute.xlu1 %952  ;;  %v951_v40 = vpack.c.bf16 %v1607_v14, %v1605_v15  ;;  %1616 = vpow2.f32 %v733_v36 }
 0x437   : > { %930 = vadd.xlane.f32.xlu1 %v929_v23  ;;  %1527 = vmatpush3.bf16.msra.mxu0 %v953_v17  ;;  %1618 = vpow2.f32 %v731_v55 }
 0x438   : > { %1528 = vmatprep.mubr.msk.bf16.mxu0 %vm1685_vm1, %v1684_v6  ;;  %1538 = vmatprep.subr.bf16.mxu0 %v1684_v6 }
 0x439   : > { %v1609_v21 = vpop.eup %1608 }
 0x43a   : > { %v1096_v34 = vsel %vm547_vm4, %v1609_v21, 0.0 }
 0x43b   : > { %1097 = vadd.xlane.f32.xlu0 %v1096_v34  ;;  %v594_v34 = vld [vmem:[#allocation4 + $0x8] sm:$0xff] }
 0x43d   : > { %v1611_v50 = vpop.eup %1610 }
 0x43e   : > { %1529 = vmatmul.mubr.msk.bf16.vlgmr.msra.gmra.mrb[8].mxu0 %vm547_vm4, %v951_v40  ;;  %v1099_v54 = vsel %vm547_vm4, %v1611_v50, 0.0  ;;  %v1121_v35 = vpack.c.bf16 %v1611_v50, %v1609_v21  ;;  %v1613_v57 = vpop.eup %1612 }
 0x43f   : > { %1100 = vadd.xlane.f32.xlu1 %v1099_v54  ;;  %1539 = vmatpush3.bf16.msra.mxu0 %v1123_v45  ;;  %v581_v31 = vmul.f32 %v1613_v57, %v579_v59  ;;  %v1615_v18 = vpop.eup %1614 }
 0x440   : > { %1540 = vmatprep.mubr.msk.bf16.mxu0 %vm1685_vm1, %v1684_v6  ;;  %v901_v6 = vmul.f32 1.442695, %v899_v41  ;;  %v1617_v19 = vpop.eup %1616  ;;  %v580_v48 = vmul.f32 %v1615_v18, %v578_v44  ;;  %v938_v44 = vld [vmem:[#allocation4 + $0x28] sm:$0xff] }
 0x441   : > { %v1619_v28 = vpop.eup %1618  ;;  %v755_v37 = vmul.f32 %v1617_v19, %v753_v62 }
 0x442   : > { %1620 = vpow2.f32 %v901_v6  ;;  %v754_v63 = vmul.f32 %v1619_v28, %v752_v60 }
 0x443   : > { %1622 = vpow2.f32 %v903_v29 }
 0x444   : > { %1624 = vpow2.f32 %v1071_v24 }
 0x445   : > { %1626 = vpow2.f32 %v1073_v26 }
 0x446   : > { %1541 = vmatmul.mubr.msk.bf16.vlgmr.msra.gmra.mrb[12].mxu0 %vm547_vm4, %v1121_v35 }
 0x44b   : > { %v587_v33 = vpop.xlane.xlu0 %586 }
 0x44c   : > { %v589_v25 = vadd.f32 %v587_v33, %v581_v31  ;;  %v1621_v38 = vpop.eup %1620 }
 0x44d   : > { %v1623_v39 = vpop.eup %1622  ;;  %v924_v46 = vmul.f32 %v1621_v38, %v922_v4 }
 0x44e   : > { %592 = vst.msk [vmem:[#allocation3 + $0x8] sm:$0xff] %vm434_vm2, %v589_v25  ;;  %v1625_v41 = vpop.eup %1624  ;;  %v925_v1 = vmul.f32 %v1623_v39, %v923_v8  ;;  %v767_v25 = vld [vmem:[#allocation4 + $0x10] sm:$0xff] }
 0x44f   : > { %v1627_v42 = vpop.eup %1626  ;;  %v1094_v15 = vmul.f32 %v1625_v41, %v1092_v12 }
 0x450   : > { %602 = vperm.xlu1 %1592, %v1613_v57   ;;  %v1095_v14 = vmul.f32 %v1627_v42, %v1093_v16 }
 0x451   : > { %597 = vperm.xlu0 %1593, %v1615_v18  }
 0x454   : > { %776 = vperm.xlu1 %1592, %v1617_v19  }
 0x455   : > { %771 = vperm.xlu0 %1593, %v1619_v28   ;;  %v1179_v30 = vld [vmem:[#allocation3 + $0x8] sm:$0xff] }
 0x456   : > { %1628 = vrcp.f32 %v1179_v30 }
 0x458   : > { %941 = vperm.xlu1 %1592, %v1621_v38  }
 0x459   : > { %946 = vperm.xlu0 %1593, %v1623_v39  }
 0x45c   : > { %1111 = vperm.xlu1 %1592, %v1625_v41  }
 0x45d   : > { %1116 = vperm.xlu0 %1593, %v1627_v42   ;;  %v937_v42 = vld [vmem:[#allocation4 + $0x20] sm:$0xff] }
 0x460   : > { %v1629_v43 = vpop.eup %1628 }
 0x461   : > { %1191 = vperm.xlu0 %1593, %v1629_v43  }
 0x468   : > { %v584_v49 = vpop.xlane.xlu1 %583 }
 0x469   : > { %v588_v51 = vadd.f32 %v584_v49, %v580_v48 }
 0x46b   : > { %591 = vst.msk [vmem:[#allocation3] sm:$0xff] %vm434_vm2, %v588_v51 }
 0x472   : > { %v1178_v52 = vld [vmem:[#allocation3] sm:$0xff] }
 0x473   : > { %1630 = vrcp.f32 %v1178_v52 }
 0x47d   : > { %v1631_v53 = vpop.eup %1630 }
 0x47e   : > { %1186 = vperm.xlu1 %1592, %v1631_v53  }
 0x4b8   : > { %v758_v0 = vpop.xlane.xlu1 %757 }
 0x4b9   : > { %v762_v2 = vadd.f32 %v758_v0, %v754_v63 }
 0x4ba   : > { %v761_v3 = vpop.xlane.xlu0 %760 }
 0x4bb   : > { %764 = vst.msk [vmem:[#allocation3 + $0x10] sm:$0xff] %vm434_vm2, %v762_v2  ;;  %v763_v47 = vadd.f32 %v761_v3, %v755_v37  ;;  %v1107_v2 = vld [vmem:[#allocation4 + $0x30] sm:$0xff]  ;;  %v1108_v3 = vld [vmem:[#allocation4 + $0x38] sm:$0xff] }
 0x4bd   : > { %765 = vst.msk [vmem:[#allocation3 + $0x18] sm:$0xff] %vm434_vm2, %v763_v47 }
 0x4c0   : > { %v928_v7 = vpop.xlane.xlu0 %927 }
 0x4c1   : > { %v932_v61 = vadd.f32 %v928_v7, %v924_v46 }
 0x4c2   : > { %v1198_v9 = vld [vmem:[#allocation3 + $0x10] sm:$0xff] }
 0x4c3   : > { %934 = vst.msk [vmem:[#allocation3 + $0x20] sm:$0xff] %vm434_vm2, %v932_v61  ;;  %1632 = vrcp.f32 %v1198_v9 }
 0x4c4   : > { %v931_v11 = vpop.xlane.xlu1 %930  ;;  %v1199_v5 = vld [vmem:[#allocation3 + $0x18] sm:$0xff] }
 0x4c5   : > { %v933_v13 = vadd.f32 %v931_v11, %v925_v1  ;;  %1634 = vrcp.f32 %v1199_v5 }
 0x4c7   : > { %935 = vst.msk [vmem:[#allocation3 + $0x28] sm:$0xff] %vm434_vm2, %v933_v13 }
 0x4c8   : > { %v1098_v10 = vpop.xlane.xlu0 %1097 }
 0x4c9   : > { %v1102_v20 = vadd.f32 %v1098_v10, %v1094_v15 }
 0x4ca   : > { %v1219_v22 = vld [vmem:[#allocation3 + $0x20] sm:$0xff] }
 0x4cb   : > { %1104 = vst.msk [vmem:[#allocation3 + $0x30] sm:$0xff] %vm434_vm2, %v1102_v20  ;;  %1636 = vrcp.f32 %v1219_v22 }
 0x4cc   : > { %v1101_v23 = vpop.xlane.xlu1 %1100 }
 0x4cd   : > { %v1633_v17 = vpop.eup %1632  ;;  %v1103_v21 = vadd.f32 %v1101_v23, %v1095_v14 }
 0x4ce   : > { %1207 = vperm.xlu1 %1592, %v1633_v17   ;;  %v1220_v40 = vld [vmem:[#allocation3 + $0x28] sm:$0xff] }
 0x4cf   : > { %v1635_v45 = vpop.eup %1634  ;;  %1105 = vst.msk [vmem:[#allocation3 + $0x38] sm:$0xff] %vm434_vm2, %v1103_v21  ;;  %1638 = vrcp.f32 %v1220_v40 }
 0x4d0   : > { %1212 = vperm.xlu0 %1593, %v1635_v45   ;;  %v598_v50 = vpop.permute.xlu0 %597  ;;  %v603_v54 = vpop.permute.xlu1 %602 }
 0x4d1   : > { %v605_v32 = vmul.f32 %v598_v50, %v593_v27  ;;  %v606_v35 = vmul.f32 %v603_v54, %v594_v34 }
 0x4d2   : > { %v1240_v36 = vld [vmem:[#allocation3 + $0x30] sm:$0xff] }
 0x4d3   : > { %v658_v55 = vadd.f32 %v1915_v56, %v605_v32  ;;  %v659_v57 = vadd.f32 %v1917_v58, %v606_v35  ;;  %1640 = vrcp.f32 %v1240_v36  ;;  %v768_v56 = vld [vmem:[#allocation4 + $0x18] sm:$0xff] }
 0x4d4   : > { %v772_v24 = vpop.permute.xlu0 %771  ;;  %v777_v26 = vpop.permute.xlu1 %776 }
 0x4d5   : > { %v1637_v59 = vpop.eup %1636  ;;  %660 = vst.msk [vmem:[#allocation4] sm:$0xff] %vm451_vm0, %v658_v55  ;;  %661 = vst.msk [vmem:[#allocation4 + $0x8] sm:$0xff] %vm451_vm0, %v659_v57  ;;  %v779_v58 = vmul.f32 %v772_v24, %v767_v25  ;;  %v780_v19 = vmul.f32 %v777_v26, %v768_v56 }
 0x4d6   : > { %1228 = vperm.xlu1 %1592, %v1637_v59   ;;  %v1241_v6 = vld [vmem:[#allocation3 + $0x38] sm:$0xff] }
 0x4d7   : > { %1642 = vrcp.f32 %v1241_v6 }
 0x4d8   : > { %v942_v43 = vpop.permute.xlu1 %941  ;;  %v947_v48 = vpop.permute.xlu0 %946 }
 0x4d9   : > { %v1639_v29 = vpop.eup %1638  ;;  %v949_v49 = vmul.f32 %v942_v43, %v937_v42  ;;  %v950_v52 = vmul.f32 %v947_v48, %v938_v44 }
 0x4da   : > { %1233 = vperm.xlu0 %1593, %v1639_v29  }
 0x4dc   : > { %v1112_v37 = vpop.permute.xlu1 %1111  ;;  %v1117_v47 = vpop.permute.xlu0 %1116  ;;  %v1182_v59 = vld [vmem:[#allocation4] sm:$0xff]  ;;  %v1183_v29 = vld [vmem:[#allocation4 + $0x8] sm:$0xff] }
 0x4dd   : > { %v1641_v31 = vpop.eup %1640  ;;  %v1119_v4 = vmul.f32 %v1112_v37, %v1107_v2  ;;  %v1120_v7 = vmul.f32 %v1117_v47, %v1108_v3 }
 0x4de   : > { %1249 = vperm.xlu1 %1592, %v1641_v31  }
 0x4e0   : > { %v1192_v5 = vpop.permute.xlu0 %1191 }
 0x4e1   : > { %v1643_v33 = vpop.eup %1642  ;;  %v1195_v31 = vmul.f32 %v1192_v5, %v1183_v29 }
 0x4e2   : > { %1254 = vperm.xlu0 %1593, %v1643_v33  }
 0x4fd   : > { %v1187_v12 = vpop.permute.xlu1 %1186 }
 0x4fe   : > { %v1194_v6 = vmul.f32 %v1187_v12, %v1182_v59 }
 0x500   : > { %v1196_v25 = vpack.c.bf16 %v1195_v31, %v1194_v6 }
 0x509   : > { %v822_v18 = vpop.f32.mrb[4].mxu0 }
 0x50a   : > { %v829_v28 = vadd.f32 %v822_v18, %v779_v58  ;;  %v1518_v30 = vpop.f32.mrb[5].mxu0 }
 0x50b   : > { %v825_v38 = vpop.f32.mrb[6].mxu0 }
 0x50c   : > { %831 = vst.msk [vmem:[#allocation4 + $0x10] sm:$0xff] %vm451_vm0, %v829_v28  ;;  %v830_v39 = vadd.f32 %v825_v38, %v780_v19  ;;  %v1519_v41 = vpop.f32.mrb[7].mxu0 }
 0x50e   : > { %832 = vst.msk [vmem:[#allocation4 + $0x18] sm:$0xff] %vm451_vm0, %v830_v39 }
 0x511   : > { %v992_v51 = vpop.f32.mrb[8].mxu0 }
 0x512   : > { %v999_v53 = vadd.f32 %v992_v51, %v949_v49  ;;  %v1530_v60 = vpop.f32.mrb[9].mxu0 }
 0x513   : > { %v995_v62 = vpop.f32.mrb[10].mxu0  ;;  %v1203_v15 = vld [vmem:[#allocation4 + $0x10] sm:$0xff] }
 0x514   : > { %1001 = vst.msk [vmem:[#allocation4 + $0x20] sm:$0xff] %vm451_vm0, %v999_v53  ;;  %v1000_v63 = vadd.f32 %v995_v62, %v950_v52  ;;  %v1531_v0 = vpop.f32.mrb[11].mxu0 }
 0x515   : > { %v1204_v16 = vld [vmem:[#allocation4 + $0x18] sm:$0xff] }
 0x516   : > { %1002 = vst.msk [vmem:[#allocation4 + $0x28] sm:$0xff] %vm451_vm0, %v1000_v63 }
 0x519   : > { %v1162_v46 = vpop.f32.mrb[12].mxu0 }
 0x51a   : > { %v1169_v8 = vadd.f32 %v1162_v46, %v1119_v4  ;;  %v1542_v61 = vpop.f32.mrb[13].mxu0 }
 0x51b   : > { %v1165_v9 = vpop.f32.mrb[14].mxu0  ;;  %v1224_v17 = vld [vmem:[#allocation4 + $0x20] sm:$0xff] }
 0x51c   : > { %1171 = vst.msk [vmem:[#allocation4 + $0x30] sm:$0xff] %vm451_vm0, %v1169_v8  ;;  %v1170_v1 = vadd.f32 %v1165_v9, %v1120_v7  ;;  %v1543_v11 = vpop.f32.mrb[15].mxu0 }
 0x51d   : > { %v1225_v27 = vld [vmem:[#allocation4 + $0x28] sm:$0xff] }
 0x51e   : > { %1172 = vst.msk [vmem:[#allocation4 + $0x38] sm:$0xff] %vm451_vm0, %v1170_v1 }
 0x523   : > { %v1245_v54 = vld [vmem:[#allocation4 + $0x30] sm:$0xff] }
 0x525   : > { %v1246_v35 = vld [vmem:[#allocation4 + $0x38] sm:$0xff] }
 0x54d   : > { %v1208_v13 = vpop.permute.xlu1 %1207 }
 0x54e   : > { %v1215_v20 = vmul.f32 %v1208_v13, %v1203_v15 }
 0x54f   : > { %v1213_v10 = vpop.permute.xlu0 %1212 }
 0x550   : > { %v1216_v22 = vmul.f32 %v1213_v10, %v1204_v16 }
 0x552   : > { %v1217_v14 = vpack.c.bf16 %v1216_v22, %v1215_v20 }
 0x554   : > { %1261 = vrot.lane.b32.xlu1 %v1217_v14, %s1690_s29 }
 0x555   : > { %v1229_v23 = vpop.permute.xlu1 %1228 }
 0x556   : > { %v1236_v34 = vmul.f32 %v1229_v23, %v1224_v17 }
 0x559   : > { %v1234_v21 = vpop.permute.xlu0 %1233 }
 0x55a   : > { %v1237_v40 = vmul.f32 %v1234_v21, %v1225_v27 }
 0x55c   : > { %v1238_v45 = vpack.c.bf16 %v1237_v40, %v1236_v34 }
 0x55d   : > { %v1250_v50 = vpop.permute.xlu1 %1249 }
 0x55e   : > { %1264 = vrot.lane.b32.xlu0 %v1238_v45, %s1689_s28  ;;  %v1257_v36 = vmul.f32 %v1250_v50, %v1245_v54 }
 0x561   : > { %v1255_v32 = vpop.permute.xlu0 %1254 }
 0x562   : > { %v1258_v55 = vmul.f32 %v1255_v32, %v1246_v35 }
 0x564   : > { %v1259_v57 = vpack.c.bf16 %v1258_v55, %v1257_v36 }
 0x566   : > { %1267 = vrot.lane.b32.xlu1 %v1259_v57, %s1688_s26 }
 0x5c6   : > { %v1262_v33 = vpop.permute.xlu1 %1261 }
 0x5c7   : > { %v1272_v56 = vsel %vm451_vm0, %v1196_v25, %v1262_v33 }
 0x5d0   : > { %v1265_v24 = vpop.permute.xlu0 %1264 }
 0x5d1   : > { %v1275_v26 = vsel %vm1273_vm6, %v1272_v56, %v1265_v24 }
 0x5d8   : > { %v1268_v58 = vpop.permute.xlu1 %1267 }
 0x5d9   : > { %v1278_v18 = vsel %vm1276_vm7, %v1275_v26, %v1268_v58 }
 0x5da   : > { %v1471_v19 = vcombine.low %v1278_v18, %v1278_v18  ;;  %v1472_v28 = vcombine.high %v1278_v18, %v1278_v18 }
 0x5dc   : > { %1286 = vst [vmem:[%s427_s6] sm:$0xf] %v1471_v19  ;;  %1287 = vst [vmem:[%s427_s6 + $0x4] sm:$0xf] %v1472_v28 }
 0x5dd PF: > { %s13_s16 = sadd.s32 1, %s1682_s16   ;;  %s2123_s12 = smov %s1670_s13 }
 0x5de   : > { %p10_p10 = scmp.ge.s32.totalorder %s13_s16, 4   ;;  %s2124_s13 = smov %s1750_s21 }
 0x5df   : > { %s2125_s14 = smov %s1678_s15  ;;  %s2126_s15 = smov %s2128_s17 }
 0x5e0   :  { %12 = sbr.rel (!%p10_p10) target bundleno = 3 (0x3), region = 233 }

// kernel: gpt_forward.21
= control target key start
LH: loop header
LB: loop body
LE: loop exit
PB: predicated region body
PF: predicated region fallthrough
CT: control target
= control target key end

     0   :  { %s494_s0 = inlined_call_operand.vmem [shape: f32[32,128], index: 0, kind: input, shape index: {}]   ;;  %s495_s1 = inlined_call_operand.vmem [shape: f32[1,128], index: 1, kind: input, shape index: {}]   ;;  %s496_s2 = inlined_call_operand.vmem [shape: f32[1,128], index: 2, kind: input, shape index: {}]   ;;  %s497_s3 = inlined_call_operand.vmem [shape: bf16[128,256], index: 3, kind: input, shape index: {}]   ;;  %s498_s4 = inlined_call_operand.hbm [shape: f32[32,256], index: 4, kind: output, shape index: {}]  }
   0x1   :  { %v23_v0 = vld [vmem:[%s494_s0] sm:$0xff]  ;;  %v25_v1 = vld [vmem:[%s494_s0 + $0x10] sm:$0xff]  ;;  %v24_v2 = vld [vmem:[%s494_s0 + $0x8] sm:$0xff] }
   0x2   :  { %27 = vadd.xlane.f32.xlu0 %v23_v0  ;;  %31 = vadd.xlane.f32.xlu1 %v25_v1  ;;  %v26_v3 = vld [vmem:[%s494_s0 + $0x18] sm:$0xff] }
   0x6   :  { %29 = vadd.xlane.f32.xlu0 %v24_v2  ;;  %33 = vadd.xlane.f32.xlu1 %v26_v3 }
   0x7   :  { %9 = vsyncpa [#allocation4], 0  ;;  %v311_v4 = vld [vmem:[%s497_s3 + $0x4] ss:$8 sps:$4 sm:$0xff]   ;;  %v313_v5 = vld [vmem:[%s497_s3] ss:$8 sps:$4 sm:$0xff]  }
   0x8   :  { %v314_v6 = vld [vmem:[%s497_s3 + $0x14] ss:$8 sps:$4 sm:$0xff]   ;;  %196 = vmatprep.subr.bf16.mxu0 %v311_v4  ;;  %291 = vmatprep.subr.bf16.mxu1 %v311_v4  ;;  %v316_v23 = vld [vmem:[%s497_s3 + $0x10] ss:$8 sps:$4 sm:$0xff]   ;;  %v317_v24 = vld [vmem:[%s497_s3 + $0x24] ss:$8 sps:$4 sm:$0xff]  }
   0x9   :  { %197 = vmatpush1.bf16.msra.mxu0 %v313_v5  ;;  %299 = vmatpush1.bf16.msra.mxu1 %v313_v5  ;;  %v319_v25 = vld [vmem:[%s497_s3 + $0x20] ss:$8 sps:$4 sm:$0xff]   ;;  %v320_v26 = vld [vmem:[%s497_s3 + $0x34] ss:$8 sps:$4 sm:$0xff]   ;;  %v322_v27 = vld [vmem:[%s497_s3 + $0x30] ss:$8 sps:$4 sm:$0xff]  }
   0xa   :  { %198 = vmatprep.subr.bf16.mxu0 %v314_v6  ;;  %292 = vmatprep.subr.bf16.mxu1 %v314_v6  ;;  %v323_v28 = vld [vmem:[%s497_s3 + $0x44] ss:$8 sps:$4 sm:$0xff]   ;;  %v325_v29 = vld [vmem:[%s497_s3 + $0x40] ss:$8 sps:$4 sm:$0xff]   ;;  %v326_v30 = vld [vmem:[%s497_s3 + $0x54] ss:$8 sps:$4 sm:$0xff]  }
   0xb   :  { %v328_v31 = vld [vmem:[%s497_s3 + $0x50] ss:$8 sps:$4 sm:$0xff]   ;;  %v329_v32 = vld [vmem:[%s497_s3 + $0x64] ss:$8 sps:$4 sm:$0xff]   ;;  %v367_v33 = vmov 0  }
   0xc   :  { %228 = vmatprep.mubr.bf16.mxu0 %v367_v33  ;;  %238 = vmatprep.mubr.bf16.mxu1 %v367_v33  ;;  %v331_v34 = vld [vmem:[%s497_s3 + $0x60] ss:$8 sps:$4 sm:$0xff]   ;;  %v332_v35 = vld [vmem:[%s497_s3 + $0x74] ss:$8 sps:$4 sm:$0xff]   ;;  %v334_v36 = vld [vmem:[%s497_s3 + $0x70] ss:$8 sps:$4 sm:$0xff]  }
   0xd   :  { %199 = vmatpush1.bf16.msra.mxu0 %v316_v23  ;;  %300 = vmatpush1.bf16.msra.mxu1 %v316_v23  ;;  %v273_v51 = vld [vmem:[%s495_s1] ss:$0 sm:$0xff]  ;;  %s368_s1 = smov [#allocation3]  }
   0xe   :  { %200 = vmatprep.subr.bf16.mxu0 %v317_v24  ;;  %293 = vmatprep.subr.bf16.mxu1 %v317_v24  ;;  %v274_v56 = vld [vmem:[%s496_s2] ss:$0 sm:$0xff]  ;;  %s262_s2 = sshll.u32 %s368_s1, 4  ;;  %s263_s2 = int_to_ptr.vmem [resolvable:$true] %s262_s2 }
   0xf   :  { %s343_s30 = scalar_lea.vmem %s263_s2, 1024  ;;  %p348_p1 = scmp.lt.s32.totalorder %s263_s2, %s263_s2 }
  0x10   :  { %p344_p0 = scmp.ne.s32.totalorder %s263_s2, %s343_s30  ;;  %p349_p2 = scmp.lt.s32.totalorder %s343_s30, %s343_s30 }
  0x11   :  { %201 = vmatpush1.bf16.msra.mxu0 %v319_v25  ;;  %301 = vmatpush1.bf16.msra.mxu1 %v319_v25 }
  0x12   :  { %202 = vmatprep.subr.bf16.mxu0 %v320_v26  ;;  %294 = vmatprep.subr.bf16.mxu1 %v320_v26  ;;  %p350_p3 = por %p349_p2, %p348_p1 }
  0x14   :  { %p351_p4 = pnand %p350_p3, %p344_p0 }
  0x15   :  { %203 = vmatpush1.bf16.msra.mxu0 %v322_v27  ;;  %302 = vmatpush1.bf16.msra.mxu1 %v322_v27 }
  0x16   :  { %204 = vmatprep.subr.bf16.mxu0 %v323_v28  ;;  %295 = vmatprep.subr.bf16.mxu1 %v323_v28 }
  0x19   :  { %205 = vmatpush1.bf16.msra.mxu0 %v325_v29  ;;  %303 = vmatpush1.bf16.msra.mxu1 %v325_v29 }
  0x1a   :  { %206 = vmatprep.subr.bf16.mxu0 %v326_v30  ;;  %296 = vmatprep.subr.bf16.mxu1 %v326_v30 }
  0x1d   :  { %207 = vmatpush1.bf16.msra.mxu0 %v328_v31  ;;  %304 = vmatpush1.bf16.msra.mxu1 %v328_v31 }
  0x1e   :  { %208 = vmatprep.subr.bf16.mxu0 %v329_v32  ;;  %297 = vmatprep.subr.bf16.mxu1 %v329_v32 }
  0x21   :  { %209 = vmatpush1.bf16.msra.mxu0 %v331_v34  ;;  %305 = vmatpush1.bf16.msra.mxu1 %v331_v34 }
  0x22   :  { %210 = vmatprep.subr.bf16.mxu0 %v332_v35  ;;  %298 = vmatprep.subr.bf16.mxu1 %v332_v35 }
  0x25   :  { %211 = vmatpush1.bf16.msra.mxu0 %v334_v36  ;;  %306 = vmatpush1.bf16.msra.mxu1 %v334_v36 }
  0x8f   :  { %v28_v7 = vpop.xlane.xlu0 %27  ;;  %v32_v8 = vpop.xlane.xlu1 %31 }
  0x90   :  { %v36_v9 = vmul.f32 0.0078125, %v28_v7  ;;  %v38_v10 = vmul.f32 0.0078125, %v32_v8 }
  0x92   :  { %v417_v11 = vsub.f32 %v23_v0, %v36_v9  ;;  %v419_v12 = vsub.f32 %v25_v1, %v38_v10 }
  0x93   :  { %v30_v13 = vpop.xlane.xlu0 %29  ;;  %v34_v14 = vpop.xlane.xlu1 %33 }
  0x94   :  { %v37_v15 = vmul.f32 0.0078125, %v30_v13  ;;  %v44_v16 = vmul.f32 %v417_v11, %v417_v11  ;;  %v39_v17 = vmul.f32 0.0078125, %v34_v14  ;;  %v46_v20 = vmul.f32 %v419_v12, %v419_v12 }
  0x96   :  { %v423_v18 = vsub.f32 %v24_v2, %v37_v15  ;;  %48 = vadd.xlane.f32.xlu0 %v44_v16  ;;  %v425_v19 = vsub.f32 %v26_v3, %v39_v17 }
  0x98   :  { %v45_v21 = vmul.f32 %v423_v18, %v423_v18  ;;  %v47_v22 = vmul.f32 %v425_v19, %v425_v19 }
  0x9a   :  { %52 = vadd.xlane.f32.xlu0 %v46_v20  ;;  %50 = vadd.xlane.f32.xlu1 %v45_v21 }
  0x9e   :  { %54 = vadd.xlane.f32.xlu1 %v47_v22 }
 0x123   :  { %v49_v37 = vpop.xlane.xlu0 %48 }
 0x124   :  { %v56_v38 = vmul.f32 0.0078125, %v49_v37 }
 0x126   :  { %v60_v39 = vadd.f32 1e-05, %v56_v38 }
 0x127   :  { %v51_v40 = vpop.xlane.xlu1 %50  ;;  %v53_v41 = vpop.xlane.xlu0 %52 }
 0x128   :  { %335 = vrsqrt.f32 %v60_v39  ;;  %v57_v42 = vmul.f32 0.0078125, %v51_v40  ;;  %v58_v43 = vmul.f32 0.0078125, %v53_v41 }
 0x12a   :  { %v61_v44 = vadd.f32 1e-05, %v57_v42  ;;  %v62_v45 = vadd.f32 1e-05, %v58_v43 }
 0x12b   :  { %v55_v46 = vpop.xlane.xlu1 %54 }
 0x12c   :  { %337 = vrsqrt.f32 %v61_v44  ;;  %v59_v47 = vmul.f32 0.0078125, %v55_v46 }
 0x12d   :  { %339 = vrsqrt.f32 %v62_v45 }
 0x12e   :  { %v63_v48 = vadd.f32 1e-05, %v59_v47 }
 0x130   :  { %341 = vrsqrt.f32 %v63_v48 }
 0x132   :  { %v336_v49 = vpop.eup %335 }
 0x133   :  { %v68_v50 = vmul.f32 %v336_v49, %v417_v11 }
 0x135   :  { %v79_v55 = vmul.f32 %v273_v51, %v68_v50 }
 0x136   :  { %v338_v52 = vpop.eup %337 }
 0x137   :  { %v340_v53 = vpop.eup %339  ;;  %v69_v54 = vmul.f32 %v338_v52, %v423_v18  ;;  %v90_v60 = vadd.f32 %v274_v56, %v79_v55 }
 0x138   :  { %v70_v57 = vmul.f32 %v340_v53, %v419_v12 }
 0x139   :  { %v80_v58 = vmul.f32 %v273_v51, %v69_v54 }
 0x13a   :  { %v342_v59 = vpop.eup %341  ;;  %v81_v63 = vmul.f32 %v273_v51, %v70_v57 }
 0x13b   :  { %v91_v61 = vadd.f32 %v274_v56, %v80_v58  ;;  %v71_v62 = vmul.f32 %v342_v59, %v425_v19 }
 0x13c   :  { %v92_v2 = vadd.f32 %v274_v56, %v81_v63 }
 0x13d   :  { %v94_v0 = vpack.c.bf16 %v91_v61, %v90_v60  ;;  %v82_v1 = vmul.f32 %v273_v51, %v71_v62 }
 0x13f   :  { %229 = vmatmul.mubr.bf16.vlgmr.msra.gmra.mrb[0].mxu0 %v94_v0  ;;  %v93_v3 = vadd.f32 %v274_v56, %v82_v1 }
 0x141   :  { %v95_v4 = vpack.c.bf16 %v93_v3, %v92_v2 }
 0x143   :  { %239 = vmatmul.mubr.bf16.vlgmr.msra.gmra.mrb[0].mxu1 %v95_v4 }
 0x212   :  { %v230_v5 = vpop.f32.mrb[0].mxu0 }
 0x213   :  { %249 = vst [vmem:[#allocation3] sm:$0xff] %v230_v5  ;;  %v232_v6 = vpop.f32.mrb[1].mxu0 }
 0x214   :  { %250 = vst [vmem:[#allocation3 + $0x8] sm:$0xff] %v232_v6  ;;  %v234_v7 = vpop.f32.mrb[2].mxu0 }
 0x215   :  { %251 = vst [vmem:[#allocation3 + $0x10] sm:$0xff] %v234_v7  ;;  %v236_v8 = vpop.f32.mrb[3].mxu0 }
 0x216   :  { %252 = vst [vmem:[#allocation3 + $0x18] sm:$0xff] %v236_v8  ;;  %v240_v9 = vpop.f32.mrb[0].mxu1 }
 0x217   :  { %253 = vst [vmem:[#allocation3 + $0x20] sm:$0xff] %v240_v9  ;;  %v242_v10 = vpop.f32.mrb[1].mxu1 }
 0x218   :  { %254 = vst [vmem:[#allocation3 + $0x28] sm:$0xff] %v242_v10  ;;  %v244_v11 = vpop.f32.mrb[2].mxu1 }
 0x219   :  { %255 = vst [vmem:[#allocation3 + $0x30] sm:$0xff] %v244_v11  ;;  %v246_v12 = vpop.f32.mrb[3].mxu1 }
 0x21a   :  { %256 = vst [vmem:[#allocation3 + $0x38] sm:$0xff] %v246_v12 }
 0x21b   :  { %354 = shalt.err (!%p351_p4)
}
 0x21c   :  { %s355_s7 = scalar_lea.hbm %s498_s4, 1024 }
 0x21d   :  { %p356_p5 = scmp.ne.s32.totalorder %s498_s4, %s355_s7  ;;  %p359_p6 = scmp.lt.u32.totalorder %s355_s7, %s498_s4 }
 0x21f   :  { %p361_p7 = pnand %p359_p6, %p356_p5 }
 0x221   :  { %364 = shalt.err (!%p361_p7)
}
 0x222   :  { %s369_s12 = smov 256   ;;  %s370_s13 = smov 16  }
 0x223   :  { %268 = dma.vmem_to_hbm [thread:$0]  %s263_s2, 1024, %s498_s4, [#allocation4], %s369_s12, %s369_s12, %s370_s13  }
 0x224   :  { %365 = dma.done.wait [#allocation4], 1024  }
 0x225   :  { %366 = vsyncadd [#allocation4], 4294966272 }
 0x226   :  { %272 = vsyncpa [#allocation4], 1 }

// kernel: gpt_forward.15
= control target key start
LH: loop header
LB: loop body
LE: loop exit
PB: predicated region body
PF: predicated region fallthrough
CT: control target
= control target key end

     0   :  { %s787_s1 = inlined_call_operand.vmem [shape: bf16[512,128], index: 1, kind: input, shape index: {}]   ;;  %s788_s0 = inlined_call_operand.vmem [shape: bf16[32,512], index: 0, kind: input, shape index: {}]   ;;  %s789_s2 = inlined_call_operand.vmem [shape: f32[1,128], index: 2, kind: input, shape index: {}]   ;;  %s790_s3 = inlined_call_operand.vmem [shape: f32[32,128], index: 3, kind: input, shape index: {}]   ;;  %s791_s4 = inlined_call_operand.vmem [shape: f32[32,128], index: 4, kind: output, shape index: {}]  }
   0x1   :  { %v571_v0 = vld [vmem:[%s787_s1 + $0x40] sm:$0xff]   ;;  %v575_v4 = vld [vmem:[%s787_s1 + $0x48] sm:$0xff]   ;;  %v579_v8 = vld [vmem:[%s787_s1 + $0x50] sm:$0xff]  }
   0x2   :  { %v572_v1 = vld [vmem:[%s787_s1 + $0xc0] sm:$0xff]   ;;  %515 = vmatprep.subr.bf16.mxu0 %v571_v0  ;;  %v576_v5 = vld [vmem:[%s787_s1 + $0xc8] sm:$0xff]   ;;  %v580_v9 = vld [vmem:[%s787_s1 + $0xd0] sm:$0xff]  }
   0x3   :  { %v573_v2 = vld [vmem:[%s787_s1] sm:$0xff]   ;;  %543 = vmatprep.subr.bf16.mxu1 %v572_v1  ;;  %v577_v6 = vld [vmem:[%s787_s1 + $0x8] sm:$0xff]   ;;  %v581_v10 = vld [vmem:[%s787_s1 + $0x10] sm:$0xff]  }
   0x4   :  { %v574_v3 = vld [vmem:[%s787_s1 + $0x80] sm:$0xff]   ;;  %516 = vmatpush3.bf16.msra.mxu0 %v573_v2  ;;  %v578_v7 = vld [vmem:[%s787_s1 + $0x88] sm:$0xff]   ;;  %v582_v11 = vld [vmem:[%s787_s1 + $0x90] sm:$0xff]  }
   0x5   :  { %544 = vmatpush3.bf16.msra.mxu1 %v574_v3  ;;  %517 = vmatprep.subr.bf16.mxu0 %v575_v4  ;;  %v583_v12 = vld [vmem:[%s787_s1 + $0x58] sm:$0xff]   ;;  %v587_v16 = vld [vmem:[%s787_s1 + $0x60] sm:$0xff]   ;;  %v591_v20 = vld [vmem:[%s787_s1 + $0x68] sm:$0xff]  }
   0x6   :  { %545 = vmatprep.subr.bf16.mxu1 %v576_v5  ;;  %v584_v13 = vld [vmem:[%s787_s1 + $0xd8] sm:$0xff]   ;;  %v588_v17 = vld [vmem:[%s787_s1 + $0xe0] sm:$0xff]   ;;  %v592_v21 = vld [vmem:[%s787_s1 + $0xe8] sm:$0xff]  }
   0x7   :  { %v585_v14 = vld [vmem:[%s787_s1 + $0x18] sm:$0xff]   ;;  %v589_v18 = vld [vmem:[%s787_s1 + $0x20] sm:$0xff]   ;;  %v593_v22 = vld [vmem:[%s787_s1 + $0x28] sm:$0xff]  }
   0x8   :  { %518 = vmatpush3.bf16.msra.mxu0 %v577_v6  ;;  %v586_v15 = vld [vmem:[%s787_s1 + $0x98] sm:$0xff]   ;;  %v590_v19 = vld [vmem:[%s787_s1 + $0xa0] sm:$0xff]   ;;  %v594_v23 = vld [vmem:[%s787_s1 + $0xa8] sm:$0xff]  }
   0x9   :  { %546 = vmatpush3.bf16.msra.mxu1 %v578_v7  ;;  %519 = vmatprep.subr.bf16.mxu0 %v579_v8  ;;  %v595_v24 = vld [vmem:[%s787_s1 + $0x70] sm:$0xff]   ;;  %v599_v28 = vld [vmem:[%s787_s1 + $0x78] sm:$0xff]   ;;  %v514_v49 = vld [vmem:[%s789_s2] ss:$0 sm:$0xff] }
   0xa   :  { %547 = vmatprep.subr.bf16.mxu1 %v580_v9  ;;  %v596_v25 = vld [vmem:[%s787_s1 + $0xf0] sm:$0xff]   ;;  %v600_v29 = vld [vmem:[%s787_s1 + $0xf8] sm:$0xff]   ;;  %v458_v54 = vld [vmem:[%s790_s3] sm:$0xff] }
   0xb   :  { %v597_v26 = vld [vmem:[%s787_s1 + $0x30] sm:$0xff]   ;;  %v601_v30 = vld [vmem:[%s787_s1 + $0x38] sm:$0xff]   ;;  %v459_v57 = vld [vmem:[%s790_s3 + $0x8] sm:$0xff] }
   0xc   :  { %520 = vmatpush3.bf16.msra.mxu0 %v581_v10  ;;  %v598_v27 = vld [vmem:[%s787_s1 + $0xb0] sm:$0xff]   ;;  %v602_v31 = vld [vmem:[%s787_s1 + $0xb8] sm:$0xff]  }
   0xd   :  { %548 = vmatpush3.bf16.msra.mxu1 %v582_v11  ;;  %521 = vmatprep.subr.bf16.mxu0 %v583_v12  ;;  %v603_v32 = vld [vmem:[%s788_s0] ss:$16 sps:$4 sm:$0xff]   ;;  %v605_v33 = vld [vmem:[%s788_s0 + $0x4] ss:$16 sps:$4 sm:$0xff]   ;;  %v606_v34 = vld [vmem:[%s788_s0 + $0x8] ss:$16 sps:$4 sm:$0xff]  }
   0xe   :  { %549 = vmatprep.subr.bf16.mxu1 %v584_v13  ;;  %v608_v35 = vld [vmem:[%s788_s0 + $0xc] ss:$16 sps:$4 sm:$0xff]   ;;  %366 = vmatprep.mubr.bf16.mxu0 %v605_v33  ;;  %v609_v36 = vld [vmem:[%s788_s0 + $0x24] ss:$16 sps:$4 sm:$0xff]   ;;  %v613_v38 = vld [vmem:[%s788_s0 + $0x20] ss:$16 sps:$4 sm:$0xff]  }
   0xf   :  { %415 = vmatprep.mubr.bf16.mxu1 %v608_v35  ;;  %v611_v37 = vld [vmem:[%s788_s0 + $0x2c] ss:$16 sps:$4 sm:$0xff]   ;;  %v614_v39 = vld [vmem:[%s788_s0 + $0x28] ss:$16 sps:$4 sm:$0xff]   ;;  %v460_v10 = vld [vmem:[%s790_s3 + $0x10] sm:$0xff] }
  0x10   :  { %522 = vmatpush3.bf16.msra.mxu0 %v585_v14  ;;  %v461_v13 = vld [vmem:[%s790_s3 + $0x18] sm:$0xff] }
  0x11   :  { %550 = vmatpush3.bf16.msra.mxu1 %v586_v15  ;;  %523 = vmatprep.subr.bf16.mxu0 %v587_v16 }
  0x12   :  { %551 = vmatprep.subr.bf16.mxu1 %v588_v17 }
  0x14   :  { %524 = vmatpush3.bf16.msra.mxu0 %v589_v18 }
  0x15   :  { %552 = vmatpush3.bf16.msra.mxu1 %v590_v19  ;;  %525 = vmatprep.subr.bf16.mxu0 %v591_v20 }
  0x16   :  { %553 = vmatprep.subr.bf16.mxu1 %v592_v21 }
  0x18   :  { %526 = vmatpush3.bf16.msra.mxu0 %v593_v22 }
  0x19   :  { %554 = vmatpush3.bf16.msra.mxu1 %v594_v23  ;;  %527 = vmatprep.subr.bf16.mxu0 %v595_v24 }
  0x1a   :  { %555 = vmatprep.subr.bf16.mxu1 %v596_v25 }
  0x1c   :  { %528 = vmatpush3.bf16.msra.mxu0 %v597_v26 }
  0x1d   :  { %556 = vmatpush3.bf16.msra.mxu1 %v598_v27  ;;  %529 = vmatprep.subr.bf16.mxu0 %v599_v28 }
  0x1e   :  { %557 = vmatprep.subr.bf16.mxu1 %v600_v29 }
  0x20   :  { %530 = vmatpush3.bf16.msra.mxu0 %v601_v30 }
  0x21   :  { %558 = vmatpush3.bf16.msra.mxu1 %v602_v31 }
  0x23   :  { %367 = vmatmul.mubr.bf16.vlgmr.msra.gmra.mrb[0].mxu0 %v603_v32 }
  0x24   :  { %416 = vmatmul.mubr.bf16.vlgmr.msra.gmra.mrb[0].mxu1 %v606_v34  ;;  %374 = vmatprep.mubr.bf16.mxu0 %v609_v36 }
  0x25   :  { %423 = vmatprep.mubr.bf16.mxu1 %v611_v37 }
  0x2b   :  { %375 = vmatmul.mubr.bf16.gmra.mrb[4].mxu0 %v613_v38 }
  0x2c   :  { %424 = vmatmul.mubr.bf16.gmra.mrb[4].mxu1 %v614_v39 }
  0xf6   :  { %v531_v40 = vpop.f32.mrb[0].mxu0 }
  0xf7   :  { %v559_v41 = vpop.f32.mrb[0].mxu1  ;;  %v532_v42 = vpop.f32.mrb[1].mxu0 }
  0xf8   :  { %v533_v43 = vadd.f32 %v532_v42, %v531_v40  ;;  %v560_v44 = vpop.f32.mrb[1].mxu1  ;;  %v534_v45 = vpop.f32.mrb[2].mxu0 }
  0xf9   :  { %v561_v46 = vadd.f32 %v560_v44, %v559_v41  ;;  %v562_v47 = vpop.f32.mrb[2].mxu1  ;;  %v535_v48 = vpop.f32.mrb[3].mxu0 }
  0xfa   :  { %v536_v50 = vadd.f32 %v535_v48, %v534_v45  ;;  %v563_v51 = vpop.f32.mrb[3].mxu1 }
  0xfb   :  { %v418_v52 = vadd.f32 %v561_v46, %v533_v43  ;;  %v564_v53 = vadd.f32 %v563_v51, %v562_v47 }
  0xfd   :  { %v454_v55 = vadd.f32 %v514_v49, %v418_v52  ;;  %v421_v56 = vadd.f32 %v564_v53, %v536_v50 }
  0xfe   :  { %v537_v58 = vpop.f32.mrb[4].mxu0 }
  0xff   :  { %v462_v59 = vadd.f32 %v458_v54, %v454_v55  ;;  %v455_v60 = vadd.f32 %v514_v49, %v421_v56  ;;  %v565_v61 = vpop.f32.mrb[4].mxu1  ;;  %v538_v62 = vpop.f32.mrb[5].mxu0 }
 0x100   :  { %v539_v63 = vadd.f32 %v538_v62, %v537_v58  ;;  %v566_v0 = vpop.f32.mrb[5].mxu1  ;;  %v540_v1 = vpop.f32.mrb[6].mxu0 }
 0x101   :  { %466 = vst [vmem:[%s791_s4] sm:$0xff] %v462_v59  ;;  %v463_v2 = vadd.f32 %v459_v57, %v455_v60  ;;  %v567_v3 = vadd.f32 %v566_v0, %v565_v61  ;;  %v568_v4 = vpop.f32.mrb[6].mxu1  ;;  %v541_v5 = vpop.f32.mrb[7].mxu0 }
 0x102   :  { %v542_v6 = vadd.f32 %v541_v5, %v540_v1  ;;  %v569_v7 = vpop.f32.mrb[7].mxu1 }
 0x103   :  { %467 = vst [vmem:[%s791_s4 + $0x8] sm:$0xff] %v463_v2  ;;  %v426_v8 = vadd.f32 %v567_v3, %v539_v63  ;;  %v570_v9 = vadd.f32 %v569_v7, %v568_v4 }
 0x105   :  { %v456_v11 = vadd.f32 %v514_v49, %v426_v8  ;;  %v429_v12 = vadd.f32 %v570_v9, %v542_v6 }
 0x107   :  { %v464_v14 = vadd.f32 %v460_v10, %v456_v11  ;;  %v457_v15 = vadd.f32 %v514_v49, %v429_v12 }
 0x109   :  { %468 = vst [vmem:[%s791_s4 + $0x10] sm:$0xff] %v464_v14  ;;  %v465_v16 = vadd.f32 %v461_v13, %v457_v15 }
 0x10b   :  { %469 = vst [vmem:[%s791_s4 + $0x18] sm:$0xff] %v465_v16 }

</bundles_post_ra>
